<compile_context>
chip_gen: v6e
topology: v6e:2x2x1
jax: 0.10.0
libtpu: 0.0.40
codegen_flags: <defaults>
</compile_context>

<pallas_src>
import functools

import jax
import jax.numpy as jnp
from jax.experimental import pallas as pl
from jax.experimental.pallas import tpu as pltpu

KSIZE = 7
PAD = 3
LANES = 128


def _spatial_attn_kernel(w_ref, b_ref, x_ref, o_ref, *, H, W, C, G, GB, Wseg, Hp, L):
    # w_ref: SMEM (2*7*7,) f32, b_ref: SMEM (1,) f32
    # x_ref: VMEM (GB*G, C, H*W) -- lane-dense input block
    # o_ref: VMEM (GB, H, L)     -- lane-dense output slab, L % 128 == 0
    inv_c = 1.0 / C
    flip = Hp >= 48  # cap vreg pressure for tall images (extra lane rolls -> XLU)

    for gb in range(GB):
        # ---- fused channel mean / max: one pass over x, f32 accumulation ----
        x0 = x_ref[pl.ds(gb * G, G), 0, :].astype(jnp.float32)        # (G, H*W)
        s = x0
        m = x0
        for c in range(1, C):
            xc = x_ref[pl.ds(gb * G, G), c, :].astype(jnp.float32)
            s = s + xc
            m = jnp.maximum(m, xc)
        pooled = ((s * inv_c).reshape(G, H, W),      # channel 0 = avg
                  m.reshape(G, H, W))                # channel 1 = max

        # ---- build the lane-packed, zero-haloed planes fully in registers ----
        # Each of the G segments is W data columns + (Wseg-W) >= PAD zero columns;
        # rows H..Hp-1 are zero.  The zero halos absorb the circular wrap of the
        # rolls, so no edge masks are needed and each step is self-contained.
        planes = []
        for pc in pooled:
            pieces = []
            zcols = jnp.zeros((H, Wseg - W), jnp.float32)
            for g in range(G):
                pieces.append(pc[g])
                pieces.append(zcols)
            if L > G * Wseg:
                pieces.append(jnp.zeros((H, L - G * Wseg), jnp.float32))
            row = jnp.concatenate(pieces, axis=1)                       # (H, L)
            plane = jnp.concatenate(
                [row, jnp.zeros((Hp - H, L), jnp.float32)], axis=0)     # (Hp, L)
            planes.append(plane)

        # ---- 7x7 "same" conv (2 -> 1 channels) via roll-shift-accumulate ----
        if not flip:
            # 14 lane rolls total, 7 live (Hp, L) partials, 6 sublane rolls.
            parts = [None] * KSIZE
            for c in range(2):
                plane = planes[c]
                for dj in range(-PAD, PAD + 1):
                    t = plane if dj == 0 else pltpu.roll(plane, (-dj) % L, axis=1)
                    for di in range(-PAD, PAD + 1):
                        wv = w_ref[c * KSIZE * KSIZE + (di + PAD) * KSIZE + (dj + PAD)]
                        k = di + PAD
                        parts[k] = wv * t if parts[k] is None else parts[k] + wv * t
            acc = parts[PAD]
            for di in range(-PAD, PAD + 1):
                if di == 0:
                    continue
                acc = acc + pltpu.roll(parts[di + PAD], (-di) % Hp, axis=0)
        else:
            # row-offset outermost: only one partial live at a time (no spills for
            # tall Hp); lane rolls recomputed per di land on the XLU, which has slack.
            acc = None
            for di in range(-PAD, PAD + 1):
                part = None
                for c in range(2):
                    plane = planes[c]
                    for dj in range(-PAD, PAD + 1):
                        t = plane if dj == 0 else pltpu.roll(plane, (-dj) % L, axis=1)
                        wv = w_ref[c * KSIZE * KSIZE + (di + PAD) * KSIZE + (dj + PAD)]
                        part = wv * t if part is None else part + wv * t
                sh = part if di == 0 else pltpu.roll(part, (-di) % Hp, axis=0)
                acc = sh if acc is None else acc + sh

        y = acc[:H, :] + b_ref[0]
        # LogSigmoid, numerically stable: min(y, 0) - log1p(exp(-|y|))
        out = jnp.minimum(y, 0.0) - jnp.log1p(jnp.exp(-jnp.abs(y)))
        o_ref[gb] = out.astype(o_ref.dtype)


def spatial_attention(x, weight, bias):
    """x: (N, C, H, W); weight: (1, 2, 7, 7); bias: (1,).  Returns (N, 1, H, W)."""
    N, C, H, W = x.shape
    w_flat = weight.reshape(-1).astype(jnp.float32)        # (2*7*7,)
    b = bias.reshape(-1).astype(jnp.float32)               # (1,)

    # ---- lane packing geometry ----
    Wseg = W + PAD                                         # segment width incl. halo
    G = max(1, LANES // Wseg)                              # planes per lane-group
    L = -(-(G * Wseg) // LANES) * LANES                    # slab width, multiple of 128
    Hp = -(-(H + PAD) // 8) * 8                            # sublane-padded height
    # circular-wrap safety: halos must be at least PAD wide/tall
    assert Wseg - W >= PAD and Hp - H >= PAD
    assert L % LANES == 0 and L >= G * Wseg

    # ---- groups per grid step: amortize per-step overhead, bound VMEM ----
    itemsize = x.dtype.itemsize
    n_groups = -(-N // G)
    per_group = 2 * (G * C * H * W + H * L) * itemsize     # double-buffered in + out
    GB = int(max(1, min(n_groups, (24 * 1024 * 1024) // max(per_group, 1), 8)))
    n_steps = -(-n_groups // GB)
    N_pad = n_steps * GB * G                               # pad N instead of shrinking G

    xp = x
    if N_pad != N:
        xp = jnp.pad(x, ((0, N_pad - N), (0, 0), (0, 0), (0, 0)))
    xp = xp.reshape(N_pad, C, H * W)                       # contiguous, lane-dense

    # actual VMEM requirement (+ slack), capped well under v7x's 64 MiB physical VMEM
    vmem_need = GB * per_group + 4 * Hp * L * 4
    vmem_limit = int(min(max(4 * vmem_need, 16 * 1024 * 1024), 48 * 1024 * 1024))

    kernel = functools.partial(_spatial_attn_kernel, H=H, W=W, C=C, G=G, GB=GB,
                               Wseg=Wseg, Hp=Hp, L=L)
    out_packed = pl.pallas_call(
        kernel,
        out_shape=jax.ShapeDtypeStruct((n_steps * GB, H, L), x.dtype),
        grid=(n_steps,),
        in_specs=[
            pl.BlockSpec(memory_space=pltpu.MemorySpace.SMEM),      # conv weights
            pl.BlockSpec(memory_space=pltpu.MemorySpace.SMEM),      # conv bias
            # lane-dense input block: GB*G batch planes, full C and H*W per step
            # TODO(synk): on v6e consider pipeline_mode=pl.Buffered(3) here if the
            # input DMA shows up exposed after enlarging GB.
            pl.BlockSpec((GB * G, C, H * W), lambda s: (s, 0, 0)),
        ],
        out_specs=pl.BlockSpec((GB, H, L), lambda s: (s, 0, 0)),    # lane-dense slab
        compiler_params=pltpu.CompilerParams(
            dimension_semantics=("parallel",),
            vmem_limit_bytes=vmem_limit,
        ),
    )(w_flat, b, xp)

    # ---- unpack the lane-packed slabs back to NCHW (layout plumbing only) ----
    P = n_steps * GB
    out = out_packed[:, :, :G * Wseg].reshape(P, H, G, Wseg)
    out = out.transpose(0, 2, 1, 3).reshape(P * G, H, Wseg)[:N, :, :W]
    return out.reshape(N, 1, H, W)


def _reference(x, weight, bias):
    # pure-JAX reference of the PyTorch forward
    avg_out = jnp.mean(x, axis=1, keepdims=True)
    max_out = jnp.max(x, axis=1, keepdims=True)
    cat = jnp.concatenate([avg_out, max_out], axis=1)        # (N, 2, H, W)
    y = jax.lax.conv_general_dilated(
        cat, weight, window_strides=(1, 1), padding=((PAD, PAD), (PAD, PAD)),
        dimension_numbers=("NCHW", "OIHW", "NCHW"))
    y = y + bias.reshape(1, 1, 1, 1)
    return jax.nn.log_sigmoid(y)


if __name__ == "__main__":
    key = jax.random.PRNGKey(0)
    kx, kw, kb = jax.random.split(key, 3)

    N, C, H, W = 2, 4, 16, 16
    x = jax.random.normal(kx, (N, C, H, W), dtype=jnp.float32)

    # deterministic Conv2d(2, 1, kernel_size=7) parameters
    fan_in = 2 * KSIZE * KSIZE
    bound = 1.0 / (fan_in ** 0.5)
    weight = jax.random.uniform(kw, (1, 2, KSIZE, KSIZE),
                                minval=-bound, maxval=bound, dtype=jnp.float32)
    bias = jax.random.uniform(kb, (1,), minval=-bound, maxval=bound,
                              dtype=jnp.float32)

    out = jax.block_until_ready(spatial_attention(x, weight, bias))
    ref = _reference(x, weight, bias)

    assert out.shape == (N, 1, H, W), out.shape
    err = float(jnp.max(jnp.abs(out - ref)))
    assert jnp.allclose(out, ref, atol=1e-4, rtol=1e-4), err
    print("KERNEL_OK")
</pallas_src>

<mosaic_0001>
module attributes {stable_mosaic.version = 11 : i64} {
  func.func @_spatial_attn_kernel(%arg0: i32, %arg1: memref<98xf32, #tpu.memory_space<smem>>, %arg2: memref<1xf32, #tpu.memory_space<smem>>, %arg3: memref<6x4x256xf32, #tpu.memory_space<vmem>>, %arg4: memref<1x16x128xf32, #tpu.memory_space<vmem>>) attributes {dimension_semantics = [#tpu.dimension_semantics<parallel>], iteration_bounds = array<i64: 1>, scalar_prefetch = 0 : i64, scratch_operands = 0 : i64, tpu.core_type = #tpu.core_type<tc>, window_params = [{transform_indices = @transform_0, window_bounds = array<i64: 98>}, {transform_indices = @transform_1, window_bounds = array<i64: 1>}, {transform_indices = @transform_2, window_bounds = array<i64: 6, 4, 256>}, {transform_indices = @transform_3, window_bounds = array<i64: 1, 16, 128>}]} {
    %c0 = arith.constant 0 : index
    %c0_0 = arith.constant 0 : index
    %c0_1 = arith.constant 0 : index
    %0 = vector.load %arg3[%c0, %c0_0, %c0_1] : memref<6x4x256xf32, #tpu.memory_space<vmem>>, vector<6x1x256xf32>
    %1 = vector.shape_cast %0 : vector<6x1x256xf32> to vector<6x256xf32>
    %c0_2 = arith.constant 0 : index
    %c1 = arith.constant 1 : index
    %c0_3 = arith.constant 0 : index
    %2 = vector.load %arg3[%c0_2, %c1, %c0_3] : memref<6x4x256xf32, #tpu.memory_space<vmem>>, vector<6x1x256xf32>
    %3 = vector.shape_cast %2 : vector<6x1x256xf32> to vector<6x256xf32>
    %4 = arith.addf %1, %3 : vector<6x256xf32>
    %5 = arith.maximumf %1, %3 : vector<6x256xf32>
    %c0_4 = arith.constant 0 : index
    %c2 = arith.constant 2 : index
    %c0_5 = arith.constant 0 : index
    %6 = vector.load %arg3[%c0_4, %c2, %c0_5] : memref<6x4x256xf32, #tpu.memory_space<vmem>>, vector<6x1x256xf32>
    %7 = vector.shape_cast %6 : vector<6x1x256xf32> to vector<6x256xf32>
    %8 = arith.addf %4, %7 : vector<6x256xf32>
    %9 = arith.maximumf %5, %7 : vector<6x256xf32>
    %c0_6 = arith.constant 0 : index
    %c3 = arith.constant 3 : index
    %c0_7 = arith.constant 0 : index
    %10 = vector.load %arg3[%c0_6, %c3, %c0_7] : memref<6x4x256xf32, #tpu.memory_space<vmem>>, vector<6x1x256xf32>
    %11 = vector.shape_cast %10 : vector<6x1x256xf32> to vector<6x256xf32>
    %12 = arith.addf %8, %11 : vector<6x256xf32>
    %13 = arith.maximumf %9, %11 : vector<6x256xf32>
    %cst = arith.constant 2.500000e-01 : f32
    %14 = vector.broadcast %cst : f32 to vector<6x256xf32>
    %15 = arith.mulf %12, %14 : vector<6x256xf32>
    %16 = vector.shape_cast %15 : vector<6x256xf32> to vector<6x16x16xf32>
    %17 = vector.shape_cast %13 : vector<6x256xf32> to vector<6x16x16xf32>
    %cst_8 = arith.constant 0.000000e+00 : f32
    %18 = vector.broadcast %cst_8 : f32 to vector<16x3xf32>
    %19 = vector.extract_strided_slice %16 {offsets = [0, 0, 0], sizes = [1, 16, 16], strides = [1, 1, 1]} : vector<6x16x16xf32> to vector<1x16x16xf32>
    %20 = vector.shape_cast %19 : vector<1x16x16xf32> to vector<16x16xf32>
    %21 = vector.extract_strided_slice %16 {offsets = [1, 0, 0], sizes = [1, 16, 16], strides = [1, 1, 1]} : vector<6x16x16xf32> to vector<1x16x16xf32>
    %22 = vector.shape_cast %21 : vector<1x16x16xf32> to vector<16x16xf32>
    %23 = vector.extract_strided_slice %16 {offsets = [2, 0, 0], sizes = [1, 16, 16], strides = [1, 1, 1]} : vector<6x16x16xf32> to vector<1x16x16xf32>
    %24 = vector.shape_cast %23 : vector<1x16x16xf32> to vector<16x16xf32>
    %25 = vector.extract_strided_slice %16 {offsets = [3, 0, 0], sizes = [1, 16, 16], strides = [1, 1, 1]} : vector<6x16x16xf32> to vector<1x16x16xf32>
    %26 = vector.shape_cast %25 : vector<1x16x16xf32> to vector<16x16xf32>
    %27 = vector.extract_strided_slice %16 {offsets = [4, 0, 0], sizes = [1, 16, 16], strides = [1, 1, 1]} : vector<6x16x16xf32> to vector<1x16x16xf32>
    %28 = vector.shape_cast %27 : vector<1x16x16xf32> to vector<16x16xf32>
    %29 = vector.extract_strided_slice %16 {offsets = [5, 0, 0], sizes = [1, 16, 16], strides = [1, 1, 1]} : vector<6x16x16xf32> to vector<1x16x16xf32>
    %30 = vector.shape_cast %29 : vector<1x16x16xf32> to vector<16x16xf32>
    %cst_9 = arith.constant 0.000000e+00 : f32
    %31 = vector.broadcast %cst_9 : f32 to vector<16x14xf32>
    %32 = tpu.concatenate %20, %18, %22, %18, %24, %18, %26, %18, %28, %18, %30, %18, %31 in 1 : vector<16x16xf32>, vector<16x3xf32>, vector<16x16xf32>, vector<16x3xf32>, vector<16x16xf32>, vector<16x3xf32>, vector<16x16xf32>, vector<16x3xf32>, vector<16x16xf32>, vector<16x3xf32>, vector<16x16xf32>, vector<16x3xf32>, vector<16x14xf32> -> vector<16x128xf32>
    %cst_10 = arith.constant 0.000000e+00 : f32
    %33 = vector.broadcast %cst_10 : f32 to vector<8x128xf32>
    %34 = tpu.concatenate %32, %33 in 0 : vector<16x128xf32>, vector<8x128xf32> -> vector<24x128xf32>
    %cst_11 = arith.constant 0.000000e+00 : f32
    %35 = vector.broadcast %cst_11 : f32 to vector<16x3xf32>
    %36 = vector.extract_strided_slice %17 {offsets = [0, 0, 0], sizes = [1, 16, 16], strides = [1, 1, 1]} : vector<6x16x16xf32> to vector<1x16x16xf32>
    %37 = vector.shape_cast %36 : vector<1x16x16xf32> to vector<16x16xf32>
    %38 = vector.extract_strided_slice %17 {offsets = [1, 0, 0], sizes = [1, 16, 16], strides = [1, 1, 1]} : vector<6x16x16xf32> to vector<1x16x16xf32>
    %39 = vector.shape_cast %38 : vector<1x16x16xf32> to vector<16x16xf32>
    %40 = vector.extract_strided_slice %17 {offsets = [2, 0, 0], sizes = [1, 16, 16], strides = [1, 1, 1]} : vector<6x16x16xf32> to vector<1x16x16xf32>
    %41 = vector.shape_cast %40 : vector<1x16x16xf32> to vector<16x16xf32>
    %42 = vector.extract_strided_slice %17 {offsets = [3, 0, 0], sizes = [1, 16, 16], strides = [1, 1, 1]} : vector<6x16x16xf32> to vector<1x16x16xf32>
    %43 = vector.shape_cast %42 : vector<1x16x16xf32> to vector<16x16xf32>
    %44 = vector.extract_strided_slice %17 {offsets = [4, 0, 0], sizes = [1, 16, 16], strides = [1, 1, 1]} : vector<6x16x16xf32> to vector<1x16x16xf32>
    %45 = vector.shape_cast %44 : vector<1x16x16xf32> to vector<16x16xf32>
    %46 = vector.extract_strided_slice %17 {offsets = [5, 0, 0], sizes = [1, 16, 16], strides = [1, 1, 1]} : vector<6x16x16xf32> to vector<1x16x16xf32>
    %47 = vector.shape_cast %46 : vector<1x16x16xf32> to vector<16x16xf32>
    %cst_12 = arith.constant 0.000000e+00 : f32
    %48 = vector.broadcast %cst_12 : f32 to vector<16x14xf32>
    %49 = tpu.concatenate %37, %35, %39, %35, %41, %35, %43, %35, %45, %35, %47, %35, %48 in 1 : vector<16x16xf32>, vector<16x3xf32>, vector<16x16xf32>, vector<16x3xf32>, vector<16x16xf32>, vector<16x3xf32>, vector<16x16xf32>, vector<16x3xf32>, vector<16x16xf32>, vector<16x3xf32>, vector<16x16xf32>, vector<16x3xf32>, vector<16x14xf32> -> vector<16x128xf32>
    %cst_13 = arith.constant 0.000000e+00 : f32
    %50 = vector.broadcast %cst_13 : f32 to vector<8x128xf32>
    %51 = tpu.concatenate %49, %50 in 0 : vector<16x128xf32>, vector<8x128xf32> -> vector<24x128xf32>
    %c3_i32 = arith.constant 3 : i32
    %52 = tpu.dynamic_rotate %34 by %c3_i32 dim 1 : vector<24x128xf32>, i32 -> vector<24x128xf32>
    %c0_14 = arith.constant 0 : index
    %53 = memref.load %arg1[%c0_14] : memref<98xf32, #tpu.memory_space<smem>>
    %54 = vector.broadcast %53 : f32 to vector<24x128xf32>
    %55 = arith.mulf %54, %52 : vector<24x128xf32>
    %c7 = arith.constant 7 : index
    %56 = memref.load %arg1[%c7] : memref<98xf32, #tpu.memory_space<smem>>
    %57 = vector.broadcast %56 : f32 to vector<24x128xf32>
    %58 = arith.mulf %57, %52 : vector<24x128xf32>
    %c14 = arith.constant 14 : index
    %59 = memref.load %arg1[%c14] : memref<98xf32, #tpu.memory_space<smem>>
    %60 = vector.broadcast %59 : f32 to vector<24x128xf32>
    %61 = arith.mulf %60, %52 : vector<24x128xf32>
    %c21 = arith.constant 21 : index
    %62 = memref.load %arg1[%c21] : memref<98xf32, #tpu.memory_space<smem>>
    %63 = vector.broadcast %62 : f32 to vector<24x128xf32>
    %64 = arith.mulf %63, %52 : vector<24x128xf32>
    %c28 = arith.constant 28 : index
    %65 = memref.load %arg1[%c28] : memref<98xf32, #tpu.memory_space<smem>>
    %66 = vector.broadcast %65 : f32 to vector<24x128xf32>
    %67 = arith.mulf %66, %52 : vector<24x128xf32>
    %c35 = arith.constant 35 : index
    %68 = memref.load %arg1[%c35] : memref<98xf32, #tpu.memory_space<smem>>
    %69 = vector.broadcast %68 : f32 to vector<24x128xf32>
    %70 = arith.mulf %69, %52 : vector<24x128xf32>
    %c42 = arith.constant 42 : index
    %71 = memref.load %arg1[%c42] : memref<98xf32, #tpu.memory_space<smem>>
    %72 = vector.broadcast %71 : f32 to vector<24x128xf32>
    %73 = arith.mulf %72, %52 : vector<24x128xf32>
    %c2_i32 = arith.constant 2 : i32
    %74 = tpu.dynamic_rotate %34 by %c2_i32 dim 1 : vector<24x128xf32>, i32 -> vector<24x128xf32>
    %c1_15 = arith.constant 1 : index
    %75 = memref.load %arg1[%c1_15] : memref<98xf32, #tpu.memory_space<smem>>
    %76 = vector.broadcast %75 : f32 to vector<24x128xf32>
    %77 = arith.mulf %76, %74 : vector<24x128xf32>
    %78 = arith.addf %55, %77 : vector<24x128xf32>
    %c8 = arith.constant 8 : index
    %79 = memref.load %arg1[%c8] : memref<98xf32, #tpu.memory_space<smem>>
    %80 = vector.broadcast %79 : f32 to vector<24x128xf32>
    %81 = arith.mulf %80, %74 : vector<24x128xf32>
    %82 = arith.addf %58, %81 : vector<24x128xf32>
    %c15 = arith.constant 15 : index
    %83 = memref.load %arg1[%c15] : memref<98xf32, #tpu.memory_space<smem>>
    %84 = vector.broadcast %83 : f32 to vector<24x128xf32>
    %85 = arith.mulf %84, %74 : vector<24x128xf32>
    %86 = arith.addf %61, %85 : vector<24x128xf32>
    %c22 = arith.constant 22 : index
    %87 = memref.load %arg1[%c22] : memref<98xf32, #tpu.memory_space<smem>>
    %88 = vector.broadcast %87 : f32 to vector<24x128xf32>
    %89 = arith.mulf %88, %74 : vector<24x128xf32>
    %90 = arith.addf %64, %89 : vector<24x128xf32>
    %c29 = arith.constant 29 : index
    %91 = memref.load %arg1[%c29] : memref<98xf32, #tpu.memory_space<smem>>
    %92 = vector.broadcast %91 : f32 to vector<24x128xf32>
    %93 = arith.mulf %92, %74 : vector<24x128xf32>
    %94 = arith.addf %67, %93 : vector<24x128xf32>
    %c36 = arith.constant 36 : index
    %95 = memref.load %arg1[%c36] : memref<98xf32, #tpu.memory_space<smem>>
    %96 = vector.broadcast %95 : f32 to vector<24x128xf32>
    %97 = arith.mulf %96, %74 : vector<24x128xf32>
    %98 = arith.addf %70, %97 : vector<24x128xf32>
    %c43 = arith.constant 43 : index
    %99 = memref.load %arg1[%c43] : memref<98xf32, #tpu.memory_space<smem>>
    %100 = vector.broadcast %99 : f32 to vector<24x128xf32>
    %101 = arith.mulf %100, %74 : vector<24x128xf32>
    %102 = arith.addf %73, %101 : vector<24x128xf32>
    %c1_i32 = arith.constant 1 : i32
    %103 = tpu.dynamic_rotate %34 by %c1_i32 dim 1 : vector<24x128xf32>, i32 -> vector<24x128xf32>
    %c2_16 = arith.constant 2 : index
    %104 = memref.load %arg1[%c2_16] : memref<98xf32, #tpu.memory_space<smem>>
    %105 = vector.broadcast %104 : f32 to vector<24x128xf32>
    %106 = arith.mulf %105, %103 : vector<24x128xf32>
    %107 = arith.addf %78, %106 : vector<24x128xf32>
    %c9 = arith.constant 9 : index
    %108 = memref.load %arg1[%c9] : memref<98xf32, #tpu.memory_space<smem>>
    %109 = vector.broadcast %108 : f32 to vector<24x128xf32>
    %110 = arith.mulf %109, %103 : vector<24x128xf32>
    %111 = arith.addf %82, %110 : vector<24x128xf32>
    %c16 = arith.constant 16 : index
    %112 = memref.load %arg1[%c16] : memref<98xf32, #tpu.memory_space<smem>>
    %113 = vector.broadcast %112 : f32 to vector<24x128xf32>
    %114 = arith.mulf %113, %103 : vector<24x128xf32>
    %115 = arith.addf %86, %114 : vector<24x128xf32>
    %c23 = arith.constant 23 : index
    %116 = memref.load %arg1[%c23] : memref<98xf32, #tpu.memory_space<smem>>
    %117 = vector.broadcast %116 : f32 to vector<24x128xf32>
    %118 = arith.mulf %117, %103 : vector<24x128xf32>
    %119 = arith.addf %90, %118 : vector<24x128xf32>
    %c30 = arith.constant 30 : index
    %120 = memref.load %arg1[%c30] : memref<98xf32, #tpu.memory_space<smem>>
    %121 = vector.broadcast %120 : f32 to vector<24x128xf32>
    %122 = arith.mulf %121, %103 : vector<24x128xf32>
    %123 = arith.addf %94, %122 : vector<24x128xf32>
    %c37 = arith.constant 37 : index
    %124 = memref.load %arg1[%c37] : memref<98xf32, #tpu.memory_space<smem>>
    %125 = vector.broadcast %124 : f32 to vector<24x128xf32>
    %126 = arith.mulf %125, %103 : vector<24x128xf32>
    %127 = arith.addf %98, %126 : vector<24x128xf32>
    %c44 = arith.constant 44 : index
    %128 = memref.load %arg1[%c44] : memref<98xf32, #tpu.memory_space<smem>>
    %129 = vector.broadcast %128 : f32 to vector<24x128xf32>
    %130 = arith.mulf %129, %103 : vector<24x128xf32>
    %131 = arith.addf %102, %130 : vector<24x128xf32>
    %c3_17 = arith.constant 3 : index
    %132 = memref.load %arg1[%c3_17] : memref<98xf32, #tpu.memory_space<smem>>
    %133 = vector.broadcast %132 : f32 to vector<24x128xf32>
    %134 = arith.mulf %133, %34 : vector<24x128xf32>
    %135 = arith.addf %107, %134 : vector<24x128xf32>
    %c10 = arith.constant 10 : index
    %136 = memref.load %arg1[%c10] : memref<98xf32, #tpu.memory_space<smem>>
    %137 = vector.broadcast %136 : f32 to vector<24x128xf32>
    %138 = arith.mulf %137, %34 : vector<24x128xf32>
    %139 = arith.addf %111, %138 : vector<24x128xf32>
    %c17 = arith.constant 17 : index
    %140 = memref.load %arg1[%c17] : memref<98xf32, #tpu.memory_space<smem>>
    %141 = vector.broadcast %140 : f32 to vector<24x128xf32>
    %142 = arith.mulf %141, %34 : vector<24x128xf32>
    %143 = arith.addf %115, %142 : vector<24x128xf32>
    %c24 = arith.constant 24 : index
    %144 = memref.load %arg1[%c24] : memref<98xf32, #tpu.memory_space<smem>>
    %145 = vector.broadcast %144 : f32 to vector<24x128xf32>
    %146 = arith.mulf %145, %34 : vector<24x128xf32>
    %147 = arith.addf %119, %146 : vector<24x128xf32>
    %c31 = arith.constant 31 : index
    %148 = memref.load %arg1[%c31] : memref<98xf32, #tpu.memory_space<smem>>
    %149 = vector.broadcast %148 : f32 to vector<24x128xf32>
    %150 = arith.mulf %149, %34 : vector<24x128xf32>
    %151 = arith.addf %123, %150 : vector<24x128xf32>
    %c38 = arith.constant 38 : index
    %152 = memref.load %arg1[%c38] : memref<98xf32, #tpu.memory_space<smem>>
    %153 = vector.broadcast %152 : f32 to vector<24x128xf32>
    %154 = arith.mulf %153, %34 : vector<24x128xf32>
    %155 = arith.addf %127, %154 : vector<24x128xf32>
    %c45 = arith.constant 45 : index
    %156 = memref.load %arg1[%c45] : memref<98xf32, #tpu.memory_space<smem>>
    %157 = vector.broadcast %156 : f32 to vector<24x128xf32>
    %158 = arith.mulf %157, %34 : vector<24x128xf32>
    %159 = arith.addf %131, %158 : vector<24x128xf32>
    %c127_i32 = arith.constant 127 : i32
    %160 = tpu.dynamic_rotate %34 by %c127_i32 dim 1 : vector<24x128xf32>, i32 -> vector<24x128xf32>
    %c4 = arith.constant 4 : index
    %161 = memref.load %arg1[%c4] : memref<98xf32, #tpu.memory_space<smem>>
    %162 = vector.broadcast %161 : f32 to vector<24x128xf32>
    %163 = arith.mulf %162, %160 : vector<24x128xf32>
    %164 = arith.addf %135, %163 : vector<24x128xf32>
    %c11 = arith.constant 11 : index
    %165 = memref.load %arg1[%c11] : memref<98xf32, #tpu.memory_space<smem>>
    %166 = vector.broadcast %165 : f32 to vector<24x128xf32>
    %167 = arith.mulf %166, %160 : vector<24x128xf32>
    %168 = arith.addf %139, %167 : vector<24x128xf32>
    %c18 = arith.constant 18 : index
    %169 = memref.load %arg1[%c18] : memref<98xf32, #tpu.memory_space<smem>>
    %170 = vector.broadcast %169 : f32 to vector<24x128xf32>
    %171 = arith.mulf %170, %160 : vector<24x128xf32>
    %172 = arith.addf %143, %171 : vector<24x128xf32>
    %c25 = arith.constant 25 : index
    %173 = memref.load %arg1[%c25] : memref<98xf32, #tpu.memory_space<smem>>
    %174 = vector.broadcast %173 : f32 to vector<24x128xf32>
    %175 = arith.mulf %174, %160 : vector<24x128xf32>
    %176 = arith.addf %147, %175 : vector<24x128xf32>
    %c32 = arith.constant 32 : index
    %177 = memref.load %arg1[%c32] : memref<98xf32, #tpu.memory_space<smem>>
    %178 = vector.broadcast %177 : f32 to vector<24x128xf32>
    %179 = arith.mulf %178, %160 : vector<24x128xf32>
    %180 = arith.addf %151, %179 : vector<24x128xf32>
    %c39 = arith.constant 39 : index
    %181 = memref.load %arg1[%c39] : memref<98xf32, #tpu.memory_space<smem>>
    %182 = vector.broadcast %181 : f32 to vector<24x128xf32>
    %183 = arith.mulf %182, %160 : vector<24x128xf32>
    %184 = arith.addf %155, %183 : vector<24x128xf32>
    %c46 = arith.constant 46 : index
    %185 = memref.load %arg1[%c46] : memref<98xf32, #tpu.memory_space<smem>>
    %186 = vector.broadcast %185 : f32 to vector<24x128xf32>
    %187 = arith.mulf %186, %160 : vector<24x128xf32>
    %188 = arith.addf %159, %187 : vector<24x128xf32>
    %c126_i32 = arith.constant 126 : i32
    %189 = tpu.dynamic_rotate %34 by %c126_i32 dim 1 : vector<24x128xf32>, i32 -> vector<24x128xf32>
    %c5 = arith.constant 5 : index
    %190 = memref.load %arg1[%c5] : memref<98xf32, #tpu.memory_space<smem>>
    %191 = vector.broadcast %190 : f32 to vector<24x128xf32>
    %192 = arith.mulf %191, %189 : vector<24x128xf32>
    %193 = arith.addf %164, %192 : vector<24x128xf32>
    %c12 = arith.constant 12 : index
    %194 = memref.load %arg1[%c12] : memref<98xf32, #tpu.memory_space<smem>>
    %195 = vector.broadcast %194 : f32 to vector<24x128xf32>
    %196 = arith.mulf %195, %189 : vector<24x128xf32>
    %197 = arith.addf %168, %196 : vector<24x128xf32>
    %c19 = arith.constant 19 : index
    %198 = memref.load %arg1[%c19] : memref<98xf32, #tpu.memory_space<smem>>
    %199 = vector.broadcast %198 : f32 to vector<24x128xf32>
    %200 = arith.mulf %199, %189 : vector<24x128xf32>
    %201 = arith.addf %172, %200 : vector<24x128xf32>
    %c26 = arith.constant 26 : index
    %202 = memref.load %arg1[%c26] : memref<98xf32, #tpu.memory_space<smem>>
    %203 = vector.broadcast %202 : f32 to vector<24x128xf32>
    %204 = arith.mulf %203, %189 : vector<24x128xf32>
    %205 = arith.addf %176, %204 : vector<24x128xf32>
    %c33 = arith.constant 33 : index
    %206 = memref.load %arg1[%c33] : memref<98xf32, #tpu.memory_space<smem>>
    %207 = vector.broadcast %206 : f32 to vector<24x128xf32>
    %208 = arith.mulf %207, %189 : vector<24x128xf32>
    %209 = arith.addf %180, %208 : vector<24x128xf32>
    %c40 = arith.constant 40 : index
    %210 = memref.load %arg1[%c40] : memref<98xf32, #tpu.memory_space<smem>>
    %211 = vector.broadcast %210 : f32 to vector<24x128xf32>
    %212 = arith.mulf %211, %189 : vector<24x128xf32>
    %213 = arith.addf %184, %212 : vector<24x128xf32>
    %c47 = arith.constant 47 : index
    %214 = memref.load %arg1[%c47] : memref<98xf32, #tpu.memory_space<smem>>
    %215 = vector.broadcast %214 : f32 to vector<24x128xf32>
    %216 = arith.mulf %215, %189 : vector<24x128xf32>
    %217 = arith.addf %188, %216 : vector<24x128xf32>
    %c125_i32 = arith.constant 125 : i32
    %218 = tpu.dynamic_rotate %34 by %c125_i32 dim 1 : vector<24x128xf32>, i32 -> vector<24x128xf32>
    %c6 = arith.constant 6 : index
    %219 = memref.load %arg1[%c6] : memref<98xf32, #tpu.memory_space<smem>>
    %220 = vector.broadcast %219 : f32 to vector<24x128xf32>
    %221 = arith.mulf %220, %218 : vector<24x128xf32>
    %222 = arith.addf %193, %221 : vector<24x128xf32>
    %c13 = arith.constant 13 : index
    %223 = memref.load %arg1[%c13] : memref<98xf32, #tpu.memory_space<smem>>
    %224 = vector.broadcast %223 : f32 to vector<24x128xf32>
    %225 = arith.mulf %224, %218 : vector<24x128xf32>
    %226 = arith.addf %197, %225 : vector<24x128xf32>
    %c20 = arith.constant 20 : index
    %227 = memref.load %arg1[%c20] : memref<98xf32, #tpu.memory_space<smem>>
    %228 = vector.broadcast %227 : f32 to vector<24x128xf32>
    %229 = arith.mulf %228, %218 : vector<24x128xf32>
    %230 = arith.addf %201, %229 : vector<24x128xf32>
    %c27 = arith.constant 27 : index
    %231 = memref.load %arg1[%c27] : memref<98xf32, #tpu.memory_space<smem>>
    %232 = vector.broadcast %231 : f32 to vector<24x128xf32>
    %233 = arith.mulf %232, %218 : vector<24x128xf32>
    %234 = arith.addf %205, %233 : vector<24x128xf32>
    %c34 = arith.constant 34 : index
    %235 = memref.load %arg1[%c34] : memref<98xf32, #tpu.memory_space<smem>>
    %236 = vector.broadcast %235 : f32 to vector<24x128xf32>
    %237 = arith.mulf %236, %218 : vector<24x128xf32>
    %238 = arith.addf %209, %237 : vector<24x128xf32>
    %c41 = arith.constant 41 : index
    %239 = memref.load %arg1[%c41] : memref<98xf32, #tpu.memory_space<smem>>
    %240 = vector.broadcast %239 : f32 to vector<24x128xf32>
    %241 = arith.mulf %240, %218 : vector<24x128xf32>
    %242 = arith.addf %213, %241 : vector<24x128xf32>
    %c48 = arith.constant 48 : index
    %243 = memref.load %arg1[%c48] : memref<98xf32, #tpu.memory_space<smem>>
    %244 = vector.broadcast %243 : f32 to vector<24x128xf32>
    %245 = arith.mulf %244, %218 : vector<24x128xf32>
    %246 = arith.addf %217, %245 : vector<24x128xf32>
    %c3_i32_18 = arith.constant 3 : i32
    %247 = tpu.dynamic_rotate %51 by %c3_i32_18 dim 1 : vector<24x128xf32>, i32 -> vector<24x128xf32>
    %c49 = arith.constant 49 : index
    %248 = memref.load %arg1[%c49] : memref<98xf32, #tpu.memory_space<smem>>
    %249 = vector.broadcast %248 : f32 to vector<24x128xf32>
    %250 = arith.mulf %249, %247 : vector<24x128xf32>
    %251 = arith.addf %222, %250 : vector<24x128xf32>
    %c56 = arith.constant 56 : index
    %252 = memref.load %arg1[%c56] : memref<98xf32, #tpu.memory_space<smem>>
    %253 = vector.broadcast %252 : f32 to vector<24x128xf32>
    %254 = arith.mulf %253, %247 : vector<24x128xf32>
    %255 = arith.addf %226, %254 : vector<24x128xf32>
    %c63 = arith.constant 63 : index
    %256 = memref.load %arg1[%c63] : memref<98xf32, #tpu.memory_space<smem>>
    %257 = vector.broadcast %256 : f32 to vector<24x128xf32>
    %258 = arith.mulf %257, %247 : vector<24x128xf32>
    %259 = arith.addf %230, %258 : vector<24x128xf32>
    %c70 = arith.constant 70 : index
    %260 = memref.load %arg1[%c70] : memref<98xf32, #tpu.memory_space<smem>>
    %261 = vector.broadcast %260 : f32 to vector<24x128xf32>
    %262 = arith.mulf %261, %247 : vector<24x128xf32>
    %263 = arith.addf %234, %262 : vector<24x128xf32>
    %c77 = arith.constant 77 : index
    %264 = memref.load %arg1[%c77] : memref<98xf32, #tpu.memory_space<smem>>
    %265 = vector.broadcast %264 : f32 to vector<24x128xf32>
    %266 = arith.mulf %265, %247 : vector<24x128xf32>
    %267 = arith.addf %238, %266 : vector<24x128xf32>
    %c84 = arith.constant 84 : index
    %268 = memref.load %arg1[%c84] : memref<98xf32, #tpu.memory_space<smem>>
    %269 = vector.broadcast %268 : f32 to vector<24x128xf32>
    %270 = arith.mulf %269, %247 : vector<24x128xf32>
    %271 = arith.addf %242, %270 : vector<24x128xf32>
    %c91 = arith.constant 91 : index
    %272 = memref.load %arg1[%c91] : memref<98xf32, #tpu.memory_space<smem>>
    %273 = vector.broadcast %272 : f32 to vector<24x128xf32>
    %274 = arith.mulf %273, %247 : vector<24x128xf32>
    %275 = arith.addf %246, %274 : vector<24x128xf32>
    %c2_i32_19 = arith.constant 2 : i32
    %276 = tpu.dynamic_rotate %51 by %c2_i32_19 dim 1 : vector<24x128xf32>, i32 -> vector<24x128xf32>
    %c50 = arith.constant 50 : index
    %277 = memref.load %arg1[%c50] : memref<98xf32, #tpu.memory_space<smem>>
    %278 = vector.broadcast %277 : f32 to vector<24x128xf32>
    %279 = arith.mulf %278, %276 : vector<24x128xf32>
    %280 = arith.addf %251, %279 : vector<24x128xf32>
    %c57 = arith.constant 57 : index
    %281 = memref.load %arg1[%c57] : memref<98xf32, #tpu.memory_space<smem>>
    %282 = vector.broadcast %281 : f32 to vector<24x128xf32>
    %283 = arith.mulf %282, %276 : vector<24x128xf32>
    %284 = arith.addf %255, %283 : vector<24x128xf32>
    %c64 = arith.constant 64 : index
    %285 = memref.load %arg1[%c64] : memref<98xf32, #tpu.memory_space<smem>>
    %286 = vector.broadcast %285 : f32 to vector<24x128xf32>
    %287 = arith.mulf %286, %276 : vector<24x128xf32>
    %288 = arith.addf %259, %287 : vector<24x128xf32>
    %c71 = arith.constant 71 : index
    %289 = memref.load %arg1[%c71] : memref<98xf32, #tpu.memory_space<smem>>
    %290 = vector.broadcast %289 : f32 to vector<24x128xf32>
    %291 = arith.mulf %290, %276 : vector<24x128xf32>
    %292 = arith.addf %263, %291 : vector<24x128xf32>
    %c78 = arith.constant 78 : index
    %293 = memref.load %arg1[%c78] : memref<98xf32, #tpu.memory_space<smem>>
    %294 = vector.broadcast %293 : f32 to vector<24x128xf32>
    %295 = arith.mulf %294, %276 : vector<24x128xf32>
    %296 = arith.addf %267, %295 : vector<24x128xf32>
    %c85 = arith.constant 85 : index
    %297 = memref.load %arg1[%c85] : memref<98xf32, #tpu.memory_space<smem>>
    %298 = vector.broadcast %297 : f32 to vector<24x128xf32>
    %299 = arith.mulf %298, %276 : vector<24x128xf32>
    %300 = arith.addf %271, %299 : vector<24x128xf32>
    %c92 = arith.constant 92 : index
    %301 = memref.load %arg1[%c92] : memref<98xf32, #tpu.memory_space<smem>>
    %302 = vector.broadcast %301 : f32 to vector<24x128xf32>
    %303 = arith.mulf %302, %276 : vector<24x128xf32>
    %304 = arith.addf %275, %303 : vector<24x128xf32>
    %c1_i32_20 = arith.constant 1 : i32
    %305 = tpu.dynamic_rotate %51 by %c1_i32_20 dim 1 : vector<24x128xf32>, i32 -> vector<24x128xf32>
    %c51 = arith.constant 51 : index
    %306 = memref.load %arg1[%c51] : memref<98xf32, #tpu.memory_space<smem>>
    %307 = vector.broadcast %306 : f32 to vector<24x128xf32>
    %308 = arith.mulf %307, %305 : vector<24x128xf32>
    %309 = arith.addf %280, %308 : vector<24x128xf32>
    %c58 = arith.constant 58 : index
    %310 = memref.load %arg1[%c58] : memref<98xf32, #tpu.memory_space<smem>>
    %311 = vector.broadcast %310 : f32 to vector<24x128xf32>
    %312 = arith.mulf %311, %305 : vector<24x128xf32>
    %313 = arith.addf %284, %312 : vector<24x128xf32>
    %c65 = arith.constant 65 : index
    %314 = memref.load %arg1[%c65] : memref<98xf32, #tpu.memory_space<smem>>
    %315 = vector.broadcast %314 : f32 to vector<24x128xf32>
    %316 = arith.mulf %315, %305 : vector<24x128xf32>
    %317 = arith.addf %288, %316 : vector<24x128xf32>
    %c72 = arith.constant 72 : index
    %318 = memref.load %arg1[%c72] : memref<98xf32, #tpu.memory_space<smem>>
    %319 = vector.broadcast %318 : f32 to vector<24x128xf32>
    %320 = arith.mulf %319, %305 : vector<24x128xf32>
    %321 = arith.addf %292, %320 : vector<24x128xf32>
    %c79 = arith.constant 79 : index
    %322 = memref.load %arg1[%c79] : memref<98xf32, #tpu.memory_space<smem>>
    %323 = vector.broadcast %322 : f32 to vector<24x128xf32>
    %324 = arith.mulf %323, %305 : vector<24x128xf32>
    %325 = arith.addf %296, %324 : vector<24x128xf32>
    %c86 = arith.constant 86 : index
    %326 = memref.load %arg1[%c86] : memref<98xf32, #tpu.memory_space<smem>>
    %327 = vector.broadcast %326 : f32 to vector<24x128xf32>
    %328 = arith.mulf %327, %305 : vector<24x128xf32>
    %329 = arith.addf %300, %328 : vector<24x128xf32>
    %c93 = arith.constant 93 : index
    %330 = memref.load %arg1[%c93] : memref<98xf32, #tpu.memory_space<smem>>
    %331 = vector.broadcast %330 : f32 to vector<24x128xf32>
    %332 = arith.mulf %331, %305 : vector<24x128xf32>
    %333 = arith.addf %304, %332 : vector<24x128xf32>
    %c52 = arith.constant 52 : index
    %334 = memref.load %arg1[%c52] : memref<98xf32, #tpu.memory_space<smem>>
    %335 = vector.broadcast %334 : f32 to vector<24x128xf32>
    %336 = arith.mulf %335, %51 : vector<24x128xf32>
    %337 = arith.addf %309, %336 : vector<24x128xf32>
    %c59 = arith.constant 59 : index
    %338 = memref.load %arg1[%c59] : memref<98xf32, #tpu.memory_space<smem>>
    %339 = vector.broadcast %338 : f32 to vector<24x128xf32>
    %340 = arith.mulf %339, %51 : vector<24x128xf32>
    %341 = arith.addf %313, %340 : vector<24x128xf32>
    %c66 = arith.constant 66 : index
    %342 = memref.load %arg1[%c66] : memref<98xf32, #tpu.memory_space<smem>>
    %343 = vector.broadcast %342 : f32 to vector<24x128xf32>
    %344 = arith.mulf %343, %51 : vector<24x128xf32>
    %345 = arith.addf %317, %344 : vector<24x128xf32>
    %c73 = arith.constant 73 : index
    %346 = memref.load %arg1[%c73] : memref<98xf32, #tpu.memory_space<smem>>
    %347 = vector.broadcast %346 : f32 to vector<24x128xf32>
    %348 = arith.mulf %347, %51 : vector<24x128xf32>
    %349 = arith.addf %321, %348 : vector<24x128xf32>
    %c80 = arith.constant 80 : index
    %350 = memref.load %arg1[%c80] : memref<98xf32, #tpu.memory_space<smem>>
    %351 = vector.broadcast %350 : f32 to vector<24x128xf32>
    %352 = arith.mulf %351, %51 : vector<24x128xf32>
    %353 = arith.addf %325, %352 : vector<24x128xf32>
    %c87 = arith.constant 87 : index
    %354 = memref.load %arg1[%c87] : memref<98xf32, #tpu.memory_space<smem>>
    %355 = vector.broadcast %354 : f32 to vector<24x128xf32>
    %356 = arith.mulf %355, %51 : vector<24x128xf32>
    %357 = arith.addf %329, %356 : vector<24x128xf32>
    %c94 = arith.constant 94 : index
    %358 = memref.load %arg1[%c94] : memref<98xf32, #tpu.memory_space<smem>>
    %359 = vector.broadcast %358 : f32 to vector<24x128xf32>
    %360 = arith.mulf %359, %51 : vector<24x128xf32>
    %361 = arith.addf %333, %360 : vector<24x128xf32>
    %c127_i32_21 = arith.constant 127 : i32
    %362 = tpu.dynamic_rotate %51 by %c127_i32_21 dim 1 : vector<24x128xf32>, i32 -> vector<24x128xf32>
    %c53 = arith.constant 53 : index
    %363 = memref.load %arg1[%c53] : memref<98xf32, #tpu.memory_space<smem>>
    %364 = vector.broadcast %363 : f32 to vector<24x128xf32>
    %365 = arith.mulf %364, %362 : vector<24x128xf32>
    %366 = arith.addf %337, %365 : vector<24x128xf32>
    %c60 = arith.constant 60 : index
    %367 = memref.load %arg1[%c60] : memref<98xf32, #tpu.memory_space<smem>>
    %368 = vector.broadcast %367 : f32 to vector<24x128xf32>
    %369 = arith.mulf %368, %362 : vector<24x128xf32>
    %370 = arith.addf %341, %369 : vector<24x128xf32>
    %c67 = arith.constant 67 : index
    %371 = memref.load %arg1[%c67] : memref<98xf32, #tpu.memory_space<smem>>
    %372 = vector.broadcast %371 : f32 to vector<24x128xf32>
    %373 = arith.mulf %372, %362 : vector<24x128xf32>
    %374 = arith.addf %345, %373 : vector<24x128xf32>
    %c74 = arith.constant 74 : index
    %375 = memref.load %arg1[%c74] : memref<98xf32, #tpu.memory_space<smem>>
    %376 = vector.broadcast %375 : f32 to vector<24x128xf32>
    %377 = arith.mulf %376, %362 : vector<24x128xf32>
    %378 = arith.addf %349, %377 : vector<24x128xf32>
    %c81 = arith.constant 81 : index
    %379 = memref.load %arg1[%c81] : memref<98xf32, #tpu.memory_space<smem>>
    %380 = vector.broadcast %379 : f32 to vector<24x128xf32>
    %381 = arith.mulf %380, %362 : vector<24x128xf32>
    %382 = arith.addf %353, %381 : vector<24x128xf32>
    %c88 = arith.constant 88 : index
    %383 = memref.load %arg1[%c88] : memref<98xf32, #tpu.memory_space<smem>>
    %384 = vector.broadcast %383 : f32 to vector<24x128xf32>
    %385 = arith.mulf %384, %362 : vector<24x128xf32>
    %386 = arith.addf %357, %385 : vector<24x128xf32>
    %c95 = arith.constant 95 : index
    %387 = memref.load %arg1[%c95] : memref<98xf32, #tpu.memory_space<smem>>
    %388 = vector.broadcast %387 : f32 to vector<24x128xf32>
    %389 = arith.mulf %388, %362 : vector<24x128xf32>
    %390 = arith.addf %361, %389 : vector<24x128xf32>
    %c126_i32_22 = arith.constant 126 : i32
    %391 = tpu.dynamic_rotate %51 by %c126_i32_22 dim 1 : vector<24x128xf32>, i32 -> vector<24x128xf32>
    %c54 = arith.constant 54 : index
    %392 = memref.load %arg1[%c54] : memref<98xf32, #tpu.memory_space<smem>>
    %393 = vector.broadcast %392 : f32 to vector<24x128xf32>
    %394 = arith.mulf %393, %391 : vector<24x128xf32>
    %395 = arith.addf %366, %394 : vector<24x128xf32>
    %c61 = arith.constant 61 : index
    %396 = memref.load %arg1[%c61] : memref<98xf32, #tpu.memory_space<smem>>
    %397 = vector.broadcast %396 : f32 to vector<24x128xf32>
    %398 = arith.mulf %397, %391 : vector<24x128xf32>
    %399 = arith.addf %370, %398 : vector<24x128xf32>
    %c68 = arith.constant 68 : index
    %400 = memref.load %arg1[%c68] : memref<98xf32, #tpu.memory_space<smem>>
    %401 = vector.broadcast %400 : f32 to vector<24x128xf32>
    %402 = arith.mulf %401, %391 : vector<24x128xf32>
    %403 = arith.addf %374, %402 : vector<24x128xf32>
    %c75 = arith.constant 75 : index
    %404 = memref.load %arg1[%c75] : memref<98xf32, #tpu.memory_space<smem>>
    %405 = vector.broadcast %404 : f32 to vector<24x128xf32>
    %406 = arith.mulf %405, %391 : vector<24x128xf32>
    %407 = arith.addf %378, %406 : vector<24x128xf32>
    %c82 = arith.constant 82 : index
    %408 = memref.load %arg1[%c82] : memref<98xf32, #tpu.memory_space<smem>>
    %409 = vector.broadcast %408 : f32 to vector<24x128xf32>
    %410 = arith.mulf %409, %391 : vector<24x128xf32>
    %411 = arith.addf %382, %410 : vector<24x128xf32>
    %c89 = arith.constant 89 : index
    %412 = memref.load %arg1[%c89] : memref<98xf32, #tpu.memory_space<smem>>
    %413 = vector.broadcast %412 : f32 to vector<24x128xf32>
    %414 = arith.mulf %413, %391 : vector<24x128xf32>
    %415 = arith.addf %386, %414 : vector<24x128xf32>
    %c96 = arith.constant 96 : index
    %416 = memref.load %arg1[%c96] : memref<98xf32, #tpu.memory_space<smem>>
    %417 = vector.broadcast %416 : f32 to vector<24x128xf32>
    %418 = arith.mulf %417, %391 : vector<24x128xf32>
    %419 = arith.addf %390, %418 : vector<24x128xf32>
    %c125_i32_23 = arith.constant 125 : i32
    %420 = tpu.dynamic_rotate %51 by %c125_i32_23 dim 1 : vector<24x128xf32>, i32 -> vector<24x128xf32>
    %c55 = arith.constant 55 : index
    %421 = memref.load %arg1[%c55] : memref<98xf32, #tpu.memory_space<smem>>
    %422 = vector.broadcast %421 : f32 to vector<24x128xf32>
    %423 = arith.mulf %422, %420 : vector<24x128xf32>
    %424 = arith.addf %395, %423 : vector<24x128xf32>
    %c62 = arith.constant 62 : index
    %425 = memref.load %arg1[%c62] : memref<98xf32, #tpu.memory_space<smem>>
    %426 = vector.broadcast %425 : f32 to vector<24x128xf32>
    %427 = arith.mulf %426, %420 : vector<24x128xf32>
    %428 = arith.addf %399, %427 : vector<24x128xf32>
    %c69 = arith.constant 69 : index
    %429 = memref.load %arg1[%c69] : memref<98xf32, #tpu.memory_space<smem>>
    %430 = vector.broadcast %429 : f32 to vector<24x128xf32>
    %431 = arith.mulf %430, %420 : vector<24x128xf32>
    %432 = arith.addf %403, %431 : vector<24x128xf32>
    %c76 = arith.constant 76 : index
    %433 = memref.load %arg1[%c76] : memref<98xf32, #tpu.memory_space<smem>>
    %434 = vector.broadcast %433 : f32 to vector<24x128xf32>
    %435 = arith.mulf %434, %420 : vector<24x128xf32>
    %436 = arith.addf %407, %435 : vector<24x128xf32>
    %c83 = arith.constant 83 : index
    %437 = memref.load %arg1[%c83] : memref<98xf32, #tpu.memory_space<smem>>
    %438 = vector.broadcast %437 : f32 to vector<24x128xf32>
    %439 = arith.mulf %438, %420 : vector<24x128xf32>
    %440 = arith.addf %411, %439 : vector<24x128xf32>
    %c90 = arith.constant 90 : index
    %441 = memref.load %arg1[%c90] : memref<98xf32, #tpu.memory_space<smem>>
    %442 = vector.broadcast %441 : f32 to vector<24x128xf32>
    %443 = arith.mulf %442, %420 : vector<24x128xf32>
    %444 = arith.addf %415, %443 : vector<24x128xf32>
    %c97 = arith.constant 97 : index
    %445 = memref.load %arg1[%c97] : memref<98xf32, #tpu.memory_space<smem>>
    %446 = vector.broadcast %445 : f32 to vector<24x128xf32>
    %447 = arith.mulf %446, %420 : vector<24x128xf32>
    %448 = arith.addf %419, %447 : vector<24x128xf32>
    %c3_i32_24 = arith.constant 3 : i32
    %449 = tpu.dynamic_rotate %424 by %c3_i32_24 dim 0 : vector<24x128xf32>, i32 -> vector<24x128xf32>
    %450 = arith.addf %436, %449 : vector<24x128xf32>
    %c2_i32_25 = arith.constant 2 : i32
    %451 = tpu.dynamic_rotate %428 by %c2_i32_25 dim 0 : vector<24x128xf32>, i32 -> vector<24x128xf32>
    %452 = arith.addf %450, %451 : vector<24x128xf32>
    %c1_i32_26 = arith.constant 1 : i32
    %453 = tpu.dynamic_rotate %432 by %c1_i32_26 dim 0 : vector<24x128xf32>, i32 -> vector<24x128xf32>
    %454 = arith.addf %452, %453 : vector<24x128xf32>
    %c23_i32 = arith.constant 23 : i32
    %455 = tpu.dynamic_rotate %440 by %c23_i32 dim 0 : vector<24x128xf32>, i32 -> vector<24x128xf32>
    %456 = arith.addf %454, %455 : vector<24x128xf32>
    %c22_i32 = arith.constant 22 : i32
    %457 = tpu.dynamic_rotate %444 by %c22_i32 dim 0 : vector<24x128xf32>, i32 -> vector<24x128xf32>
    %458 = arith.addf %456, %457 : vector<24x128xf32>
    %c21_i32 = arith.constant 21 : i32
    %459 = tpu.dynamic_rotate %448 by %c21_i32 dim 0 : vector<24x128xf32>, i32 -> vector<24x128xf32>
    %460 = arith.addf %458, %459 : vector<24x128xf32>
    %461 = vector.extract_strided_slice %460 {offsets = [0, 0], sizes = [16, 128], strides = [1, 1]} : vector<24x128xf32> to vector<16x128xf32>
    %c0_27 = arith.constant 0 : index
    %462 = memref.load %arg2[%c0_27] : memref<1xf32, #tpu.memory_space<smem>>
    %463 = vector.broadcast %462 : f32 to vector<16x128xf32>
    %464 = arith.addf %461, %463 : vector<16x128xf32>
    %cst_28 = arith.constant 0.000000e+00 : f32
    %465 = vector.broadcast %cst_28 : f32 to vector<16x128xf32>
    %466 = arith.minimumf %464, %465 : vector<16x128xf32>
    %467 = math.absf %464 : vector<16x128xf32>
    %cst_29 = arith.constant 0.000000e+00 : f32
    %468 = vector.broadcast %cst_29 : f32 to vector<16x128xf32>
    %469 = arith.subf %468, %467 : vector<16x128xf32>
    %470 = math.exp %469 : vector<16x128xf32>
    %471 = math.log1p %470 : vector<16x128xf32>
    %472 = arith.subf %466, %471 : vector<16x128xf32>
    %c0_30 = arith.constant 0 : index
    %c0_31 = arith.constant 0 : index
    %c0_32 = arith.constant 0 : index
    %473 = vector.load %arg4[%c0_30, %c0_31, %c0_32] : memref<1x16x128xf32, #tpu.memory_space<vmem>>, vector<1x16x128xf32>
    %474 = vector.shape_cast %473 : vector<1x16x128xf32> to vector<16x128xf32>
    %475 = vector.shape_cast %472 : vector<16x128xf32> to vector<1x16x128xf32>
    tpu.vector_store %arg4[%c0_30, %c0_31, %c0_32], %475 {strides = array<i32>} : memref<1x16x128xf32, #tpu.memory_space<vmem>>, vector<1x16x128xf32>,
    return
  }
  func.func @transform_0(%arg0: i32) -> i32 {
    %c0_i32 = arith.constant 0 : i32
    %c0_i32_0 = arith.constant 0 : i32
    return %c0_i32 : i32
  }
  func.func @transform_1(%arg0: i32) -> i32 {
    %c0_i32 = arith.constant 0 : i32
    %c0_i32_0 = arith.constant 0 : i32
    return %c0_i32 : i32
  }
  func.func @transform_2(%arg0: i32) -> (i32, i32, i32) {
    %c0_i32 = arith.constant 0 : i32
    %c0_i32_0 = arith.constant 0 : i32
    %c0_i32_1 = arith.constant 0 : i32
    return %arg0, %c0_i32, %c0_i32_0 : i32, i32, i32
  }
  func.func @transform_3(%arg0: i32) -> (i32, i32, i32) {
    %c0_i32 = arith.constant 0 : i32
    %c0_i32_0 = arith.constant 0 : i32
    %c0_i32_1 = arith.constant 0 : i32
    return %arg0, %c0_i32, %c0_i32_0 : i32, i32, i32
  }
}

</mosaic_0001>

<bundles_post_ra>
// kernel: tpu_custom_call.1
= control target key start
LH: loop header
LB: loop body
LE: loop exit
PB: predicated region body
PF: predicated region fallthrough
CT: control target
= control target key end

     0   :  { %s4766_s0 = inlined_call_operand.vmem [shape: f32[98], index: 0, kind: input, shape index: {}]   ;;  %s4767_s1 = inlined_call_operand.<no memory space> [shape: f32[1], index: 1, kind: input, shape index: {}]   ;;  %s4768_s2 = inlined_call_operand.hbm [shape: f32[6,4,256], index: 2, kind: input, shape index: {}]   ;;  %s4769_s3 = inlined_call_operand.hbm [shape: f32[1,16,128], index: 3, kind: output, shape index: {}]  }
   0x1   :  { %4896 = sst [smem:[#allocation136_spill]] %s4767_s1 }
   0x2   :  { %4897 = sst [smem:[#allocation137_spill]] %s4769_s3 }
   0x3   :  { %9 = vsyncpa [#allocation6], 0 }
   0x4   :  { %10 = vsyncpa [#allocation4], 0 }
   0x5   :  { %11 = vsyncpa [#allocation5], 0  ;;  %s18_s14 = sshll.u32 %s4766_s0, 4  ;;  %s19_s14 = int_to_ptr.vmem [resolvable:$true] %s18_s14 }
   0x6   :  { %s2738_s15 = scalar_lea.vmem %s19_s14, 16  ;;  %p2743_p1 = scmp.lt.s32.totalorder %s19_s14, %s19_s14 }
   0x7   :  { %p2739_p0 = scmp.ne.s32.totalorder %s19_s14, %s2738_s15  ;;  %p2744_p2 = scmp.lt.s32.totalorder %s2738_s15, %s2738_s15 }
   0x9   :  { %p2745_p3 = por %p2744_p2, %p2743_p1 }
   0xb   :  { %p2746_p4 = pnand %p2745_p3, %p2739_p0 }
   0xd   :  { %2749 = shalt.err (!%p2746_p4)
}
   0xe   :  { %s2796_s16 = smov [#allocation3]   ;;  %s2797_s17 = smov [#allocation7]  }
   0xf   :  { %21 = dma.vmem_to_smem %s19_s14, 16, %s2796_s16, [#allocation6]  }
  0x10   :  { %s29_s18 = sshll.u32 %s2797_s17, 4  ;;  %s30_s18 = int_to_ptr.vmem [resolvable:$true] %s29_s18 }
  0x11   :  { %s2758_s19 = scalar_lea.vmem %s30_s18, 768  ;;  %p2763_p6 = scmp.lt.s32.totalorder %s30_s18, %s30_s18 }
  0x12   :  { %p2759_p5 = scmp.ne.s32.totalorder %s30_s18, %s2758_s19  ;;  %p2764_p7 = scmp.lt.s32.totalorder %s2758_s19, %s2758_s19 }
  0x14   :  { %p2765_p8 = por %p2764_p7, %p2763_p6 }
  0x16   :  { %p2766_p9 = pnand %p2765_p8, %p2759_p5 }
  0x18   :  { %2769 = shalt.err (!%p2766_p9)
}
  0x19   :  { %s4770_s0 = smov 128   ;;  %s4771_s20 = smov 8  }
  0x1a   :  { %35 = dma.hbm_to_vmem [thread:$0]  %s4768_s2, 768, %s30_s18, [#allocation4], %s4770_s0, %s4770_s0, %s4771_s20  }
  0x1b   :  { %2790 = dma.done.wait [#allocation6], 16  }
  0x1c   :  { %2791 = vsyncadd [#allocation6], 4294967280 }
  0x1d   :  { %2792 = dma.done.wait [#allocation4], 768  }
  0x1e   :  { %2793 = vsyncadd [#allocation4], 4294966528 }
  0x1f   :  { %42 = sfence }
  0x20   :  { %v45_v0 = vld [vmem:[#allocation7 + $0x8] ss:$4 sm:$0x3]  ;;  %v57_v1 = vld [vmem:[#allocation7 + $0x9] ss:$4 sm:$0x3] }
  0x21   :  { %v67_v2 = vadd.f32 %v57_v1, %v45_v0  ;;  %v81_v3 = vld [vmem:[#allocation7 + $0xa] ss:$4 sm:$0x3]  ;;  %v73_v4 = vmax.f32 %v45_v0, %v57_v1  ;;  %v105_v5 = vld [vmem:[#allocation7 + $0xb] ss:$4 sm:$0x3] }
  0x22   :  { %v47_v6 = vld [vmem:[#allocation7 + $0x10] ss:$4 sm:$0x3]  ;;  %v59_v8 = vld [vmem:[#allocation7 + $0x11] ss:$4 sm:$0x3] }
  0x23   :  { %v91_v7 = vadd.f32 %v81_v3, %v67_v2  ;;  %v97_v9 = vmax.f32 %v73_v4, %v81_v3  ;;  %v74_v10 = vmax.f32 %v47_v6, %v59_v8  ;;  %v68_v12 = vadd.f32 %v59_v8, %v47_v6  ;;  %v83_v13 = vld [vmem:[#allocation7 + $0x12] ss:$4 sm:$0x3]  ;;  %v49_v15 = vld [vmem:[#allocation7 + $0x18] ss:$4 sm:$0x3] }
  0x24   :  { %v61_v16 = vld [vmem:[#allocation7 + $0x19] ss:$4 sm:$0x3]  ;;  %v107_v19 = vld [vmem:[#allocation7 + $0x13] ss:$4 sm:$0x3] }
  0x25   :  { %v115_v11 = vadd.f32 %v105_v5, %v91_v7  ;;  %v2850_v14 = vmax.f32 %v97_v9, %v105_v5  ;;  %v98_v17 = vmax.f32 %v74_v10, %v83_v13  ;;  %v75_v20 = vmax.f32 %v49_v15, %v61_v16  ;;  %v85_v21 = vld [vmem:[#allocation7 + $0x1a] ss:$4 sm:$0x3]  ;;  %s2800_s2 = smov 80   ;;  %s2801_s23 = smov 112  }
  0x26   :  { %v92_v23 = vadd.f32 %v83_v13, %v68_v12  ;;  %v51_v24 = vld [vmem:[#allocation7 + $0x20] ss:$4 sm:$0x3]  ;;  %v63_v25 = vld [vmem:[#allocation7 + $0x21] ss:$4 sm:$0x3]  ;;  %v69_v43 = vadd.f32 %v61_v16, %v49_v15  ;;  %v415_v9 = vlaneseq }
  0x27   :  { %v2852_v18 = vmul.f32 0.25, %v115_v11  ;;  %v2854_v22 = vmax.f32 %v98_v17, %v107_v19  ;;  %v99_v26 = vmax.f32 %v75_v20, %v85_v21  ;;  %v109_v27 = vld [vmem:[#allocation7 + $0x1b] ss:$4 sm:$0x3]  ;;  %v76_v29 = vmax.f32 %v51_v24, %v63_v25  ;;  %s2802_s24 = smov 64   ;;  %s2803_s25 = smov 96  }
  0x28   :  { %v87_v28 = vld [vmem:[#allocation7 + $0x22] ss:$4 sm:$0x3]  ;;  %v53_v30 = vld [vmem:[#allocation7 + $0x28] ss:$4 sm:$0x3]  ;;  %v116_v35 = vadd.f32 %v107_v19, %v92_v23  ;;  %v93_v44 = vadd.f32 %v85_v21, %v69_v43  ;;  %v70_v47 = vadd.f32 %v63_v25, %v51_v24 }
  0x29   :  { %182 = vrot.lane.b32.xlu1 %v2852_v18, %s2800_s2  ;;  %146 = vrot.lane.b32.xlu0 %v2852_v18, %s2801_s23  ;;  %v65_v31 = vld [vmem:[#allocation7 + $0x29] ss:$4 sm:$0x3]  ;;  %v2860_v32 = vmax.f32 %v99_v26, %v109_v27  ;;  %v100_v33 = vmax.f32 %v76_v29, %v87_v28  ;;  %v111_v36 = vld [vmem:[#allocation7 + $0x23] ss:$4 sm:$0x3] }
  0x2a   :  { %v77_v34 = vmax.f32 %v53_v30, %v65_v31  ;;  %v89_v37 = vld [vmem:[#allocation7 + $0x2a] ss:$4 sm:$0x3]  ;;  %v113_v40 = vld [vmem:[#allocation7 + $0x2b] ss:$4 sm:$0x3]  ;;  %v117_v45 = vadd.f32 %v109_v27, %v93_v44  ;;  %v94_v48 = vadd.f32 %v87_v28, %v70_v47  ;;  %v71_v51 = vadd.f32 %v65_v31, %v53_v30 }
  0x2b   :  { %v2866_v38 = vmax.f32 %v100_v33, %v111_v36  ;;  %s2804_s26 = smov 32   ;;  %s2805_s27 = smov 48   ;;  %v2874_v42 = vmul.f32 0.25, %v116_v35  ;;  %v43_v59 = vld [vmem:[#allocation7] ss:$4 sm:$0x3] }
  0x2c   :  { %v101_v39 = vmax.f32 %v77_v34, %v89_v37  ;;  %s2806_s28 = smov 16   ;;  %v2892_v46 = vmul.f32 0.25, %v117_v45  ;;  %v118_v49 = vadd.f32 %v111_v36, %v94_v48  ;;  %v95_v52 = vadd.f32 %v89_v37, %v71_v51  ;;  %v55_v60 = vld [vmem:[#allocation7 + $0x1] ss:$4 sm:$0x3]  ;;  %s2808_s29 = smov 19  }
  0x2d   :  { %200 = vrot.lane.b32.xlu1 %v2852_v18, %s2802_s24  ;;  %164 = vrot.lane.b32.xlu0 %v2852_v18, %s2803_s25  ;;  %v66_v63 = vadd.f32 %v55_v60, %v43_v59  ;;  %v79_v0 = vld [vmem:[#allocation7 + $0x2] ss:$4 sm:$0x3]  ;;  %v103_v4 = vld [vmem:[#allocation7 + $0x3] ss:$4 sm:$0x3]  ;;  %v72_v26 = vmax.f32 %v43_v59, %v55_v60 }
  0x2e   :  { %v2868_v41 = vmax.f32 %v101_v39, %v113_v40  ;;  %v2906_v50 = vmul.f32 0.25, %v118_v49  ;;  %v119_v53 = vadd.f32 %v113_v40, %v95_v52  ;;  %v2807_v7 = vmov 1966171168   ;;  %s2809_s30 = smov 38   ;;  %s2810_s4 = smov 57  }
  0x2f   :  { %v90_v3 = vadd.f32 %v79_v0, %v66_v63  ;;  %v413_v8 = vunpack.c.l.s4 %v2807_v7  ;;  %v3022_v15 = vshrl.u32 %v415_v9, 7  ;;  %v139_v28 = vrot.slane %v2852_v18, 1  ;;  %s2811_s5 = smov 76   ;;  %s2812_s6 = smov 95  }
  0x30   :  { %v2924_v54 = vmul.f32 0.25, %v119_v53  ;;  %v96_v45 = vmax.f32 %v72_v26, %v79_v0  ;;  %s2814_s7 = smov 3   ;;  %s2815_s8 = smov 2   ;;  %vm1028_vm0 = vcmask 130048   ;;  %vm1031_vm1 = vcmask 154624  }
  0x31   :  { %236 = vrot.lane.b32.xlu1 %v2852_v18, %s2804_s26  ;;  %218 = vrot.lane.b32.xlu0 %v2852_v18, %s2805_s27  ;;  %v114_v10 = vadd.f32 %v103_v4, %v90_v3  ;;  %v414_v13 = vunpack.c.0.s8 %v413_v8  ;;  %4898 = vst [vmem:[#allocation12_spill] sm:$0xff] %v3022_v15  ;;  %s4776_s9 = smov 1   ;;  %s4778_s10 = smov 127   ;;  %vm1034_vm2 = vcmask 285696   ;;  %vm1037_vm3 = vcmask 310272  }
  0x32   :  { %v3075_v3 = vmax.f32 %v96_v45, %v103_v4  ;;  %s4774_s11 = smov 126   ;;  %s4772_s12 = smov 125   ;;  %vm1040_vm4 = vcmask 441344   ;;  %vm1043_vm5 = vcmask 465920   ;;  %vm1046_vm6 = vcmask 596992  }
  0x33   :  { %v3028_v17 = vmul.f32 0.25, %v114_v10  ;;  %v3039_v31 = vsub.s32 %v414_v13, %v3022_v15  ;;  %vm1049_vm7 = vcmask 621568   ;;  %vm1052_vm8 = vcmask 752640   ;;  %s3374_s13 = sld [smem:[#allocation3 + $0x3]] }
  0x34   :  { %vm1055_vm9 = vcmask 777216   ;;  %vm1058_vm10 = vcmask 908288   ;;  %vm1061_vm11 = vcmask 932864   ;;  %s3379_s14 = sld [smem:[#allocation3 + $0xa]] }
  0x35   :  { %148 = vrot.lane.b32.xlu1 %v2874_v42, %s2801_s23  ;;  %254 = vrot.lane.b32.xlu0 %v2852_v18, %s2806_s28  ;;  %s3384_s15 = sld [smem:[#allocation3 + $0x11]] }
  0x36   :  { %s3389_s16 = sld [smem:[#allocation3 + $0x18]] }
  0x37   :  { %s3391_s17 = sld [smem:[#allocation3 + $0x1f]] }
  0x38   :  { %s3395_s18 = sld [smem:[#allocation3 + $0x26]] }
  0x39   :  { %184 = vrot.lane.b32.xlu1 %v2874_v42, %s2800_s2  ;;  %166 = vrot.lane.b32.xlu0 %v2874_v42, %s2803_s25  ;;  %s3400_s19 = sld [smem:[#allocation3 + $0x2d]] }
  0x3a   :  { %s3404_s21 = sld [smem:[#allocation3 + $0x34]] }
  0x3b   :  { %s3406_s22 = sld [smem:[#allocation3 + $0x3b]] }
  0x3c   :  { %s3448_s0 = sld [smem:[#allocation3 + $0xb]] }
  0x3d   :  { %220 = vrot.lane.b32.xlu1 %v2874_v42, %s2805_s27  ;;  %202 = vrot.lane.b32.xlu0 %v2874_v42, %s2802_s24  ;;  %s3452_s20 = sld [smem:[#allocation3 + $0x12]] }
  0x3e   :  { %s3460_s3 = sld [smem:[#allocation3 + $0x27]] }
  0x3f   :  { %s3466_s1 = sld [smem:[#allocation3 + $0x6]] }
  0x41   :  { %256 = vrot.lane.b32.xlu1 %v2874_v42, %s2806_s28  ;;  %238 = vrot.lane.b32.xlu0 %v2874_v42, %s2804_s26 }
  0x42   :  { %4899 = sst [smem:[#allocation13_spill]] %s3448_s0  ;;  %s4906_s0 = smov 125  }
  0x43   :  { %4900 = sst [smem:[#allocation14_spill]] %s3452_s20  ;;  %s4909_s20 = smov 126  }
  0x44   :  { %4903 = sst [smem:[#allocation17_spill]] %s3460_s3 }
  0x45   :  { %168 = vrot.lane.b32.xlu1 %v2892_v46, %s2803_s25  ;;  %150 = vrot.lane.b32.xlu0 %v2892_v46, %s2801_s23  ;;  %4905 = sst [smem:[#allocation19_spill]] %s3466_s1 }
  0x46   :  { %s3476_s3 = sld [smem:[#allocation3 + $0x1b]] }
  0x47   :  { %s3482_s1 = sld [smem:[#allocation3 + $0x29]] }
  0x49   :  { %204 = vrot.lane.b32.xlu1 %v2892_v46, %s2802_s24  ;;  %186 = vrot.lane.b32.xlu0 %v2892_v46, %s2800_s2 }
  0x4c   :  { %4910 = sst [smem:[#allocation22_spill]] %s3476_s3 }
  0x4d   :  { %240 = vrot.lane.b32.xlu1 %v2892_v46, %s2804_s26  ;;  %222 = vrot.lane.b32.xlu0 %v2892_v46, %s2805_s27  ;;  %4913 = sst [smem:[#allocation24_spill]] %s3482_s1 }
  0x4e   :  { %s3490_s3 = sld [smem:[#allocation3 + $0x38]] }
  0x4f   :  { %s3498_s1 = sld [smem:[#allocation3 + $0x4d]] }
  0x51   :  { %152 = vrot.lane.b32.xlu1 %v2906_v50, %s2801_s23  ;;  %258 = vrot.lane.b32.xlu0 %v2892_v46, %s2806_s28 }
  0x54   :  { %4914 = sst [smem:[#allocation25_spill]] %s3490_s3 }
  0x55   :  { %188 = vrot.lane.b32.xlu1 %v2906_v50, %s2800_s2  ;;  %170 = vrot.lane.b32.xlu0 %v2906_v50, %s2803_s25  ;;  %s3509_s3 = sld [smem:[#allocation3]] }
  0x59   :  { %224 = vrot.lane.b32.xlu1 %v2906_v50, %s2805_s27  ;;  %206 = vrot.lane.b32.xlu0 %v2906_v50, %s2802_s24 }
  0x5d   :  { %260 = vrot.lane.b32.xlu1 %v2906_v50, %s2806_s28  ;;  %242 = vrot.lane.b32.xlu0 %v2906_v50, %s2804_s26 }
  0x61   :  { %172 = vrot.lane.b32.xlu1 %v2924_v54, %s2803_s25  ;;  %154 = vrot.lane.b32.xlu0 %v2924_v54, %s2801_s23 }
  0x65   :  { %208 = vrot.lane.b32.xlu1 %v2924_v54, %s2802_s24  ;;  %190 = vrot.lane.b32.xlu0 %v2924_v54, %s2800_s2 }
  0x69   :  { %244 = vrot.lane.b32.xlu1 %v2924_v54, %s2804_s26  ;;  %226 = vrot.lane.b32.xlu0 %v2924_v54, %s2805_s27 }
  0x6d   :  { %284 = vrot.lane.b32.xlu1 %v2850_v14, %s2801_s23  ;;  %262 = vrot.lane.b32.xlu0 %v2924_v54, %s2806_s28 }
  0x71   :  { %320 = vrot.lane.b32.xlu1 %v2850_v14, %s2800_s2  ;;  %302 = vrot.lane.b32.xlu0 %v2850_v14, %s2803_s25 }
  0x75   :  { %356 = vrot.lane.b32.xlu1 %v2850_v14, %s2805_s27  ;;  %338 = vrot.lane.b32.xlu0 %v2850_v14, %s2802_s24 }
  0x79   :  { %392 = vrot.lane.b32.xlu1 %v2850_v14, %s2806_s28  ;;  %374 = vrot.lane.b32.xlu0 %v2850_v14, %s2804_s26 }
  0x7d   :  { %304 = vrot.lane.b32.xlu1 %v2854_v22, %s2803_s25  ;;  %286 = vrot.lane.b32.xlu0 %v2854_v22, %s2801_s23 }
  0x81   :  { %340 = vrot.lane.b32.xlu1 %v2854_v22, %s2802_s24  ;;  %322 = vrot.lane.b32.xlu0 %v2854_v22, %s2800_s2 }
  0x85   :  { %376 = vrot.lane.b32.xlu1 %v2854_v22, %s2804_s26  ;;  %358 = vrot.lane.b32.xlu0 %v2854_v22, %s2805_s27 }
  0x89   :  { %288 = vrot.lane.b32.xlu1 %v2860_v32, %s2801_s23  ;;  %394 = vrot.lane.b32.xlu0 %v2854_v22, %s2806_s28 }
  0x8d   :  { %324 = vrot.lane.b32.xlu1 %v2860_v32, %s2800_s2  ;;  %306 = vrot.lane.b32.xlu0 %v2860_v32, %s2803_s25 }
  0x91   :  { %360 = vrot.lane.b32.xlu1 %v2860_v32, %s2805_s27  ;;  %342 = vrot.lane.b32.xlu0 %v2860_v32, %s2802_s24 }
  0x95   :  { %396 = vrot.lane.b32.xlu1 %v2860_v32, %s2806_s28  ;;  %378 = vrot.lane.b32.xlu0 %v2860_v32, %s2804_s26 }
  0x99   :  { %308 = vrot.lane.b32.xlu1 %v2866_v38, %s2803_s25  ;;  %290 = vrot.lane.b32.xlu0 %v2866_v38, %s2801_s23 }
  0x9b   :  { %v2986_v55 = vpop.permute.xlu1 %182  ;;  %v2988_v56 = vpop.permute.xlu0 %146 }
  0x9c   :  { %v193_v27 = vrot.slane %v2986_v55, 1  ;;  %v157_v29 = vrot.slane %v2988_v56, 1  ;;  %v508_v36 = vcombine.low %v2852_v18, %v2988_v56  ;;  %v140_v56 = vrot.slane %v2874_v42, 1 }
  0x9d   :  { %344 = vrot.lane.b32.xlu1 %v2866_v38, %s2802_s24  ;;  %326 = vrot.lane.b32.xlu0 %v2866_v38, %s2800_s2 }
  0x9e   :  { %v557_v47 = vcombine.low %v139_v28, %v157_v29  ;;  %v518_v53 = vrot.slane %v508_v36, %v3039_v31  ;;  %v142_v29 = vrot.slane %v2906_v50, 1 }
  0x9f   :  { %v2994_v57 = vpop.permute.xlu1 %200  ;;  %v165_v58 = vpop.permute.xlu0 %164 }
  0xa0   :  { %v175_v19 = vrot.slane %v165_v58, 1  ;;  %v509_v30 = vcombine.low %v165_v58, %v2986_v55  ;;  %v211_v33 = vrot.slane %v2994_v57, 1  ;;  %v567_v63 = vrot.slane %v557_v47, %v3039_v31 }
  0xa1   :  { %380 = vrot.lane.b32.xlu1 %v2866_v38, %s2804_s26  ;;  %362 = vrot.lane.b32.xlu0 %v2866_v38, %s2805_s27 }
  0xa2   :  { %v558_v37 = vcombine.low %v175_v19, %v193_v27  ;;  %v525_v48 = vrot.slane %v509_v30, %v3039_v31  ;;  %v141_v27 = vrot.slane %v2892_v46, 1 }
  0xa3   :  { %v237_v61 = vpop.permute.xlu1 %236  ;;  %v219_v62 = vpop.permute.xlu0 %218 }
  0xa4   :  { %v247_v20 = vrot.slane %v237_v61, 1  ;;  %v229_v21 = vrot.slane %v219_v62, 1  ;;  %v510_v34 = vcombine.low %v2994_v57, %v219_v62  ;;  %v574_v55 = vrot.slane %v558_v37, %v3039_v31 }
  0xa5   :  { %292 = vrot.lane.b32.xlu1 %v2868_v41, %s2801_s23  ;;  %398 = vrot.lane.b32.xlu0 %v2866_v38, %s2806_s28  ;;  %v540_v0 = vcombine.low %v518_v53, %v525_v48 }
  0xa6   :  { %v559_v39 = vcombine.low %v211_v33, %v229_v21  ;;  %v532_v52 = vrot.slane %v510_v34, %v3039_v31  ;;  %v589_v4 = vcombine.low %v567_v63, %v574_v55 }
  0xa7   :  { %v3004_v1 = vpop.permute.xlu1 %148  ;;  %v255_v2 = vpop.permute.xlu0 %254 }
  0xa8   :  { %v265_v16 = vrot.slane %v255_v2, 1  ;;  %v511_v23 = vcombine.low %v237_v61, %v255_v2  ;;  %v158_v57 = vrot.slane %v3004_v1, 1  ;;  %v581_v58 = vrot.slane %v559_v39, %v3039_v31 }
  0xa9   :  { %328 = vrot.lane.b32.xlu1 %v2868_v41, %s2800_s2  ;;  %310 = vrot.lane.b32.xlu0 %v2868_v41, %s2803_s25  ;;  %v612_v7 = vcombine.low %v2874_v42, %v3004_v1  ;;  %v597_v30 = vrot.slane %v589_v4, %v3039_v31 }
  0xaa   :  { %v560_v35 = vcombine.low %v247_v20, %v265_v16  ;;  %v539_v40 = vrot.slane %v511_v23, %v3039_v31 }
  0xab   :  { %v3010_v5 = vpop.permute.xlu1 %184  ;;  %v3012_v6 = vpop.permute.xlu0 %166 }
  0xac   :  { %v194_v49 = vrot.slane %v3010_v5, 1  ;;  %v176_v51 = vrot.slane %v3012_v6, 1  ;;  %v588_v18 = vrot.slane %v560_v35, %v3039_v31  ;;  %v541_v59 = vcombine.low %v532_v52, %v539_v40 }
  0xad   :  { %364 = vrot.lane.b32.xlu1 %v2868_v41, %s2805_s27  ;;  %346 = vrot.lane.b32.xlu0 %v2868_v41, %s2802_s24  ;;  %v613_v60 = vcombine.low %v3012_v6, %v3010_v5  ;;  %v661_v6 = vcombine.low %v140_v56, %v158_v57 }
  0xae   :  { %v662_v2 = vcombine.low %v176_v51, %v194_v49  ;;  %v590_v5 = vcombine.low %v581_v58, %v588_v18  ;;  %v3093_v19 = vrot.slane %v541_v59, %v3039_v31 }
  0xaf   :  { %v3018_v11 = vpop.permute.xlu1 %220  ;;  %v3020_v12 = vpop.permute.xlu0 %202  ;;  %v629_v13 = vrot.slane %v613_v60, %v3039_v31 }
  0xb0   :  { %v614_v42 = vcombine.low %v3020_v12, %v3018_v11  ;;  %v678_v20 = vrot.slane %v662_v2, %v3039_v31  ;;  %v230_v21 = vrot.slane %v3018_v11, 1  ;;  %v212_v23 = vrot.slane %v3020_v12, 1 }
  0xb1   :  { %400 = vrot.lane.b32.xlu1 %v2868_v41, %s2806_s28  ;;  %382 = vrot.lane.b32.xlu0 %v2868_v41, %s2804_s26  ;;  %v604_v28 = vrot.slane %v590_v5, %v3039_v31  ;;  %v671_v11 = vrot.slane %v661_v6, %v3039_v31 }
  0xb2   :  { %v636_v34 = vrot.slane %v614_v42, %v3039_v31  ;;  %v663_v40 = vcombine.low %v212_v23, %v230_v21 }
  0xb3   :  { %v3030_v24 = vpop.permute.xlu1 %256  ;;  %v3032_v25 = vpop.permute.xlu0 %238  ;;  %v3119_v48 = vcombine.low %v671_v11, %v678_v20  ;;  %v605_v18 = vcombine.low %v597_v30, %v604_v28 }
  0xb4   :  { %v615_v8 = vcombine.low %v3032_v25, %v3030_v24  ;;  %v266_v9 = vrot.slane %v3030_v24, 1  ;;  %v248_v10 = vrot.slane %v3032_v25, 1  ;;  %v3099_v24 = vrot.slane %v540_v0, %v3039_v31 }
  0xb5   :  { %162 = vrot.lane.b32.xlu1 %v3028_v17, %s2803_s25  ;;  %144 = vrot.lane.b32.xlu0 %v3028_v17, %s2801_s23  ;;  %v622_v25 = vrot.slane %v612_v7, %v3039_v31  ;;  %v685_v7 = vrot.slane %v663_v40, %v3039_v31 }
  0xb6   :  { %v643_v26 = vrot.slane %v615_v8, %v3039_v31  ;;  %v664_v12 = vcombine.low %v248_v10, %v266_v9  ;;  %v556_v39 = vcombine.low %v3099_v24, %v3093_v19 }
  0xb7   :  { %v3050_v43 = vpop.permute.xlu1 %168  ;;  %v3052_v44 = vpop.permute.xlu0 %150  ;;  %v644_v33 = vcombine.low %v622_v25, %v629_v13 }
  0xb8   :  { %v159_v35 = vrot.slane %v3052_v44, 1  ;;  %v645_v49 = vcombine.low %v636_v34, %v643_v26  ;;  %v692_v53 = vrot.slane %v664_v12, %v3039_v31  ;;  %v177_v55 = vrot.slane %v3050_v43, 1 }
  0xb9   :  { %198 = vrot.lane.b32.xlu1 %v3028_v17, %s2802_s24  ;;  %180 = vrot.lane.b32.xlu0 %v3028_v17, %s2800_s2  ;;  %v716_v56 = vcombine.low %v2892_v46, %v3052_v44  ;;  %v3137_v6 = vrot.slane %v644_v33, %v3039_v31 }
  0xba   :  { %v765_v58 = vcombine.low %v141_v27, %v159_v35  ;;  %v659_v4 = vrot.slane %v645_v49, %v3039_v31 }
  0xbb   :  { %v3070_v61 = vpop.permute.xlu1 %204  ;;  %v3072_v62 = vpop.permute.xlu0 %186 }
  0xbc   :  { %v195_v45 = vrot.slane %v3072_v62, 1  ;;  %v717_v57 = vcombine.low %v3050_v43, %v3072_v62  ;;  %v213_v59 = vrot.slane %v3070_v61, 1  ;;  %v701_v43 = vrot.slane %v3119_v48, %v3039_v31 }
  0xbd   :  { %234 = vrot.lane.b32.xlu1 %v3028_v17, %s2804_s26  ;;  %216 = vrot.lane.b32.xlu0 %v3028_v17, %s2805_s27  ;;  %v726_v62 = vrot.slane %v716_v56, %v3039_v31  ;;  %v775_v13 = vrot.slane %v765_v58, %v3039_v31  ;;  %v660_v35 = vcombine.low %v3137_v6, %v659_v4 }
  0xbe   :  { %v766_v8 = vcombine.low %v177_v55, %v195_v45  ;;  %v733_v10 = vrot.slane %v717_v57, %v3039_v31 }
  0xbf   :  { %v241_v1 = vpop.permute.xlu1 %240  ;;  %v3090_v16 = vpop.permute.xlu0 %222 }
  0xc0   :  { %v249_v51 = vrot.slane %v241_v1, 1  ;;  %v231_v52 = vrot.slane %v3090_v16, 1  ;;  %v718_v5 = vcombine.low %v3070_v61, %v3090_v16  ;;  %v694_v61 = vcombine.low %v685_v7, %v692_v53 }
  0xc1   :  { %282 = vrot.lane.b32.xlu1 %v3075_v3, %s2801_s23  ;;  %252 = vrot.lane.b32.xlu0 %v3028_v17, %s2806_s28  ;;  %v782_v23 = vrot.slane %v766_v8, %v3039_v31  ;;  %v748_v30 = vcombine.low %v726_v62, %v733_v10  ;;  %s3412_s23 = sld [smem:[#allocation3 + $0x50]] }
  0xc2   :  { %v767_v46 = vcombine.low %v213_v59, %v231_v52  ;;  %v740_v25 = vrot.slane %v718_v5, %v3039_v31  ;;  %v708_v34 = vrot.slane %v694_v61, %v3039_v31 }
  0xc3   :  { %v3114_v36 = vpop.permute.xlu1 %152  ;;  %v259_v37 = vpop.permute.xlu0 %258  ;;  %v756_v8 = vrot.slane %v748_v30, %v3039_v31 }
  0xc4   :  { %v267_v47 = vrot.slane %v259_v37, 1  ;;  %v719_v60 = vcombine.low %v241_v1, %v259_v37  ;;  %v160_v42 = vrot.slane %v3114_v36, 1  ;;  %v789_v28 = vrot.slane %v767_v46, %v3039_v31 }
  0xc5   :  { %318 = vrot.lane.b32.xlu1 %v3075_v3, %s2800_s2  ;;  %300 = vrot.lane.b32.xlu0 %v3075_v3, %s2803_s25  ;;  %v820_v37 = vcombine.low %v2906_v50, %v3114_v36  ;;  %v797_v50 = vcombine.low %v775_v13, %v782_v23  ;;  %v709_v59 = vcombine.low %v701_v43, %v708_v34  ;;  %s3410_s2 = sld [smem:[#allocation3 + $0x42]] }
  0xc6   :  { %v768_v63 = vcombine.low %v249_v51, %v267_v47  ;;  %v747_v1 = vrot.slane %v719_v60, %v3039_v31  ;;  %v869_v40 = vcombine.low %v142_v29, %v160_v42  ;;  %s3418_s25 = sld [smem:[#allocation3 + $0x57]] }
  0xc7   :  { %v189_v0 = vpop.permute.xlu1 %188  ;;  %v171_v2 = vpop.permute.xlu0 %170  ;;  %v830_v60 = vrot.slane %v820_v37, %v3039_v31  ;;  %v805_v6 = vrot.slane %v797_v50, %v3039_v31 }
  0xc8   :  { %v196_v44 = vrot.slane %v189_v0, 1  ;;  %v178_v9 = vrot.slane %v171_v2, 1  ;;  %v796_v16 = vrot.slane %v768_v63, %v3039_v31  ;;  %v821_v11 = vcombine.low %v171_v2, %v189_v0 }
  0xc9   :  { %354 = vrot.lane.b32.xlu1 %v3075_v3, %s2805_s27  ;;  %336 = vrot.lane.b32.xlu0 %v3075_v3, %s2802_s24  ;;  %v749_v45 = vcombine.low %v740_v25, %v747_v1  ;;  %v879_v63 = vrot.slane %v869_v40, %v3039_v31  ;;  %s3416_s24 = sld [smem:[#allocation3 + $0x49]] }
  0xca   :  { %v870_v12 = vcombine.low %v178_v9, %v196_v44  ;;  %v798_v49 = vcombine.low %v789_v28, %v796_v16  ;;  %v837_v56 = vrot.slane %v821_v11, %v3039_v31  ;;  %s3424_s27 = sld [smem:[#allocation3 + $0x1]] }
  0xcb   :  { %v225_v20 = vpop.permute.xlu1 %224  ;;  %v207_v21 = vpop.permute.xlu0 %206  ;;  %v763_v7 = vrot.slane %v749_v45, %v3039_v31 }
  0xcc   :  { %v232_v26 = vrot.slane %v225_v20, 1  ;;  %v214_v27 = vrot.slane %v207_v21, 1  ;;  %v822_v33 = vcombine.low %v207_v21, %v225_v20  ;;  %v886_v57 = vrot.slane %v870_v12, %v3039_v31 }
  0xcd   :  { %390 = vrot.lane.b32.xlu1 %v3075_v3, %s2806_s28  ;;  %372 = vrot.lane.b32.xlu0 %v3075_v3, %s2804_s26  ;;  %v852_v5 = vcombine.low %v830_v60, %v837_v56  ;;  %v764_v10 = vcombine.low %v756_v8, %v763_v7  ;;  %v143_v20 = vrot.slane %v2924_v54, 1  ;;  %s3422_s26 = sld [smem:[#allocation3 + $0x5e]] }
  0xce   :  { %v871_v51 = vcombine.low %v214_v27, %v232_v26  ;;  %v844_v29 = vrot.slane %v822_v33, %v3039_v31  ;;  %v901_v46 = vcombine.low %v879_v63, %v886_v57  ;;  %s3428_s28 = sld [smem:[#allocation3 + $0x8]] }
  0xcf   :  { %v261_v47 = vpop.permute.xlu1 %260  ;;  %v243_v48 = vpop.permute.xlu0 %242  ;;  %v860_v1 = vrot.slane %v852_v5, %v3039_v31 }
  0xd0   :  { %v268_v52 = vrot.slane %v261_v47, 1  ;;  %v250_v53 = vrot.slane %v243_v48, 1  ;;  %v823_v55 = vcombine.low %v243_v48, %v261_v47  ;;  %v893_v19 = vrot.slane %v871_v51, %v3039_v31 }
  0xd1   :  { %608 = vrot.lane.b32.xlu1 %v605_v18, %s2808_s29  ;;  %606 = vrot.lane.b32.xlu0 %v556_v39, %s2808_s29  ;;  %v812_v18 = vrot.slane %v798_v49, %v3039_v31  ;;  %v909_v13 = vrot.slane %v901_v46, %v3039_v31 }
  0xd2   :  { %v851_v36 = vrot.slane %v823_v55, %v3039_v31  ;;  %v872_v58 = vcombine.low %v250_v53, %v268_v52 }
  0xd3   :  { %v173_v0 = vpop.permute.xlu1 %172  ;;  %v155_v2 = vpop.permute.xlu0 %154  ;;  %v813_v62 = vcombine.low %v805_v6, %v812_v18  ;;  %v277_v18 = vrot.slane %v2850_v14, 1 }
  0xd4   :  { %v853_v24 = vcombine.low %v844_v29, %v851_v36  ;;  %v900_v39 = vrot.slane %v872_v58, %v3039_v31  ;;  %v179_v16 = vrot.slane %v173_v0, 1  ;;  %v161_v21 = vrot.slane %v155_v2, 1 }
  0xd5   :  { %712 = vrot.lane.b32.xlu1 %v709_v59, %s2809_s30  ;;  %710 = vrot.lane.b32.xlu0 %v660_v35, %s2809_s30  ;;  %v924_v12 = vcombine.low %v2924_v54, %v155_v2 }
  0xd6   :  { %v902_v44 = vcombine.low %v893_v19, %v900_v39  ;;  %v867_v61 = vrot.slane %v853_v24, %v3039_v31  ;;  %v973_v34 = vcombine.low %v143_v20, %v161_v21 }
  0xd7   :  { %v209_v9 = vpop.permute.xlu1 %208  ;;  %v191_v43 = vpop.permute.xlu0 %190  ;;  %v934_v51 = vrot.slane %v924_v12, %v3039_v31 }
  0xd8   :  { %v197_v4 = vrot.slane %v191_v43, 1  ;;  %v916_v42 = vrot.slane %v902_v44, %v3039_v31  ;;  %v925_v23 = vcombine.low %v173_v0, %v191_v43  ;;  %v868_v28 = vcombine.low %v860_v1, %v867_v61 }
  0xd9   :  { %816 = vrot.lane.b32.xlu1 %v813_v62, %s2810_s4  ;;  %814 = vrot.lane.b32.xlu0 %v764_v10, %s2810_s4  ;;  %v215_v33 = vrot.slane %v209_v9, 1  ;;  %v983_v55 = vrot.slane %v973_v34, %v3039_v31 }
  0xda   :  { %v917_v27 = vcombine.low %v909_v13, %v916_v42  ;;  %v974_v30 = vcombine.low %v179_v16, %v197_v4  ;;  %v941_v35 = vrot.slane %v925_v23, %v3039_v31 }
  0xdb   :  { %v245_v25 = vpop.permute.xlu1 %244  ;;  %v227_v26 = vpop.permute.xlu0 %226 }
  0xdc   :  { %v233_v11 = vrot.slane %v227_v26, 1  ;;  %v926_v37 = vcombine.low %v209_v9, %v227_v26  ;;  %v251_v47 = vrot.slane %v245_v25, 1  ;;  %v990_v54 = vrot.slane %v974_v30, %v3039_v31 }
  0xdd   :  { %920 = vrot.lane.b32.xlu1 %v917_v27, %s2811_s5  ;;  %918 = vrot.lane.b32.xlu0 %v868_v28, %s2811_s5  ;;  %v956_v56 = vcombine.low %v934_v51, %v941_v35 }
  0xde   :  { %v975_v48 = vcombine.low %v215_v33, %v233_v11  ;;  %v948_v57 = vrot.slane %v926_v37, %v3039_v31  ;;  %v1005_v2 = vcombine.low %v983_v55, %v990_v54 }
  0xdf   :  { %v285_v40 = vpop.permute.xlu1 %284  ;;  %v263_v45 = vpop.permute.xlu0 %262  ;;  %v964_v5 = vrot.slane %v956_v56, %v3039_v31 }
  0xe0   :  { %v269_v49 = vrot.slane %v263_v45, 1  ;;  %v927_v52 = vcombine.low %v245_v25, %v263_v45  ;;  %v997_v58 = vrot.slane %v975_v48, %v3039_v31  ;;  %v295_v19 = vrot.slane %v285_v40, 1 }
  0xe1   :  { %v1164_v46 = vcombine.low %v2850_v14, %v285_v40  ;;  %v1013_v10 = vrot.slane %v1005_v2, %v3039_v31 }
  0xe2   :  { %v976_v53 = vcombine.low %v251_v47, %v269_v49  ;;  %v955_v50 = vrot.slane %v927_v52, %v3039_v31  ;;  %v1213_v13 = vcombine.low %v277_v18, %v295_v19 }
  0xe3   :  { %v321_v29 = vpop.permute.xlu1 %320  ;;  %v303_v36 = vpop.permute.xlu0 %302  ;;  %v1174_v26 = vrot.slane %v1164_v46, %v3039_v31 }
  0xe4   :  { %v1004_v59 = vrot.slane %v976_v53, %v3039_v31  ;;  %v957_v60 = vcombine.low %v948_v57, %v955_v50  ;;  %v331_v63 = vrot.slane %v321_v29, 1  ;;  %v313_v0 = vrot.slane %v303_v36, 1 }
  0xe5   :  { %v1165_v24 = vcombine.low %v303_v36, %v321_v29  ;;  %v1223_v30 = vrot.slane %v1213_v13, %v3039_v31  ;;  %v278_v50 = vrot.slane %v2854_v22, 1 }
  0xe6   :  { %v1006_v7 = vcombine.low %v997_v58, %v1004_v59  ;;  %v971_v6 = vrot.slane %v957_v60, %v3039_v31  ;;  %v1214_v43 = vcombine.low %v313_v0, %v331_v63 }
  0xe7   :  { %v357_v39 = vpop.permute.xlu1 %356  ;;  %v339_v8 = vpop.permute.xlu0 %338  ;;  %v1181_v42 = vrot.slane %v1165_v24, %v3039_v31 }
  0xe8   :  { %v367_v44 = vrot.slane %v357_v39, 1  ;;  %v349_v9 = vrot.slane %v339_v8, 1  ;;  %v972_v62 = vcombine.low %v964_v5, %v971_v6  ;;  %v1020_v61 = vrot.slane %v1006_v7, %v3039_v31 }
  0xe9   :  { %v1166_v4 = vcombine.low %v339_v8, %v357_v39  ;;  %v1230_v27 = vrot.slane %v1214_v43, %v3039_v31  ;;  %v1196_v33 = vcombine.low %v1174_v26, %v1181_v42  ;;  %v279_v26 = vrot.slane %v2860_v32, 1 }
  0xea   :  { %1022 = vrot.lane.b32.xlu0 %v972_v62, %s2812_s6  ;;  %v1021_v20 = vcombine.low %v1013_v10, %v1020_v61  ;;  %v1215_v21 = vcombine.low %v349_v9, %v367_v44 }
  0xeb   :  { %v393_v1 = vpop.permute.xlu1 %392  ;;  %v375_v16 = vpop.permute.xlu0 %374  ;;  %v1188_v28 = vrot.slane %v1166_v4, %v3039_v31  ;;  %v1245_v47 = vcombine.low %v1223_v30, %v1230_v27  ;;  %v1204_v52 = vrot.slane %v1196_v33, %v3039_v31 }
  0xec   :  { %v403_v14 = vrot.slane %v393_v1, 1  ;;  %v385_v23 = vrot.slane %v375_v16, 1  ;;  %v1167_v25 = vcombine.low %v375_v16, %v393_v1  ;;  %1024 = vrot.lane.b32.xlu1 %v1021_v20, %s2812_s6  ;;  %v1237_v37 = vrot.slane %v1215_v21, %v3039_v31 }
  0xed   :  { %v1253_v56 = vrot.slane %v1245_v47, %v3039_v31 }
  0xee   :  { %v1195_v11 = vrot.slane %v1167_v25, %v3039_v31  ;;  %v1216_v12 = vcombine.low %v385_v23, %v403_v14 }
  0xef   :  { %v305_v34 = vpop.permute.xlu1 %304  ;;  %v287_v35 = vpop.permute.xlu0 %286 }
  0xf0   :  { %v1197_v40 = vcombine.low %v1188_v28, %v1195_v11  ;;  %v1244_v45 = vrot.slane %v1216_v12, %v3039_v31  ;;  %v314_v29 = vrot.slane %v305_v34, 1  ;;  %v296_v36 = vrot.slane %v287_v35, 1 }
  0xf1   :  { %v1268_v2 = vcombine.low %v2854_v22, %v287_v35 }
  0xf2   :  { %v1246_v48 = vcombine.low %v1237_v37, %v1244_v45  ;;  %v1211_v49 = vrot.slane %v1197_v40, %v3039_v31  ;;  %v1317_v19 = vcombine.low %v278_v50, %v296_v36 }
  0xf3   :  { %v341_v51 = vpop.permute.xlu1 %340  ;;  %v323_v54 = vpop.permute.xlu0 %322  ;;  %v1278_v9 = vrot.slane %v1268_v2, %v3039_v31 }
  0xf4   :  { %v332_v53 = vrot.slane %v323_v54, 1  ;;  %v1212_v55 = vcombine.low %v1204_v52, %v1211_v49  ;;  %v1260_v57 = vrot.slane %v1246_v48, %v3039_v31  ;;  %v1269_v58 = vcombine.low %v305_v34, %v323_v54 }
  0xf5   :  { %v350_v7 = vrot.slane %v341_v51, 1  ;;  %v1327_v22 = vrot.slane %v1317_v19, %v3039_v31 }
  0xf6   :  { %1262 = vrot.lane.b32.xlu0 %v1212_v55, %s2808_s29  ;;  %v1261_v63 = vcombine.low %v1253_v56, %v1260_v57  ;;  %v1318_v18 = vcombine.low %v314_v29, %v332_v53  ;;  %v1285_v24 = vrot.slane %v1269_v58, %v3039_v31 }
  0xf7   :  { %v377_v59 = vpop.permute.xlu1 %376  ;;  %v359_v60 = vpop.permute.xlu0 %358 }
  0xf8   :  { %v368_v0 = vrot.slane %v359_v60, 1  ;;  %1264 = vrot.lane.b32.xlu1 %v1261_v63, %s2808_s29  ;;  %v1270_v39 = vcombine.low %v341_v51, %v359_v60  ;;  %v386_v6 = vrot.slane %v377_v59, 1  ;;  %v1334_v43 = vrot.slane %v1318_v18, %v3039_v31  ;;  %s3430_s29 = sld [smem:[#allocation3 + $0xf]] }
  0xf9   :  { %v1300_v61 = vcombine.low %v1278_v9, %v1285_v24 }
  0xfa   :  { %v1319_v46 = vcombine.low %v350_v7, %v368_v0  ;;  %v1292_v4 = vrot.slane %v1270_v39, %v3039_v31  ;;  %v1349_v21 = vcombine.low %v1327_v22, %v1334_v43 }
  0xfb   :  { %v289_v8 = vpop.permute.xlu1 %288  ;;  %v395_v5 = vpop.permute.xlu0 %394  ;;  %v1308_v33 = vrot.slane %v1300_v61, %v3039_v31  ;;  %v280_v61 = vrot.slane %v2866_v38, 1 }
  0xfc   :  { %v404_v44 = vrot.slane %v395_v5, 1  ;;  %v1271_v62 = vcombine.low %v377_v59, %v395_v5  ;;  %v1341_v16 = vrot.slane %v1319_v46, %v3039_v31  ;;  %v297_v28 = vrot.slane %v289_v8, 1 }
  0xfd   :  { %v1372_v35 = vcombine.low %v2860_v32, %v289_v8  ;;  %v1357_v48 = vrot.slane %v1349_v21, %v3039_v31 }
  0xfe   :  { %v1320_v10 = vcombine.low %v386_v6, %v404_v44  ;;  %v1299_v13 = vrot.slane %v1271_v62, %v3039_v31  ;;  %v1421_v54 = vcombine.low %v279_v26, %v297_v28 }
  0xff   :  { %v325_v42 = vpop.permute.xlu1 %324  ;;  %v307_v1 = vpop.permute.xlu0 %306  ;;  %v1382_v36 = vrot.slane %v1372_v35, %v3039_v31 }
 0x100   :  { %v1348_v20 = vrot.slane %v1320_v10, %v3039_v31  ;;  %v1301_v14 = vcombine.low %v1292_v4, %v1299_v13  ;;  %v333_v23 = vrot.slane %v325_v42, 1  ;;  %v315_v25 = vrot.slane %v307_v1, 1 }
 0x101   :  { %v1373_v11 = vcombine.low %v307_v1, %v325_v42  ;;  %v1431_v0 = vrot.slane %v1421_v54, %v3039_v31 }
 0x102   :  { %v1350_v27 = vcombine.low %v1341_v16, %v1348_v20  ;;  %v1315_v34 = vrot.slane %v1301_v14, %v3039_v31  ;;  %v1422_v45 = vcombine.low %v315_v25, %v333_v23 }
 0x103   :  { %v361_v12 = vpop.permute.xlu1 %360  ;;  %v343_v30 = vpop.permute.xlu0 %342  ;;  %v1389_v52 = vrot.slane %v1373_v11, %v3039_v31 }
 0x104   :  { %v369_v37 = vrot.slane %v361_v12, 1  ;;  %v351_v40 = vrot.slane %v343_v30, 1  ;;  %v1316_v47 = vcombine.low %v1308_v33, %v1315_v34  ;;  %v1364_v49 = vrot.slane %v1350_v27, %v3039_v31 }
 0x105   :  { %v1374_v51 = vcombine.low %v343_v30, %v361_v12  ;;  %v1438_v58 = vrot.slane %v1422_v45, %v3039_v31  ;;  %v1404_v2 = vcombine.low %v1382_v36, %v1389_v52 }
 0x106   :  { %1366 = vrot.lane.b32.xlu0 %v1316_v47, %s2809_s30  ;;  %v1365_v56 = vcombine.low %v1357_v48, %v1364_v49  ;;  %v1423_v57 = vcombine.low %v351_v40, %v369_v37 }
 0x107   :  { %v397_v53 = vpop.permute.xlu1 %396  ;;  %v379_v55 = vpop.permute.xlu0 %378  ;;  %v1396_v59 = vrot.slane %v1374_v51, %v3039_v31  ;;  %v1453_v8 = vcombine.low %v1431_v0, %v1438_v58  ;;  %v1412_v46 = vrot.slane %v1404_v2, %v3039_v31 }
 0x108   :  { %v405_v50 = vrot.slane %v397_v53, 1  ;;  %v387_v32 = vrot.slane %v379_v55, 1  ;;  %v1375_v29 = vcombine.low %v379_v55, %v397_v53  ;;  %1368 = vrot.lane.b32.xlu1 %v1365_v56, %s2809_s30  ;;  %v1445_v19 = vrot.slane %v1423_v57, %v3039_v31  ;;  %s3434_s30 = sld [smem:[#allocation3 + $0x16]] }
 0x109   :  { %v1461_v10 = vrot.slane %v1453_v8, %v3039_v31 }
 0x10a   :  { %v1403_v60 = vrot.slane %v1375_v29, %v3039_v31  ;;  %v1424_v63 = vcombine.low %v387_v32, %v405_v50  ;;  %v281_v32 = vrot.slane %v2868_v41, 1 }
 0x10b   :  { %v309_v18 = vpop.permute.xlu1 %308  ;;  %v291_v7 = vpop.permute.xlu0 %290 }
 0x10c   :  { %v1405_v24 = vcombine.low %v1396_v59, %v1403_v60  ;;  %v1452_v39 = vrot.slane %v1424_v63, %v3039_v31  ;;  %v316_v4 = vrot.slane %v309_v18, 1  ;;  %v298_v13 = vrot.slane %v291_v7, 1 }
 0x10d   :  { %v1476_v14 = vcombine.low %v2866_v38, %v291_v7 }
 0x10e   :  { %v1419_v5 = vrot.slane %v1405_v24, %v3039_v31  ;;  %v1454_v6 = vcombine.low %v1445_v19, %v1452_v39  ;;  %v1525_v26 = vcombine.low %v280_v61, %v298_v13 }
 0x10f   :  { %v345_v44 = vpop.permute.xlu1 %344  ;;  %v327_v9 = vpop.permute.xlu0 %326  ;;  %v1486_v35 = vrot.slane %v1476_v14, %v3039_v31 }
 0x110   :  { %v334_v43 = vrot.slane %v327_v9, 1  ;;  %v1420_v62 = vcombine.low %v1412_v46, %v1419_v5  ;;  %v1468_v22 = vrot.slane %v1454_v6, %v3039_v31  ;;  %v1477_v42 = vcombine.low %v309_v18, %v327_v9 }
 0x111   :  { %v352_v25 = vrot.slane %v345_v44, 1  ;;  %v1535_v38 = vrot.slane %v1525_v26, %v3039_v31 }
 0x112   :  { %1470 = vrot.lane.b32.xlu0 %v1420_v62, %s2810_s4  ;;  %v1469_v20 = vcombine.low %v1461_v10, %v1468_v22  ;;  %v1526_v23 = vcombine.low %v316_v4, %v334_v43  ;;  %v1493_v27 = vrot.slane %v1477_v42, %v3039_v31 }
 0x113   :  { %v381_v1 = vpop.permute.xlu1 %380  ;;  %v363_v16 = vpop.permute.xlu0 %362 }
 0x114   :  { %v370_v21 = vrot.slane %v363_v16, 1  ;;  %1472 = vrot.lane.b32.xlu1 %v1469_v20, %s2810_s4  ;;  %v1478_v28 = vcombine.low %v345_v44, %v363_v16  ;;  %v388_v30 = vrot.slane %v381_v1, 1  ;;  %v1542_v37 = vrot.slane %v1526_v23, %v3039_v31  ;;  %s3436_s4 = sld [smem:[#allocation3 + $0x1d]] }
 0x115   :  { %v1508_v47 = vcombine.low %v1486_v35, %v1493_v27  ;;  %v138_v16 = vrot.slane %v3028_v17, 1 }
 0x116   :  { %v1527_v33 = vcombine.low %v352_v25, %v370_v21  ;;  %v1500_v48 = vrot.slane %v1478_v28, %v3039_v31  ;;  %v1557_v55 = vcombine.low %v1535_v38, %v1542_v37 }
 0x117   :  { %v293_v11 = vpop.permute.xlu1 %292  ;;  %v399_v12 = vpop.permute.xlu0 %398  ;;  %v1516_v36 = vrot.slane %v1508_v47, %v3039_v31 }
 0x118   :  { %v406_v34 = vrot.slane %v399_v12, 1  ;;  %v1479_v40 = vcombine.low %v381_v1, %v399_v12  ;;  %v1549_v52 = vrot.slane %v1527_v33, %v3039_v31  ;;  %v299_v58 = vrot.slane %v293_v11, 1 }
 0x119   :  { %v1580_v2 = vcombine.low %v2868_v41, %v293_v11  ;;  %v1565_v39 = vrot.slane %v1557_v55, %v3039_v31 }
 0x11a   :  { %v1528_v45 = vcombine.low %v388_v30, %v406_v34  ;;  %v1507_v49 = vrot.slane %v1479_v40, %v3039_v31  ;;  %v1629_v6 = vcombine.low %v281_v32, %v299_v58 }
 0x11b   :  { %v329_v51 = vpop.permute.xlu1 %328  ;;  %v311_v54 = vpop.permute.xlu0 %310  ;;  %v1590_v61 = vrot.slane %v1580_v2, %v3039_v31  ;;  %v276_v2 = vrot.slane %v3075_v3, 1 }
 0x11c   :  { %v1556_v53 = vrot.slane %v1528_v45, %v3039_v31  ;;  %v1509_v56 = vcombine.low %v1500_v48, %v1507_v49  ;;  %v335_v57 = vrot.slane %v329_v51, 1  ;;  %v317_v50 = vrot.slane %v311_v54, 1 }
 0x11d   :  { %v1581_v60 = vcombine.low %v311_v54, %v329_v51  ;;  %v1639_v20 = vrot.slane %v1629_v6, %v3039_v31 }
 0x11e   :  { %v1558_v29 = vcombine.low %v1549_v52, %v1556_v53  ;;  %v1523_v59 = vrot.slane %v1509_v56, %v3039_v31  ;;  %v1630_v19 = vcombine.low %v317_v50, %v335_v57 }
 0x11f   :  { %v365_v63 = vpop.permute.xlu1 %364  ;;  %v347_v0 = vpop.permute.xlu0 %346  ;;  %v1597_v46 = vrot.slane %v1581_v60, %v3039_v31 }
 0x120   :  { %v371_v18 = vrot.slane %v365_v63, 1  ;;  %v353_v7 = vrot.slane %v347_v0, 1  ;;  %v1524_v24 = vcombine.low %v1516_v36, %v1523_v59  ;;  %v1572_v8 = vrot.slane %v1558_v29, %v3039_v31 }
 0x121   :  { %v1582_v5 = vcombine.low %v347_v0, %v365_v63  ;;  %v1646_v4 = vrot.slane %v1630_v19, %v3039_v31  ;;  %v1612_v21 = vcombine.low %v1590_v61, %v1597_v46  ;;  %v2813_v59 = vmov 0.0  }
 0x122   :  { %1574 = vrot.lane.b32.xlu0 %v1524_v24, %s2811_s5  ;;  %v1573_v43 = vcombine.low %v1565_v39, %v1572_v8  ;;  %v1631_v62 = vcombine.low %v353_v7, %v371_v18 }
 0x123   :  { %v401_v44 = vpop.permute.xlu1 %400  ;;  %v383_v9 = vpop.permute.xlu0 %382  ;;  %v1604_v13 = vrot.slane %v1582_v5, %v3039_v31  ;;  %v1661_v11 = vcombine.low %v1639_v20, %v1646_v4  ;;  %v1620_v35 = vrot.slane %v1612_v21, %v3039_v31 }
 0x124   :  { %v407_v10 = vrot.slane %v401_v44, 1  ;;  %v389_v41 = vrot.slane %v383_v9, 1  ;;  %v1583_v22 = vcombine.low %v383_v9, %v401_v44  ;;  %1576 = vrot.lane.b32.xlu1 %v1573_v43, %s2811_s5  ;;  %v1653_v25 = vrot.slane %v1631_v62, %v3039_v31  ;;  %s3440_s5 = sld [smem:[#allocation3 + $0x24]] }
 0x125   :  { %v1669_v47 = vrot.slane %v1661_v11, %v3039_v31 }
 0x126   :  { %v1611_v42 = vrot.slane %v1583_v22, %v3039_v31  ;;  %v1632_v1 = vcombine.low %v389_v41, %v407_v10 }
 0x127   :  { %v163_v14 = vpop.permute.xlu1 %162  ;;  %v145_v23 = vpop.permute.xlu0 %144 }
 0x128   :  { %v1613_v26 = vcombine.low %v1604_v13, %v1611_v42  ;;  %v1660_v27 = vrot.slane %v1632_v1, %v3039_v31  ;;  %v156_v28 = vrot.slane %v145_v23, 1  ;;  %v174_v33 = vrot.slane %v163_v14, 1 }
 0x129   :  { %v408_v63 = vcombine.low %v3028_v17, %v145_v23 }
 0x12a   :  { %v1627_v12 = vrot.slane %v1613_v26, %v3039_v31  ;;  %v1662_v30 = vcombine.low %v1653_v25, %v1660_v27  ;;  %v457_v34 = vcombine.low %v138_v16, %v156_v28 }
 0x12b   :  { %v199_v37 = vpop.permute.xlu1 %198  ;;  %v181_v40 = vpop.permute.xlu0 %180  ;;  %v418_v9 = vrot.slane %v408_v63, %v3039_v31 }
 0x12c   :  { %v192_v45 = vrot.slane %v181_v40, 1  ;;  %v1628_v38 = vcombine.low %v1620_v35, %v1627_v12  ;;  %v1676_v48 = vrot.slane %v1662_v30, %v3039_v31  ;;  %v467_v49 = vrot.slane %v457_v34, %v3039_v31 }
 0x12d   :  { %v210_v51 = vrot.slane %v199_v37, 1  ;;  %v409_v0 = vcombine.low %v163_v14, %v181_v40 }
 0x12e   :  { %v458_v54 = vcombine.low %v174_v33, %v192_v45  ;;  %1678 = vrot.lane.b32.xlu0 %v1628_v38, %s2812_s6  ;;  %v1677_v55 = vcombine.low %v1669_v47, %v1676_v48 }
 0x12f   :  { %v235_v52 = vpop.permute.xlu1 %234  ;;  %v217_v53 = vpop.permute.xlu0 %216  ;;  %v425_v43 = vrot.slane %v409_v0, %v3039_v31 }
 0x130   :  { %v474_v56 = vrot.slane %v458_v54, %v3039_v31  ;;  %v228_v57 = vrot.slane %v217_v53, 1  ;;  %1680 = vrot.lane.b32.xlu1 %v1677_v55, %s2812_s6  ;;  %v246_v32 = vrot.slane %v235_v52, 1  ;;  %v410_v18 = vcombine.low %v199_v37, %v217_v53  ;;  %s3442_s6 = sld [smem:[#allocation3 + $0x2b]] }
 0x131   :  { %v440_v28 = vcombine.low %v418_v9, %v425_v43 }
 0x132   :  { %v489_v50 = vcombine.low %v467_v49, %v474_v56  ;;  %v459_v29 = vcombine.low %v210_v51, %v228_v57  ;;  %1712 = vrot.lane.b32.xlu0 %v2813_v59, %s2814_s7 }
 0x133   :  { %v283_v36 = vpop.permute.xlu1 %282  ;;  %v253_v58 = vpop.permute.xlu0 %252  ;;  %v448_v54 = vrot.slane %v440_v28, %v3039_v31 }
 0x134   :  { %v264_v60 = vrot.slane %v253_v58, 1  ;;  %1752 = vrot.lane.b32.xlu1 %v2813_v59, %s2815_s8  ;;  %v481_v7 = vrot.slane %v459_v29, %v3039_v31  ;;  %v294_v19 = vrot.slane %v283_v36, 1  ;;  %v1064_v39 = vcombine.low %v3075_v3, %v283_v36 }
 0x135   :  { %v411_v8 = vcombine.low %v235_v52, %v253_v58  ;;  %v432_v3 = vrot.slane %v410_v18, %v3039_v31  ;;  %v497_v16 = vrot.slane %v489_v50, %v3039_v31 }
 0x136   :  { %v460_v24 = vcombine.low %v246_v32, %v264_v60  ;;  %1812 = vrot.lane.b32.xlu0 %v2813_v59, %s4776_s9  ;;  %v1113_v10 = vcombine.low %v276_v2, %v294_v19  ;;  %v1074_v61 = vrot.slane %v1064_v39, %v3039_v31 }
 0x137   :  { %v319_v5 = vpop.permute.xlu1 %318  ;;  %v301_v6 = vpop.permute.xlu0 %300  ;;  %v439_v4 = vrot.slane %v411_v8, %v3039_v31 }
 0x138   :  { %v488_v17 = vrot.slane %v460_v24, %v3039_v31  ;;  %v330_v46 = vrot.slane %v319_v5, 1  ;;  %v312_v44 = vrot.slane %v301_v6, 1  ;;  %v1065_v62 = vcombine.low %v301_v6, %v319_v5  ;;  %1926 = vrot.lane.b32.xlu1 %v2813_v59, %s4778_s10 }
 0x139   :  { %v1123_v25 = vrot.slane %v1113_v10, %v3039_v31  ;;  %v441_v11 = vcombine.low %v432_v3, %v439_v4 }
 0x13a   :  { %v490_v41 = vcombine.low %v481_v7, %v488_v17  ;;  %v1114_v22 = vcombine.low %v312_v44, %v330_v46  ;;  %v1081_v13 = vrot.slane %v1065_v62, %v3039_v31  ;;  %1986 = vrot.lane.b32.xlu0 %v2813_v59, %s4774_s11 }
 0x13b   :  { %v355_v42 = vpop.permute.xlu1 %354  ;;  %v337_v1 = vpop.permute.xlu0 %336  ;;  %v455_v52 = vrot.slane %v441_v11, %v3039_v31 }
 0x13c   :  { %v366_v20 = vrot.slane %v355_v42, 1  ;;  %v348_v21 = vrot.slane %v337_v1, 1  ;;  %v1066_v14 = vcombine.low %v337_v1, %v355_v42  ;;  %v504_v23 = vrot.slane %v490_v41, %v3039_v31  ;;  %2046 = vrot.lane.b32.xlu1 %v2813_v59, %s4772_s12 }
 0x13d   :  { %v1130_v26 = vrot.slane %v1114_v22, %v3039_v31  ;;  %v1096_v12 = vcombine.low %v1074_v61, %v1081_v13  ;;  %v456_v60 = vcombine.low %v448_v54, %v455_v52 }
 0x13e   :  { %v1115_v27 = vcombine.low %v348_v21, %v366_v20  ;;  %v505_v34 = vcombine.low %v497_v16, %v504_v23  ;;  %v1088_v35 = vrot.slane %v1066_v14, %v3039_v31 }
 0x13f   :  { %v391_v30 = vpop.permute.xlu1 %390  ;;  %v373_v33 = vpop.permute.xlu0 %372  ;;  %v1145_v47 = vcombine.low %v1123_v25, %v1130_v26  ;;  %v1104_v55 = vrot.slane %v1096_v12, %v3039_v31  ;;  %v1029_v39 = vsel %vm1028_vm0, %v456_v60, 0.0 }
 0x140   :  { %v402_v37 = vrot.slane %v391_v30, 1  ;;  %v384_v40 = vrot.slane %v373_v33, 1  ;;  %v1067_v45 = vcombine.low %v373_v33, %v391_v30  ;;  %v1030_v38 = vsel %vm1028_vm0, %v505_v34, 0.0 }
 0x141   :  { %v1137_v48 = vrot.slane %v1115_v27, %v3039_v31  ;;  %v1153_v59 = vrot.slane %v1145_v47, %v3039_v31 }
 0x142   :  { %v1095_v49 = vrot.slane %v1067_v45, %v3039_v31  ;;  %v1116_v51 = vcombine.low %v384_v40, %v402_v37 }
 0x143   :  { %v609_v53 = vpop.permute.xlu1 %608  ;;  %v607_v29 = vpop.permute.xlu0 %606 }
 0x144   :  { %v1097_v56 = vcombine.low %v1088_v35, %v1095_v49  ;;  %v1144_v57 = vrot.slane %v1116_v51, %v3039_v31  ;;  %v1033_v50 = vsel %vm1031_vm1, %v1030_v38, %v609_v53  ;;  %v1032_v44 = vsel %vm1031_vm1, %v1029_v39, %v607_v29 }
 0x145   :  { %v1036_v32 = vsel %vm1034_vm2, %v1033_v50, 0.0  ;;  %v3513_v39 = vstv %s3391_s17  ;;  %s4920_s17 = sld [smem:[#allocation17_spill]] }
 0x146   :  { %v1111_v36 = vrot.slane %v1097_v56, %v3039_v31  ;;  %v1146_v58 = vcombine.low %v1137_v48, %v1144_v57 }
 0x147   :  { %v713_v63 = vpop.permute.xlu1 %712  ;;  %v711_v8 = vpop.permute.xlu0 %710 }
 0x148   :  { %v1039_v0 = vsel %vm1037_vm3, %v1036_v32, %v713_v63  ;;  %v1112_v2 = vcombine.low %v1104_v55, %v1111_v36  ;;  %v1160_v18 = vrot.slane %v1146_v58, %v3039_v31  ;;  %v1035_v31 = vsel %vm1034_vm2, %v1032_v44, 0.0 }
 0x149   :  { %v1042_v7 = vsel %vm1040_vm4, %v1039_v0, 0.0  ;;  %v1038_v43 = vsel %vm1037_vm3, %v1035_v31, %v711_v8  ;;  %v3516_v8 = vstv %s3395_s18  ;;  %v3537_v44 = vstv %s3412_s23 }
 0x14a   :  { %v1684_v19 = vsel %vm1028_vm0, %v1112_v2, 0.0  ;;  %v1161_v24 = vcombine.low %v1153_v59, %v1160_v18  ;;  %v1041_v62 = vsel %vm1040_vm4, %v1038_v43, 0.0  ;;  %v3501_v18 = vstv %s3374_s13  ;;  %s3534_s13 = sld [smem:[#allocation3 + $0xe]] }
 0x14b   :  { %v817_v5 = vpop.permute.xlu1 %816  ;;  %v815_v9 = vpop.permute.xlu0 %814  ;;  %v3544_v43 = vstv %s3422_s26  ;;  %s4929_s26 = sld [smem:[#allocation22_spill]] }
 0x14c   :  { %v1045_v6 = vsel %vm1043_vm5, %v1042_v7, %v817_v5  ;;  %v1685_v17 = vsel %vm1028_vm0, %v1161_v24, 0.0  ;;  %v1044_v3 = vsel %vm1043_vm5, %v1041_v62, %v815_v9  ;;  %v3504_v7 = vstv %s3379_s14  ;;  %s4916_s14 = sld [smem:[#allocation13_spill]] }
 0x14d   :  { %v1048_v46 = vsel %vm1046_vm6, %v1045_v6, 0.0  ;;  %v1047_v41 = vsel %vm1046_vm6, %v1044_v3, 0.0  ;;  %v1893_v24 = vstv %s3389_s16  ;;  %v3519_v5 = vstv %s3400_s19  ;;  %s4922_s19 = sld [smem:[#allocation19_spill]] }
 0x14e   :  { %v3526_v6 = vstv %s3404_s21  ;;  %v3541_v9 = vstv %s3418_s25  ;;  %v3547_v62 = vstv %s3424_s27  ;;  %v3550_v3 = vstv %s3428_s28  ;;  %s3556_s21 = sld [smem:[#allocation3 + $0x1c]] }
 0x14f   :  { %v919_v10 = vpop.permute.xlu0 %918  ;;  %v921_v16 = vpop.permute.xlu1 %920  ;;  %s3581_s25 = sld [smem:[#allocation3 + $0x2]] }
 0x150   :  { %v1050_v22 = vsel %vm1049_vm7, %v1047_v41, %v919_v10  ;;  %v1051_v54 = vsel %vm1049_vm7, %v1048_v46, %v921_v16  ;;  %v3532_v46 = vstv %s3410_s2  ;;  %v3553_v10 = vstv %s3430_s29  ;;  %s3570_s2 = sld [smem:[#allocation3 + $0x23]] }
 0x151   :  { %v1053_v61 = vsel %vm1052_vm8, %v1050_v22, 0.0  ;;  %v1054_v57 = vsel %vm1052_vm8, %v1051_v54, 0.0  ;;  %v3559_v22 = vstv %s3436_s4  ;;  %s3595_s27 = sld [smem:[#allocation3 + $0x9]]  ;;  %v3665_v54 = vstv %s3534_s13 }
 0x152   :  { %s3602_s28 = sld [smem:[#allocation3 + $0x10]]  ;;  %4950 = vst [vmem:[#allocation48_spill] sm:$0xff] %v3665_v54 }
 0x153   :  { %s3619_s29 = sld [smem:[#allocation3 + $0x2a]] }
 0x154   :  { %s4943_s4 = sld [smem:[#allocation24_spill]] }
 0x155   :  { %s3705_s13 = sld [smem:[#allocation3 + $0x2c]] }
 0x156   :  { %v3728_v15 = vstv %s3570_s2  ;;  %s3823_s2 = sld [smem:[#allocation3 + $0x33]] }
 0x157   :  { %4963 = vst [vmem:[#allocation60_spill] sm:$0xff] %v3728_v15 }
 0x15c   :  { %v1023_v4 = vpop.permute.xlu0 %1022 }
 0x15d   :  { %v1056_v13 = vsel %vm1055_vm9, %v1053_v61, %v1023_v4  ;;  %v3562_v61 = vstv %s3440_s5  ;;  %v3565_v4 = vstv %s3442_s6  ;;  %s3636_s5 = sld [smem:[#allocation3 + $0x1e]] }
 0x15e   :  { %v1059_v42 = vsel %vm1058_vm10, %v1056_v13, 0.0  ;;  %v1025_v20 = vpop.permute.xlu1 %1024  ;;  %s3649_s6 = sld [smem:[#allocation3 + $0x54]] }
 0x15f   :  { %v3341_v1 = vsel %vm1061_vm11, %v1059_v42, 0.0  ;;  %v1057_v36 = vsel %vm1055_vm9, %v1054_v57, %v1025_v20  ;;  %v3575_v42 = vstv %s4916_s14  ;;  %v3683_v57 = vstv %s4943_s4  ;;  %s3717_s14 = sld [smem:[#allocation3 + $0x5]] }
 0x160   :  { %1748 = vrot.lane.b32.xlu1 %v3341_v1, %s2815_s8  ;;  %v1060_v0 = vsel %vm1058_vm10, %v1057_v36, 0.0  ;;  %4926 = vst [vmem:[#allocation27_spill] sm:$0xff] %v3575_v42  ;;  %4954 = vst [vmem:[#allocation52_spill] sm:$0xff] %v3683_v57  ;;  %v3715_v20 = vstv %s3595_s27  ;;  %s3845_s27 = sld [smem:[#allocation3 + $0x4f]] }
 0x161   :  { %v3398_v2 = vsel %vm1061_vm11, %v1060_v0, 0.0  ;;  %v3703_v0 = vstv %s3581_s25  ;;  %4960 = vst [vmem:[#allocation57_spill] sm:$0xff] %v3715_v20  ;;  %s3835_s25 = sld [smem:[#allocation3 + $0x41]] }
 0x162   :  { %4958 = vst [vmem:[#allocation55_spill] sm:$0xff] %v3703_v0  ;;  %s3876_s4 = sld [smem:[#allocation3 + $0x15]] }
 0x164   :  { %1922 = vrot.lane.b32.xlu1 %v3341_v1, %s4778_s10 }
 0x168   :  { %2042 = vrot.lane.b32.xlu1 %v3341_v1, %s4772_s12  ;;  %v1263_v21 = vpop.permute.xlu0 %1262  ;;  %s3454_s12 = sld [smem:[#allocation3 + $0x19]] }
 0x169   :  { %v1686_v14 = vsel %vm1031_vm1, %v1684_v19, %v1263_v21  ;;  %v3507_v19 = vstv %s3384_s15  ;;  %s4917_s15 = sld [smem:[#allocation14_spill]] }
 0x16a   :  { %v1688_v23 = vsel %vm1034_vm2, %v1686_v14, 0.0  ;;  %v1265_v25 = vpop.permute.xlu1 %1264  ;;  %v3587_v14 = vstv %s4920_s17  ;;  %s3770_s17 = sld [smem:[#allocation3 + $0x4e]] }
 0x16b   :  { %v1687_v26 = vsel %vm1031_vm1, %v1685_v17, %v1265_v25  ;;  %v3529_v17 = vstv %s3406_s22  ;;  %4930 = vst [vmem:[#allocation30_spill] sm:$0xff] %v3587_v14  ;;  %v3593_v25 = vstv %s4922_s19  ;;  %s3792_s19 = sld [smem:[#allocation3 + $0x28]] }
 0x16c   :  { %v1689_v27 = vsel %vm1034_vm2, %v1687_v26, 0.0  ;;  %4932 = vst [vmem:[#allocation32_spill] sm:$0xff] %v3593_v25 }
 0x16e   :  { %4901 = sst [smem:[#allocation15_spill]] %s3454_s12 }
 0x16f   :  { %s3472_s12 = sld [smem:[#allocation3 + $0x14]]  ;;  %v3578_v16 = vstv %s4917_s15 }
 0x170   :  { %s4918_s16 = sld [smem:[#allocation15_spill]]  ;;  %4927 = vst [vmem:[#allocation28_spill] sm:$0xff] %v3578_v16 }
 0x171   :  { %s3725_s15 = sld [smem:[#allocation3 + $0x32]] }
 0x175   :  { %4908 = sst [smem:[#allocation21_spill]] %s3472_s12 }
 0x176   :  { %s3488_s12 = sld [smem:[#allocation3 + $0x31]] }
 0x177   :  { %s4925_s23 = sld [smem:[#allocation21_spill]] }
 0x178   :  { %v1367_v28 = vpop.permute.xlu0 %1366 }
 0x179   :  { %v1690_v11 = vsel %vm1037_vm3, %v1688_v23, %v1367_v28  ;;  %v3606_v28 = vmul.f32 %v3501_v18, %v3341_v1 }
 0x17a   :  { %v1692_v12 = vsel %vm1040_vm4, %v1690_v11, 0.0  ;;  %v1369_v30 = vpop.permute.xlu1 %1368  ;;  %v3610_v11 = vmul.f32 %v3504_v7, %v3341_v1 }
 0x17b   :  { %v1691_v33 = vsel %vm1037_vm3, %v1689_v27, %v1369_v30  ;;  %4935 = vst [vmem:[#allocation34_spill] sm:$0xff] %v3606_v28 }
 0x17c   :  { %v1693_v34 = vsel %vm1040_vm4, %v1691_v33, 0.0  ;;  %4936 = vst [vmem:[#allocation35_spill] sm:$0xff] %v3610_v11  ;;  %v3622_v33 = vmul.f32 %v1893_v24, %v3341_v1  ;;  %v3720_v41 = vstv %s3488_s12  ;;  %s3741_s12 = sld [smem:[#allocation3 + $0x40]] }
 0x17d   :  { %v3617_v30 = vstv %s4925_s23  ;;  %4961 = vst [vmem:[#allocation58_spill] sm:$0xff] %v3720_v41  ;;  %s3831_s23 = sld [smem:[#allocation3 + $0x3a]] }
 0x17e   :  { %4938 = vst [vmem:[#allocation37_spill] sm:$0xff] %v3617_v30  ;;  %4939 = vst [vmem:[#allocation38_spill] sm:$0xff] %v3622_v33 }
 0x184   :  { %v1471_v35 = vpop.permute.xlu0 %1470 }
 0x185   :  { %v1694_v37 = vsel %vm1043_vm5, %v1692_v12, %v1471_v35  ;;  %v3614_v12 = vmul.f32 %v3507_v19, %v3341_v1  ;;  %v3630_v35 = vmul.f32 %v3516_v8, %v3341_v1 }
 0x186   :  { %v1696_v40 = vsel %vm1046_vm6, %v1694_v37, 0.0  ;;  %v1473_v45 = vpop.permute.xlu1 %1472 }
 0x187   :  { %v1695_v38 = vsel %vm1043_vm5, %v1693_v34, %v1473_v45  ;;  %4937 = vst [vmem:[#allocation36_spill] sm:$0xff] %v3614_v12  ;;  %v3626_v34 = vmul.f32 %v3513_v39, %v3341_v1  ;;  %4941 = vst [vmem:[#allocation40_spill] sm:$0xff] %v3630_v35  ;;  %v3640_v45 = vmul.f32 %v3519_v5, %v3341_v1  ;;  %v3749_v35 = vstv %s3636_s5  ;;  %s3889_s5 = sld [smem:[#allocation3 + $0x35]] }
 0x188   :  { %v1697_v47 = vsel %vm1046_vm6, %v1695_v38, 0.0  ;;  %v3644_v38 = vmul.f32 %v3501_v18, %v3398_v2  ;;  %4966 = vst [vmem:[#allocation63_spill] sm:$0xff] %v3749_v35 }
 0x189   :  { %4940 = vst [vmem:[#allocation39_spill] sm:$0xff] %v3626_v34  ;;  %4944 = vst [vmem:[#allocation42_spill] sm:$0xff] %v3640_v45 }
 0x18a   :  { %4945 = vst [vmem:[#allocation43_spill] sm:$0xff] %v3644_v38 }
 0x194   :  { %v1575_v48 = vpop.permute.xlu0 %1574 }
 0x195   :  { %v1698_v51 = vsel %vm1049_vm7, %v1696_v40, %v1575_v48  ;;  %v3634_v40 = vstv %s3509_s3  ;;  %s3667_s3 = sld [smem:[#allocation3 + $0x25]] }
 0x196   :  { %v1577_v49 = vpop.permute.xlu1 %1576  ;;  %v1700_v53 = vsel %vm1052_vm8, %v1698_v51, 0.0  ;;  %4942 = vst [vmem:[#allocation41_spill] sm:$0xff] %v3634_v40  ;;  %v3660_v51 = vmul.f32 %v3507_v19, %v3398_v2 }
 0x197   :  { %v1699_v52 = vsel %vm1049_vm7, %v1697_v47, %v1577_v49  ;;  %v3656_v49 = vmul.f32 %v3504_v7, %v3398_v2 }
 0x198   :  { %v1701_v50 = vsel %vm1052_vm8, %v1699_v52, 0.0  ;;  %4949 = vst [vmem:[#allocation47_spill] sm:$0xff] %v3660_v51  ;;  %v3670_v52 = vmul.f32 %v1893_v24, %v3398_v2 }
 0x199   :  { %4948 = vst [vmem:[#allocation46_spill] sm:$0xff] %v3656_v49  ;;  %v3744_v49 = vstv %s3619_s29  ;;  %s3867_s29 = sld [smem:[#allocation3 + $0x47]] }
 0x19a   :  { %4951 = vst [vmem:[#allocation49_spill] sm:$0xff] %v3670_v52  ;;  %4965 = vst [vmem:[#allocation62_spill] sm:$0xff] %v3744_v49 }
 0x1a0   :  { %v1679_v55 = vpop.permute.xlu0 %1678 }
 0x1a1   :  { %v1702_v56 = vsel %vm1055_vm9, %v1700_v53, %v1679_v55  ;;  %v3674_v53 = vmul.f32 %v3513_v39, %v3398_v2  ;;  %v3678_v55 = vmul.f32 %v3516_v8, %v3398_v2 }
 0x1a2   :  { %v1704_v32 = vsel %vm1058_vm10, %v1702_v56, 0.0  ;;  %v1681_v29 = vpop.permute.xlu1 %1680 }
 0x1a3   :  { %v3371_v58 = vsel %vm1061_vm11, %v1704_v32, 0.0  ;;  %v1703_v59 = vsel %vm1055_vm9, %v1701_v50, %v1681_v29  ;;  %4952 = vst [vmem:[#allocation50_spill] sm:$0xff] %v3674_v53  ;;  %4953 = vst [vmem:[#allocation51_spill] sm:$0xff] %v3678_v55  ;;  %v3691_v32 = vmul.f32 %v3519_v5, %v3398_v2 }
 0x1a4   :  { %v1705_v60 = vsel %vm1058_vm10, %v1703_v59, 0.0  ;;  %2102 = vrot.lane.b32.xlu0 %v3371_v58, %s2814_s7  ;;  %v3600_v27 = vpop.permute.xlu0 %1712 }
 0x1a5   :  { %v3382_v63 = vsel %vm1061_vm11, %v1705_v60, 0.0  ;;  %v1718_v50 = vmul.f32 %v3634_v40, %v3600_v27  ;;  %4956 = vst [vmem:[#allocation53_spill] sm:$0xff] %v3691_v32  ;;  %v3700_v60 = vstv %s3556_s21  ;;  %v1728_v37 = vmul.f32 %v3665_v54, %v3600_v27  ;;  %s3796_s21 = sld [smem:[#allocation3 + $0x55]] }
 0x1a6   :  { %2104 = vrot.lane.b32.xlu1 %v3382_v63, %s2814_s7  ;;  %4957 = vst [vmem:[#allocation54_spill] sm:$0xff] %v3700_v60  ;;  %v3731_v32 = vstv %s3602_s28  ;;  %v1737_v53 = vmul.f32 %v3700_v60, %v3600_v27  ;;  %v1742_v12 = vmul.f32 %v3728_v15, %v3600_v27  ;;  %v1880_v15 = vmul.f32 0.0, %v3504_v7  ;;  %s3865_s28 = sld [smem:[#allocation3 + $0x5d]] }
 0x1a7   :  { %4964 = vst [vmem:[#allocation61_spill] sm:$0xff] %v3731_v32  ;;  %v3786_v54 = vstv %s3498_s1  ;;  %s3801_s1 = sld [smem:[#allocation3 + $0x5c]]  ;;  %v3874_v40 = vstv %s3741_s12 }
 0x1a8   :  { %2160 = vrot.lane.b32.xlu0 %v3371_v58, %s2815_s8  ;;  %v3695_v36 = vpop.permute.xlu0 %1812  ;;  %4970 = vst [vmem:[#allocation67_spill] sm:$0xff] %v3786_v54  ;;  %s3959_s12 = sld [smem:[#allocation3 + $0x44]] }
 0x1a9   :  { %v1818_v51 = vmul.f32 %v3703_v0, %v3695_v36  ;;  %v1826_v45 = vmul.f32 %v3715_v20, %v3695_v36  ;;  %v1848_v28 = vmul.f32 %v3749_v35, %v3695_v36  ;;  %v3778_v0 = vstv %s3705_s13  ;;  %s3929_s13 = sld [smem:[#allocation3 + $0x58]] }
 0x1aa   :  { %1710 = vrot.lane.b32.xlu1 %v3398_v2, %s2814_s7  ;;  %4969 = vst [vmem:[#allocation66_spill] sm:$0xff] %v3778_v0 }
 0x1ac   :  { %1708 = vrot.lane.b32.xlu0 %v3341_v1, %s2814_s7  ;;  %s3446_s7 = sld [smem:[#allocation3 + $0x4]]  ;;  %v3807_v35 = vpop.permute.xlu0 %1986 }
 0x1ae   :  { %1810 = vrot.lane.b32.xlu1 %v3398_v2, %s4776_s9 }
 0x1b0   :  { %1808 = vrot.lane.b32.xlu0 %v3341_v1, %s4776_s9 }
 0x1b2   :  { %2162 = vrot.lane.b32.xlu1 %v3382_v63, %s2815_s8  ;;  %v3568_v13 = vstv %s3446_s7  ;;  %s4955_s7 = sld [smem:[#allocation25_spill]] }
 0x1b3   :  { %4924 = vst [vmem:[#allocation26_spill] sm:$0xff] %v3568_v13 }
 0x1b4   :  { %1982 = vrot.lane.b32.xlu0 %v3341_v1, %s4774_s11  ;;  %v3662_v1 = vpop.permute.xlu1 %1752 }
 0x1b5   :  { %v1758_v56 = vmul.f32 %v3547_v62, %v3662_v1  ;;  %v1766_v29 = vmul.f32 %v3550_v3, %v3662_v1  ;;  %v1774_v24 = vmul.f32 %v3553_v10, %v3662_v1  ;;  %v1788_v55 = vmul.f32 %v3559_v22, %v3662_v1 }
 0x1b6   :  { %1984 = vrot.lane.b32.xlu1 %v3398_v2, %s4774_s11  ;;  %s3458_s11 = sld [smem:[#allocation3 + $0x20]] }
 0x1b7   :  { %v1761_v52 = vadd.f32 %v1758_v56, %v1718_v50  ;;  %v1777_v33 = vadd.f32 %v1774_v24, %v1728_v37  ;;  %v1834_v56 = vmul.f32 %v3731_v32, %v3695_v36  ;;  %v1872_v50 = vmul.f32 0.0, %v3501_v18 }
 0x1b8   :  { %1750 = vrot.lane.b32.xlu0 %v3398_v2, %s2815_s8  ;;  %s3464_s8 = sld [smem:[#allocation3 + $0x2e]]  ;;  %v3723_v31 = vstv %s4955_s7  ;;  %v3766_v37 = vstv %s3667_s3  ;;  %v1747_v18 = vmul.f32 %v3744_v49, %v3600_v27  ;;  %v1791_v24 = vadd.f32 %v1788_v55, %v1737_v53  ;;  %v3783_v60 = vpop.permute.xlu1 %1926 }
 0x1b9   :  { %4962 = vst [vmem:[#allocation59_spill] sm:$0xff] %v3723_v31  ;;  %4968 = vst [vmem:[#allocation65_spill] sm:$0xff] %v3766_v37  ;;  %v1821_v11 = vadd.f32 %v1818_v51, %v1761_v52  ;;  %v1837_v53 = vadd.f32 %v1834_v56, %v1777_v33  ;;  %v1888_v51 = vmul.f32 0.0, %v3507_v19  ;;  %v1902_v52 = vmul.f32 0.0, %v3513_v39  ;;  %s3901_s3 = sld [smem:[#allocation3 + $0x43]] }
 0x1ba   :  { %2220 = vrot.lane.b32.xlu1 %v3382_v63, %s4776_s9  ;;  %s3470_s9 = sld [smem:[#allocation3 + $0xd]]  ;;  %v1851_v55 = vadd.f32 %v1848_v28, %v1791_v24  ;;  %v1864_v19 = vmul.f32 %v3778_v0, %v3695_v36  ;;  %v1940_v32 = vmul.f32 %v3575_v42, %v3783_v60  ;;  %v1948_v39 = vmul.f32 %v3578_v16, %v3783_v60 }
 0x1bb   :  { %v1875_v56 = vadd.f32 %v1872_v50, %v1821_v11  ;;  %v1910_v28 = vmul.f32 0.0, %v3516_v8  ;;  %v3838_v0 = vstv %s3725_s15  ;;  %s3908_s7 = sld [smem:[#allocation3 + $0x17]] }
 0x1bc   :  { %1924 = vrot.lane.b32.xlu0 %v3398_v2, %s4778_s10  ;;  %4902 = sst [smem:[#allocation16_spill]] %s3458_s11  ;;  %s4915_s11 = smov 127   ;;  %v1905_v8 = vadd.f32 %v1902_v52, %v1851_v55  ;;  %4974 = vst [vmem:[#allocation71_spill] sm:$0xff] %v3838_v0  ;;  %v3855_v55 = vstv %s3792_s19 }
 0x1bd   :  { %4976 = vst [vmem:[#allocation73_spill] sm:$0xff] %v3855_v55  ;;  %s3943_s15 = sld [smem:[#allocation3 + $0x36]] }
 0x1be   :  { %2332 = vrot.lane.b32.xlu1 %v3382_v63, %s4778_s10  ;;  %4904 = sst [smem:[#allocation18_spill]] %s3464_s8  ;;  %s4912_s8 = smov 1  }
 0x1bf   :  { %s3478_s10 = sld [smem:[#allocation3 + $0x22]] }
 0x1c0   :  { %2044 = vrot.lane.b32.xlu0 %v3398_v2, %s4906_s0  ;;  %4907 = sst [smem:[#allocation20_spill]] %s3470_s9 }
 0x1c1   :  { %s3484_s9 = sld [smem:[#allocation3 + $0x30]] }
 0x1c2   :  { %2390 = vrot.lane.b32.xlu1 %v3382_v63, %s4909_s20  ;;  %s4921_s18 = sld [smem:[#allocation18_spill]] }
 0x1c3   :  { %s4923_s22 = sld [smem:[#allocation20_spill]] }
 0x1c4   :  { %2218 = vrot.lane.b32.xlu0 %v3371_v58, %s4912_s8  ;;  %s3494_s8 = sld [smem:[#allocation3 + $0x3f]] }
 0x1c5   :  { %4911 = sst [smem:[#allocation23_spill]] %s3478_s10 }
 0x1c6   :  { %2448 = vrot.lane.b32.xlu1 %v3382_v63, %s4906_s0  ;;  %s3496_s10 = sld [smem:[#allocation3 + $0x46]] }
 0x1c7   :  { %v3710_v2 = vstv %s3484_s9  ;;  %s3735_s9 = sld [smem:[#allocation3 + $0x39]] }
 0x1c8   :  { %2330 = vrot.lane.b32.xlu0 %v3371_v58, %s4915_s11  ;;  %s3523_s11 = sld [smem:[#allocation3 + $0x7]]  ;;  %v3590_v23 = vstv %s4921_s18  ;;  %4959 = vst [vmem:[#allocation56_spill] sm:$0xff] %v3710_v2 }
 0x1c9   :  { %4931 = vst [vmem:[#allocation31_spill] sm:$0xff] %v3590_v23  ;;  %v3598_v26 = vstv %s4923_s22  ;;  %s3781_s18 = sld [smem:[#allocation3 + $0x21]] }
 0x1ca   :  { %4933 = vst [vmem:[#allocation33_spill] sm:$0xff] %v3598_v26  ;;  %v3752_v34 = vstv %s3494_s8  ;;  %s3768_s8 = sld [smem:[#allocation3 + $0x13]] }
 0x1cb   :  { %4967 = vst [vmem:[#allocation64_spill] sm:$0xff] %v3752_v34  ;;  %s3815_s22 = sld [smem:[#allocation3 + $0x2f]] }
 0x1cc   :  { %2388 = vrot.lane.b32.xlu0 %v3371_v58, %s4909_s20  ;;  %s4919_s20 = sld [smem:[#allocation16_spill]] }
 0x1cd   :  { %s3986_s19 = sld [smem:[#allocation3 + $0x37]] }
 0x1ce   :  { %v3652_v48 = vstv %s3523_s11  ;;  %s3685_s11 = sld [smem:[#allocation3 + $0x5b]] }
 0x1cf   :  { %4947 = vst [vmem:[#allocation45_spill] sm:$0xff] %v3652_v48  ;;  %v1723_v59 = vmul.f32 %v3652_v48, %v3600_v27  ;;  %v3789_v48 = vstv %s3649_s6  ;;  %s3897_s6 = sld [smem:[#allocation3 + $0x3c]] }
 0x1d0   :  { %2446 = vrot.lane.b32.xlu0 %v3371_v58, %s4906_s0  ;;  %s4934_s0 = sld [smem:[#allocation23_spill]] }
 0x1d1   :  { %v1769_v38 = vadd.f32 %v1766_v29, %v1723_v59  ;;  %v1796_v29 = vmul.f32 %v3562_v61, %v3662_v1  ;;  %v1804_v59 = vmul.f32 %v3565_v4, %v3662_v1 }
 0x1d2   :  { %v3584_v21 = vstv %s4919_s20  ;;  %s3757_s20 = sld [smem:[#allocation3 + $0xc]] }
 0x1d3   :  { %4928 = vst [vmem:[#allocation29_spill] sm:$0xff] %v3584_v21  ;;  %v1829_v20 = vadd.f32 %v1826_v45, %v1769_v38  ;;  %v1932_v45 = vmul.f32 %v3568_v13, %v3783_v60  ;;  %v1799_v7 = vadd.f32 %v1796_v29, %v1742_v12  ;;  %v1856_v38 = vmul.f32 %v3766_v37, %v3695_v36 }
 0x1d4   :  { %v1807_v33 = vadd.f32 %v1804_v59, %v1747_v18  ;;  %v3810_v12 = vstv %s3685_s11  ;;  %v3813_v37 = vstv %s3717_s14  ;;  %v1891_v59 = vadd.f32 %v1888_v51, %v1837_v53  ;;  %s3921_s11 = sld [smem:[#allocation3 + $0x51]] }
 0x1d5   :  { %v1883_v29 = vadd.f32 %v1880_v15, %v1829_v20  ;;  %4971 = vst [vmem:[#allocation68_spill] sm:$0xff] %v3813_v37  ;;  %v1962_v50 = vmul.f32 %v3584_v21, %v3783_v60  ;;  %v1859_v15 = vadd.f32 %v1856_v38, %v1799_v7  ;;  %v1918_v20 = vmul.f32 0.0, %v3519_v5  ;;  %v3847_v38 = vpop.permute.xlu1 %2046  ;;  %s3933_s14 = sld [smem:[#allocation3 + $0x5f]] }
 0x1d6   :  { %v3647_v47 = vstv %s4934_s0  ;;  %v3829_v18 = vstv %s3768_s8  ;;  %v1867_v24 = vadd.f32 %v1864_v19, %v1807_v33  ;;  %v1935_v53 = vadd.f32 %v1932_v45, %v1875_v56  ;;  %s3857_s0 = sld [smem:[#allocation3 + $0x56]] }
 0x1d7   :  { %4946 = vst [vmem:[#allocation44_spill] sm:$0xff] %v3647_v47  ;;  %4973 = vst [vmem:[#allocation70_spill] sm:$0xff] %v3829_v18  ;;  %v1992_v51 = vmul.f32 %v3813_v37, %v3807_v35  ;;  %v1943_v49 = vadd.f32 %v1940_v32, %v1883_v29  ;;  %v3843_v5 = vstv %s3781_s18  ;;  %v3850_v33 = vstv %s3735_s9  ;;  %s3951_s9 = sld [smem:[#allocation3 + $0x3d]] }
 0x1d8   :  { %v3821_v11 = vstv %s3757_s20  ;;  %4975 = vst [vmem:[#allocation72_spill] sm:$0xff] %v3843_v5  ;;  %v1951_v45 = vadd.f32 %v1948_v39, %v1891_v59  ;;  %v2008_v52 = vmul.f32 %v3829_v18, %v3807_v35  ;;  %v1970_v32 = vmul.f32 %v3587_v14, %v3783_v60  ;;  %s3963_s20 = sld [smem:[#allocation3 + $0x52]] }
 0x1d9   :  { %4972 = vst [vmem:[#allocation69_spill] sm:$0xff] %v3821_v11  ;;  %v2000_v7 = vmul.f32 %v3821_v11, %v3807_v35  ;;  %v1978_v19 = vmul.f32 %v3590_v23, %v3783_v60  ;;  %v2052_v56 = vmul.f32 %v3593_v25, %v3847_v38  ;;  %v1913_v29 = vadd.f32 %v1910_v28, %v1859_v15  ;;  %s3969_s8 = sld [smem:[#allocation3 + $0x59]] }
 0x1da   :  { %v1921_v39 = vadd.f32 %v1918_v20, %v1867_v24  ;;  %v1965_v59 = vadd.f32 %v1962_v50, %v1905_v8  ;;  %v1995_v18 = vadd.f32 %v1992_v51, %v1935_v53  ;;  %v2022_v11 = vmul.f32 %v3843_v5, %v3807_v35  ;;  %s3982_s18 = sld [smem:[#allocation3 + $0x48]] }
 0x1db   :  { %v2060_v37 = vmul.f32 %v3598_v26, %v3847_v38  ;;  %v2003_v23 = vadd.f32 %v2000_v7, %v1943_v49  ;;  %v3879_v25 = vstv %s3815_s22  ;;  %v2068_v28 = vmul.f32 %v3617_v30, %v3847_v38  ;;  %s4015_s22 = sld [smem:[#allocation3 + $0x45]] }
 0x1dc   :  { %4977 = vst [vmem:[#allocation74_spill] sm:$0xff] %v3879_v25  ;;  %v3884_v15 = vstv %s3770_s17  ;;  %v3887_v50 = vstv %s3796_s21  ;;  %v2011_v20 = vadd.f32 %v2008_v52, %v1951_v45  ;;  %v2082_v24 = vmul.f32 %v3647_v47, %v3847_v38  ;;  %s3971_s17 = sld [smem:[#allocation3 + $0x1a]] }
 0x1dd   :  { %4978 = vst [vmem:[#allocation75_spill] sm:$0xff] %v3884_v15  ;;  %v2110_v49 = vmul.f32 %v3720_v41, %v3600_v27  ;;  %v1973_v8 = vadd.f32 %v1970_v32, %v1913_v29  ;;  %v2030_v53 = vmul.f32 %v3855_v55, %v3807_v35  ;;  %v1981_v51 = vadd.f32 %v1978_v19, %v1921_v39  ;;  %s3997_s21 = sld [smem:[#allocation3 + $0x4a]] }
 0x1de   :  { %v2025_v7 = vadd.f32 %v2022_v11, %v1965_v59  ;;  %v2038_v45 = vmul.f32 %v3879_v25, %v3807_v35  ;;  %v2055_v52 = vadd.f32 %v2052_v56, %v1995_v18  ;;  %v2118_v5 = vmul.f32 %v3723_v31, %v3600_v27 }
 0x1df   :  { %v3906_v41 = vstv %s3801_s1  ;;  %v2063_v32 = vadd.f32 %v2060_v37, %v2003_v23  ;;  %v3911_v29 = vstv %s3823_s2  ;;  %v2126_v19 = vmul.f32 %v3752_v34, %v3600_v27  ;;  %s4006_s1 = sld [smem:[#allocation3 + $0x3e]] }
 0x1e0   :  { %4979 = vst [vmem:[#allocation76_spill] sm:$0xff] %v3911_v29  ;;  %v2071_v11 = vadd.f32 %v2068_v28, %v2011_v20  ;;  %v3916_v39 = vstv %s3831_s23  ;;  %v3919_v18 = vstv %s3835_s25  ;;  %v2090_v56 = vmul.f32 %v3683_v57, %v3847_v38  ;;  %s4019_s2 = sld [smem:[#allocation3 + $0x4b]] }
 0x1e1   :  { %4980 = vst [vmem:[#allocation77_spill] sm:$0xff] %v3916_v39  ;;  %4981 = vst [vmem:[#allocation78_spill] sm:$0xff] %v3919_v18  ;;  %v2140_v23 = vmul.f32 %v3786_v54, %v3600_v27  ;;  %v2168_v37 = vmul.f32 %v3838_v0, %v3662_v1  ;;  %v2033_v59 = vadd.f32 %v2030_v53, %v1973_v8  ;;  %v3938_v54 = vstv %s3845_s27  ;;  %s4044_s23 = sld [smem:[#allocation3 + $0x60]] }
 0x1e2   :  { %v2098_v28 = vmul.f32 %v3710_v2, %v3847_v38  ;;  %v2041_v20 = vadd.f32 %v2038_v45, %v1981_v51  ;;  %v2085_v25 = vadd.f32 %v2082_v24, %v2025_v7  ;;  %v2113_v55 = vadd.f32 %v2110_v49, %v2055_v52  ;;  %4982 = vst [vmem:[#allocation79_spill] sm:$0xff] %v3938_v54  ;;  %s4048_s25 = sld [smem:[#allocation3 + $0x53]] }
 0x1e3   :  { %v2176_v34 = vmul.f32 %v3850_v33, %v3662_v1  ;;  %v2121_v31 = vadd.f32 %v2118_v5, %v2063_v32  ;;  %v3941_v57 = vstv %s3857_s0  ;;  %v2184_v8 = vmul.f32 %v3874_v40, %v3662_v1  ;;  %s4055_s27 = sld [smem:[#allocation3 + $0x5a]] }
 0x1e4   :  { %4983 = vst [vmem:[#allocation80_spill] sm:$0xff] %v3941_v57  ;;  %v2129_v0 = vadd.f32 %v2126_v19, %v2071_v11  ;;  %v3949_v51 = vstv %s3865_s28  ;;  %v2148_v24 = vmul.f32 %v3789_v48, %v3600_v27  ;;  %v2156_v5 = vmul.f32 %v3810_v12, %v3600_v27  ;;  %s4072_s0 = sld [smem:[#allocation3 + $0x61]] }
 0x1e5   :  { %4984 = vst [vmem:[#allocation81_spill] sm:$0xff] %v3949_v51  ;;  %v2198_v49 = vmul.f32 %v3884_v15, %v3662_v1  ;;  %v2093_v7 = vadd.f32 %v2090_v56, %v2033_v59  ;;  %v2101_v45 = vadd.f32 %v2098_v28, %v2041_v20  ;;  %v2143_v52 = vadd.f32 %v2140_v23, %v2085_v25  ;;  %s4137_s28 = sld [smem:[#allocation3 + $0x4c]] }
 0x1e6   :  { %v2171_v32 = vadd.f32 %v2168_v37, %v2113_v55  ;;  %v2226_v19 = vmul.f32 %v3911_v29, %v3695_v36  ;;  %v2179_v11 = vadd.f32 %v2176_v34, %v2121_v31  ;;  %v2234_v53 = vmul.f32 %v3916_v39, %v3695_v36 }
 0x1e7   :  { %v2280_v27 = vmul.f32 0.0, %v3526_v6  ;;  %v2288_v15 = vmul.f32 0.0, %v3529_v17  ;;  %v2187_v25 = vadd.f32 %v2184_v8, %v2129_v0  ;;  %v2242_v55 = vmul.f32 %v3919_v18, %v3695_v36 }
 0x1e8   :  { %v2296_v31 = vmul.f32 0.0, %v3532_v46  ;;  %v2310_v34 = vmul.f32 0.0, %v3537_v44  ;;  %v2206_v56 = vmul.f32 %v3887_v50, %v3662_v1  ;;  %v2214_v23 = vmul.f32 %v3906_v41, %v3662_v1 }
 0x1e9   :  { %v2151_v0 = vadd.f32 %v2148_v24, %v2093_v7  ;;  %v2159_v59 = vadd.f32 %v2156_v5, %v2101_v45  ;;  %v2201_v28 = vadd.f32 %v2198_v49, %v2143_v52  ;;  %v2229_v20 = vadd.f32 %v2226_v19, %v2171_v32 }
 0x1ea   :  { %v2256_v8 = vmul.f32 %v3938_v54, %v3695_v36  ;;  %v2237_v18 = vadd.f32 %v2234_v53, %v2179_v11  ;;  %v3989_v39 = vstv %s3889_s5  ;;  %v3992_v29 = vstv %s3897_s6 }
 0x1eb   :  { %4985 = vst [vmem:[#allocation82_spill] sm:$0xff] %v3989_v39  ;;  %4986 = vst [vmem:[#allocation83_spill] sm:$0xff] %v3992_v29  ;;  %v3995_v1 = vstv %s3901_s3  ;;  %v2245_v7 = vadd.f32 %v2242_v55, %v2187_v25  ;;  %v4001_v5 = vstv %s3921_s11  ;;  %v4004_v49 = vstv %s3929_s13 }
 0x1ec   :  { %4987 = vst [vmem:[#allocation84_spill] sm:$0xff] %v3995_v1  ;;  %4988 = vst [vmem:[#allocation85_spill] sm:$0xff] %v4001_v5  ;;  %v2209_v45 = vadd.f32 %v2206_v56, %v2151_v0  ;;  %v2264_v53 = vmul.f32 %v3941_v57, %v3695_v36  ;;  %v2272_v52 = vmul.f32 %v3949_v51, %v3695_v36  ;;  %v4013_v32 = vstv %s3933_s14  ;;  %v5071_v51 = vld [vmem:[#allocation55_spill] sm:$0xff] }
 0x1ed   :  { %4989 = vst [vmem:[#allocation86_spill] sm:$0xff] %v4004_v49  ;;  %4990 = vst [vmem:[#allocation87_spill] sm:$0xff] %v4013_v32  ;;  %v2217_v19 = vadd.f32 %v2214_v23, %v2159_v59  ;;  %v2259_v11 = vadd.f32 %v2256_v8, %v2201_v28  ;;  %v2283_v25 = vadd.f32 %v2280_v27, %v2229_v20  ;;  %v4034_v59 = vstv %s3943_s15 }
 0x1ee   :  { %v2338_v55 = vmul.f32 %v3989_v39, %v3783_v60  ;;  %v2291_v56 = vadd.f32 %v2288_v15, %v2237_v18  ;;  %v2346_v0 = vmul.f32 %v3992_v29, %v3783_v60  ;;  %v4025_v36 = vmul.f32 %v3526_v6, %v3371_v58  ;;  %4993 = vst [vmem:[#allocation90_spill] sm:$0xff] %v4034_v59  ;;  %v5069_v29 = vld [vmem:[#allocation62_spill] sm:$0xff] }
 0x1ef   :  { %v4029_v24 = vmul.f32 %v3529_v17, %v3371_v58  ;;  %v2299_v23 = vadd.f32 %v2296_v31, %v2245_v7  ;;  %v2354_v27 = vmul.f32 %v3995_v1, %v3783_v60  ;;  %v4037_v28 = vstv %s3951_s9 }
 0x1f0   :  { %4991 = vst [vmem:[#allocation88_spill] sm:$0xff] %v4025_v36  ;;  %4994 = vst [vmem:[#allocation91_spill] sm:$0xff] %v4037_v28  ;;  %v2267_v20 = vadd.f32 %v2264_v53, %v2209_v45  ;;  %v4042_v8 = vstv %s3959_s12  ;;  %v2275_v37 = vadd.f32 %v2272_v52, %v2217_v19  ;;  %v2341_v31 = vadd.f32 %v2338_v55, %v2283_v25 }
 0x1f1   :  { %4992 = vst [vmem:[#allocation89_spill] sm:$0xff] %v4029_v24  ;;  %4995 = vst [vmem:[#allocation92_spill] sm:$0xff] %v4042_v8  ;;  %v2313_v24 = vadd.f32 %v2310_v34, %v2259_v11  ;;  %v2368_v7 = vmul.f32 %v4001_v5, %v3783_v60  ;;  %v2349_v36 = vadd.f32 %v2346_v0, %v2291_v56  ;;  %v4064_v25 = vstv %s3986_s19 }
 0x1f2   :  { %v2396_v45 = vmul.f32 %v4034_v59, %v3807_v35  ;;  %v2404_v53 = vmul.f32 %v4037_v28, %v3807_v35  ;;  %v2357_v34 = vadd.f32 %v2354_v27, %v2299_v23  ;;  %v2376_v52 = vmul.f32 %v4004_v49, %v3783_v60  ;;  %4996 = vst [vmem:[#allocation93_spill] sm:$0xff] %v4064_v25  ;;  %v1749_v23 = vpop.permute.xlu1 %1748 }
 0x1f3   :  { %v2384_v19 = vmul.f32 %v4013_v32, %v3783_v60  ;;  %v2412_v11 = vmul.f32 %v4042_v8, %v3807_v35  ;;  %v4067_v55 = vstv %s4006_s1  ;;  %v4070_v56 = vstv %s4015_s22 }
 0x1f4   :  { %4997 = vst [vmem:[#allocation94_spill] sm:$0xff] %v4067_v55  ;;  %4998 = vst [vmem:[#allocation95_spill] sm:$0xff] %v4070_v56  ;;  %v2318_v0 = vmul.f32 0.0, %v3541_v9  ;;  %v2371_v27 = vadd.f32 %v2368_v7, %v2313_v24  ;;  %v4077_v18 = vstv %s3963_s20  ;;  %v4080_v60 = vstv %s3969_s8 }
 0x1f5   :  { %4999 = vst [vmem:[#allocation96_spill] sm:$0xff] %v4077_v18  ;;  %5000 = vst [vmem:[#allocation97_spill] sm:$0xff] %v4080_v60  ;;  %v4084_v8 = vmul.f32 %v3526_v6, %v3382_v63  ;;  %v2399_v28 = vadd.f32 %v2396_v45, %v2341_v31  ;;  %v2407_v59 = vadd.f32 %v2404_v53, %v2349_v36  ;;  %v2326_v32 = vmul.f32 0.0, %v3544_v43 }
 0x1f6   :  { %v2415_v49 = vadd.f32 %v2412_v11, %v2357_v34  ;;  %v2454_v24 = vmul.f32 %v4064_v25, %v3847_v38  ;;  %v2462_v7 = vmul.f32 %v4067_v55, %v3847_v38  ;;  %v2470_v15 = vmul.f32 %v4070_v56, %v3847_v38  ;;  %v1923_v25 = vpop.permute.xlu1 %1922 }
 0x1f7   :  { %5001 = vst [vmem:[#allocation98_spill] sm:$0xff] %v4084_v8  ;;  %v2426_v5 = vmul.f32 %v4077_v18, %v3807_v35  ;;  %v2434_v6 = vmul.f32 %v4080_v60, %v3807_v35  ;;  %v4098_v36 = vstv %s4044_s23  ;;  %v2321_v31 = vadd.f32 %v2318_v0, %v2267_v20  ;;  %v5040_v60 = vld [vmem:[#allocation67_spill] sm:$0xff] }
 0x1f8   :  { %5002 = vst [vmem:[#allocation99_spill] sm:$0xff] %v4098_v36  ;;  %v4102_v45 = vmul.f32 %v3529_v17, %v3382_v63  ;;  %v4106_v53 = vmul.f32 %v3532_v46, %v3382_v63  ;;  %v5005_v34 = vstv %s3416_s24  ;;  %v4114_v56 = vstv %s4048_s25 }
 0x1f9   :  { %v4111_v11 = vmul.f32 %v5005_v34, %v3382_v63  ;;  %5007 = vst [vmem:[#allocation103_spill] sm:$0xff] %v4114_v56  ;;  %v4118_v55 = vmul.f32 %v3537_v44, %v3382_v63  ;;  %v4122_v20 = vmul.f32 %v3541_v9, %v3382_v63  ;;  %v4125_v17 = vstv %s4055_s27 }
 0x1fa   :  { %5003 = vst [vmem:[#allocation100_spill] sm:$0xff] %v4102_v45  ;;  %5004 = vst [vmem:[#allocation101_spill] sm:$0xff] %v4106_v53  ;;  %v2329_v0 = vadd.f32 %v2326_v32, %v2275_v37  ;;  %v4129_v53 = vmul.f32 %v3544_v43, %v3382_v63  ;;  %v4131_v34 = vadd.f32 %v2454_v24, %v2399_v28 }
 0x1fb   :  { %5006 = vst [vmem:[#allocation102_spill] sm:$0xff] %v4111_v11  ;;  %5008 = vst [vmem:[#allocation104_spill] sm:$0xff] %v4118_v55  ;;  %v4133_v11 = vadd.f32 %v2462_v7, %v2407_v59  ;;  %v4135_v45 = vadd.f32 %v2470_v15, %v2415_v49  ;;  %v2484_v55 = vmul.f32 %v4114_v56, %v3847_v38  ;;  %v5017_v59 = vstv %s3416_s24  ;;  %v2043_v7 = vpop.permute.xlu1 %2042  ;;  %v5036_v56 = vld [vmem:[#allocation64_spill] sm:$0xff] }
 0x1fc   :  { %5009 = vst [vmem:[#allocation105_spill] sm:$0xff] %v4122_v20  ;;  %5010 = vst [vmem:[#allocation106_spill] sm:$0xff] %v4125_v17  ;;  %v4142_v20 = vstv %s4072_s0  ;;  %v2379_v8 = vadd.f32 %v2376_v52, %v2321_v31  ;;  %v2429_v37 = vadd.f32 %v2426_v5, %v2371_v27  ;;  %v2492_v32 = vmul.f32 %v4125_v17, %v3847_v38 }
 0x1fd   :  { %5011 = vst [vmem:[#allocation107_spill] sm:$0xff] %v4129_v53  ;;  %5012 = vst [vmem:[#allocation108_spill] sm:$0xff] %v4131_v34  ;;  %v4148_v63 = vmul.f32 %v3532_v46, %v3371_v58  ;;  %v4153_v49 = vmul.f32 %v5017_v59, %v3371_v58  ;;  %v4157_v28 = vmul.f32 %v3537_v44, %v3371_v58  ;;  %v5024_v31 = vstv %s3434_s30 }
 0x1fe   :  { %5013 = vst [vmem:[#allocation109_spill] sm:$0xff] %v4133_v11  ;;  %5014 = vst [vmem:[#allocation110_spill] sm:$0xff] %v4135_v45  ;;  %v4161_v15 = vmul.f32 %v3541_v9, %v3371_v58  ;;  %v4165_v5 = vmul.f32 %v3544_v43, %v3371_v58  ;;  %v2387_v52 = vadd.f32 %v2384_v19, %v2329_v0  ;;  %v5028_v11 = vld [vmem:[#allocation32_spill] sm:$0xff]  ;;  %v5038_v53 = vstv %s3496_s10 }
 0x1ff   :  { %5015 = vst [vmem:[#allocation111_spill] sm:$0xff] %v4142_v20  ;;  %5016 = vst [vmem:[#allocation112_spill] sm:$0xff] %v4148_v63  ;;  %v2442_v46 = vmul.f32 %v4098_v36, %v3807_v35  ;;  %v4174_v44 = vmul.f32 %v4142_v20, %v3847_v38  ;;  %v4177_v9 = vmul.f32 %v3547_v62, %v1749_v23 }
 0x200   :  { %5018 = vst [vmem:[#allocation113_spill] sm:$0xff] %v4153_v49  ;;  %5019 = vst [vmem:[#allocation114_spill] sm:$0xff] %v4157_v28  ;;  %v4180_v58 = vmul.f32 %v3550_v3, %v1749_v23  ;;  %v2437_v43 = vadd.f32 %v2434_v6, %v2379_v8  ;;  %v4182_v19 = vadd.f32 %v2484_v55, %v2429_v37  ;;  %v5031_v49 = vld [vmem:[#allocation52_spill] sm:$0xff] }
 0x201   :  { %5020 = vst [vmem:[#allocation115_spill] sm:$0xff] %v4161_v15  ;;  %5021 = vst [vmem:[#allocation116_spill] sm:$0xff] %v4165_v5  ;;  %v4185_v35 = vmul.f32 %v3553_v10, %v1749_v23  ;;  %v4189_v0 = vmul.f32 %v5024_v31, %v1749_v23  ;;  %v4192_v59 = vmul.f32 %v3559_v22, %v1749_v23  ;;  %v5026_v31 = vstv %s4918_s16 }
 0x202   :  { %5022 = vst [vmem:[#allocation117_spill] sm:$0xff] %v4174_v44  ;;  %5023 = vst [vmem:[#allocation118_spill] sm:$0xff] %v4182_v19  ;;  %v4195_v38 = vmul.f32 %v3562_v61, %v1749_v23  ;;  %v4198_v24 = vmul.f32 %v3565_v4, %v1749_v23  ;;  %v4201_v8 = vmul.f32 %v3568_v13, %v1923_v25  ;;  %v5027_v44 = vld [vmem:[#allocation31_spill] sm:$0xff]  ;;  %v5030_v15 = vstv %s4929_s26  ;;  %v5084_v13 = vld [vmem:[#allocation66_spill] sm:$0xff] }
 0x203   :  { %v4204_v55 = vmul.f32 %v3575_v42, %v1923_v25  ;;  %v4206_v6 = vadd.f32 %v2442_v46, %v2387_v52  ;;  %v4209_v37 = vmul.f32 %v3578_v16, %v1923_v25  ;;  %v4213_v27 = vmul.f32 %v5026_v31, %v1923_v25 }
 0x204   :  { %v4216_v19 = vmul.f32 %v3584_v21, %v1923_v25  ;;  %v4219_v23 = vmul.f32 %v3587_v14, %v1923_v25  ;;  %v4222_v45 = vmul.f32 %v5027_v44, %v1923_v25  ;;  %v4225_v34 = vmul.f32 %v5028_v11, %v2043_v7 }
 0x205   :  { %5025 = vst [vmem:[#allocation119_spill] sm:$0xff] %v4206_v6  ;;  %v4228_v6 = vadd.f32 %v2492_v32, %v2437_v43  ;;  %v4231_v31 = vmul.f32 %v3598_v26, %v2043_v7  ;;  %v4234_v5 = vmul.f32 %v3617_v30, %v2043_v7  ;;  %v4238_v28 = vmul.f32 %v5030_v15, %v2043_v7  ;;  %v5032_v32 = vld [vmem:[#allocation58_spill] sm:$0xff]  ;;  %v5068_v26 = vld [vmem:[#allocation60_spill] sm:$0xff] }
 0x206   :  { %v4241_v25 = vmul.f32 %v3647_v47, %v2043_v7  ;;  %v4244_v63 = vmul.f32 %v5031_v49, %v2043_v7  ;;  %v4247_v46 = vmul.f32 %v3710_v2, %v2043_v7 }
 0x207   :  { %5029 = vst [vmem:[#allocation120_spill] sm:$0xff] %v4228_v6  ;;  %v5034_v6 = vld [vmem:[#allocation59_spill] sm:$0xff] }
 0x216   :  { %v2103_v52 = vpop.permute.xlu0 %2102 }
 0x217   :  { %v4250_v43 = vmul.f32 %v5032_v32, %v2103_v52  ;;  %v4253_v20 = vmul.f32 %v5034_v6, %v2103_v52  ;;  %v4256_v15 = vmul.f32 %v5036_v56, %v2103_v52  ;;  %v4260_v36 = vmul.f32 %v5038_v53, %v2103_v52 }
 0x218   :  { %v2105_v17 = vpop.permute.xlu1 %2104  ;;  %v4263_v18 = vmul.f32 %v5040_v60, %v2103_v52  ;;  %v4266_v7 = vmul.f32 %v3789_v48, %v2103_v52  ;;  %v4269_v2 = vmul.f32 %v3810_v12, %v2103_v52 }
 0x219   :  { %5033 = vst [vmem:[#allocation58_spill] sm:$0xff] %v4250_v43  ;;  %5035 = vst [vmem:[#allocation59_spill] sm:$0xff] %v4253_v20  ;;  %v4272_v43 = vmul.f32 %v5032_v32, %v2105_v17  ;;  %v4275_v20 = vmul.f32 %v5034_v6, %v2105_v17  ;;  %v4288_v52 = vmul.f32 %v3789_v48, %v2105_v17 }
 0x21a   :  { %5037 = vst [vmem:[#allocation64_spill] sm:$0xff] %v4256_v15  ;;  %5039 = vst [vmem:[#allocation121_spill] sm:$0xff] %v4260_v36  ;;  %v4278_v15 = vmul.f32 %v5036_v56, %v2105_v17  ;;  %v2161_v53 = vpop.permute.xlu0 %2160  ;;  %v5047_v36 = vstv %s3496_s10  ;;  %v4291_v32 = vmul.f32 %v3810_v12, %v2105_v17 }
 0x21b   :  { %5041 = vst [vmem:[#allocation67_spill] sm:$0xff] %v4263_v18  ;;  %5042 = vst [vmem:[#allocation122_spill] sm:$0xff] %v4266_v7  ;;  %v4282_v49 = vmul.f32 %v5047_v36, %v2105_v17  ;;  %v4285_v18 = vmul.f32 %v5040_v60, %v2105_v17  ;;  %v4297_v56 = vmul.f32 %v3850_v33, %v2161_v53  ;;  %v5056_v36 = vstv %s3867_s29 }
 0x21c   :  { %5043 = vst [vmem:[#allocation123_spill] sm:$0xff] %v4269_v2  ;;  %5044 = vst [vmem:[#allocation124_spill] sm:$0xff] %v4272_v43  ;;  %v5052_v2 = vld [vmem:[#allocation71_spill] sm:$0xff]  ;;  %v4300_v7 = vmul.f32 %v3874_v40, %v2161_v53  ;;  %v1711_v60 = vpop.permute.xlu1 %1710  ;;  %v4310_v12 = vmul.f32 %v3887_v50, %v2161_v53  ;;  %v4313_v17 = vmul.f32 %v3906_v41, %v2161_v53 }
 0x21d   :  { %5045 = vst [vmem:[#allocation125_spill] sm:$0xff] %v4275_v20  ;;  %5046 = vst [vmem:[#allocation126_spill] sm:$0xff] %v4278_v15  ;;  %v4294_v6 = vmul.f32 %v5052_v2, %v2161_v53  ;;  %v5066_v20 = vld [vmem:[#allocation54_spill] sm:$0xff]  ;;  %v4337_v11 = vmul.f32 %v5068_v26, %v1711_v60  ;;  %v4343_v14 = vmul.f32 %v5069_v29, %v1711_v60 }
 0x21e   :  { %5048 = vst [vmem:[#allocation127_spill] sm:$0xff] %v4282_v49  ;;  %5049 = vst [vmem:[#allocation128_spill] sm:$0xff] %v4285_v18  ;;  %v4304_v49 = vmul.f32 %v5056_v36, %v2161_v53  ;;  %v5058_v18 = vld [vmem:[#allocation75_spill] sm:$0xff]  ;;  %v5065_v36 = vstv %s3876_s4  ;;  %v1709_v43 = vpop.permute.xlu0 %1708 }
 0x21f   :  { %5050 = vst [vmem:[#allocation129_spill] sm:$0xff] %v4288_v52  ;;  %5051 = vst [vmem:[#allocation130_spill] sm:$0xff] %v4291_v32  ;;  %v4307_v48 = vmul.f32 %v5058_v18, %v2161_v53  ;;  %v5067_v47 = vmov %v5065_v36  ;;  %v1735_v1 = vmul.f32 %v5066_v20, %v1709_v43  ;;  %v1745_v39 = vmul.f32 %v5069_v29, %v1709_v43  ;;  %v5073_v29 = vld [vmem:[#allocation57_spill] sm:$0xff] }
 0x220   :  { %5053 = vst [vmem:[#allocation71_spill] sm:$0xff] %v4294_v6  ;;  %5054 = vst [vmem:[#allocation131_spill] sm:$0xff] %v4297_v56  ;;  %v5062_v6 = vld [vmem:[#allocation41_spill] sm:$0xff]  ;;  %v1731_v30 = vmul.f32 %v5067_v47, %v1709_v43  ;;  %v1811_v44 = vpop.permute.xlu1 %1810 }
 0x221   :  { %5055 = vst [vmem:[#allocation132_spill] sm:$0xff] %v4300_v7  ;;  %5057 = vst [vmem:[#allocation133_spill] sm:$0xff] %v4304_v49  ;;  %v4316_v32 = vmul.f32 %v5062_v6, %v1711_v60  ;;  %v5063_v56 = vld [vmem:[#allocation45_spill] sm:$0xff]  ;;  %v5064_v7 = vld [vmem:[#allocation48_spill] sm:$0xff]  ;;  %v4326_v49 = vmul.f32 %v5065_v36, %v1711_v60  ;;  %v1740_v36 = vmul.f32 %v5068_v26, %v1709_v43 }
 0x222   :  { %5059 = vst [vmem:[#allocation75_spill] sm:$0xff] %v4307_v48  ;;  %5060 = vst [vmem:[#allocation134_spill] sm:$0xff] %v4310_v12  ;;  %v4319_v52 = vmul.f32 %v5063_v56, %v1711_v60  ;;  %v4322_v15 = vmul.f32 %v5064_v7, %v1711_v60  ;;  %v4329_v48 = vmul.f32 %v5066_v20, %v1711_v60 }
 0x223   :  { %5061 = vst [vmem:[#allocation135_spill] sm:$0xff] %v4313_v17  ;;  %v1716_v12 = vmul.f32 %v5062_v6, %v1709_v43  ;;  %v1721_v53 = vmul.f32 %v5063_v56, %v1709_v43  ;;  %v1726_v17 = vmul.f32 %v5064_v7, %v1709_v43  ;;  %5070 = vst [vmem:[#allocation41_spill] sm:$0xff] %v4343_v14  ;;  %v1809_v43 = vpop.permute.xlu0 %1808  ;;  %v5088_v14 = vld [vmem:[#allocation36_spill] sm:$0xff] }
 0x224   :  { %v1782_v56 = vadd.f32 %v4189_v0, %v1731_v30  ;;  %v1789_v20 = vadd.f32 %v4192_v59, %v1735_v1  ;;  %v1797_v21 = vadd.f32 %v4195_v38, %v1740_v36  ;;  %v1805_v26 = vadd.f32 %v4198_v24, %v1745_v39  ;;  %v5079_v30 = vld [vmem:[#allocation63_spill] sm:$0xff]  ;;  %v5081_v1 = vld [vmem:[#allocation65_spill] sm:$0xff] }
 0x225   :  { %v1759_v6 = vadd.f32 %v4177_v9, %v1716_v12  ;;  %v1767_v7 = vadd.f32 %v4180_v58, %v1721_v53  ;;  %v1775_v47 = vadd.f32 %v4185_v35, %v1726_v17  ;;  %v4353_v16 = vmul.f32 %v5071_v51, %v1811_v44  ;;  %v5075_v9 = vld [vmem:[#allocation61_spill] sm:$0xff] }
 0x226   :  { %v4356_v60 = vmul.f32 %v5073_v29, %v1811_v44  ;;  %v4359_v58 = vmul.f32 %v5075_v9, %v1811_v44  ;;  %v5077_v12 = vstv %s3908_s7  ;;  %v4366_v0 = vmul.f32 %v5079_v30, %v1811_v44 }
 0x227   :  { %5072 = vst [vmem:[#allocation45_spill] sm:$0xff] %v4353_v16  ;;  %v4363_v35 = vmul.f32 %v5077_v12, %v1811_v44  ;;  %v4369_v59 = vmul.f32 %v5081_v1, %v1811_v44  ;;  %v1816_v39 = vmul.f32 %v5071_v51, %v1809_v43  ;;  %v1824_v24 = vmul.f32 %v5073_v29, %v1809_v43  ;;  %v5087_v16 = vld [vmem:[#allocation35_spill] sm:$0xff] }
 0x228   :  { %5074 = vst [vmem:[#allocation48_spill] sm:$0xff] %v4356_v60  ;;  %5076 = vst [vmem:[#allocation54_spill] sm:$0xff] %v4359_v58  ;;  %v1832_v38 = vmul.f32 %v5075_v9, %v1809_v43  ;;  %v5083_v17 = vmov %v5077_v12  ;;  %v1846_v36 = vmul.f32 %v5079_v30, %v1809_v43  ;;  %v1854_v42 = vmul.f32 %v5081_v1, %v1809_v43  ;;  %v2163_v12 = vpop.permute.xlu1 %2162  ;;  %v5086_v60 = vld [vmem:[#allocation34_spill] sm:$0xff] }
 0x229   :  { %5078 = vst [vmem:[#allocation60_spill] sm:$0xff] %v4363_v35  ;;  %5080 = vst [vmem:[#allocation62_spill] sm:$0xff] %v4366_v0  ;;  %v1840_v53 = vmul.f32 %v5083_v17, %v1809_v43  ;;  %v4379_v57 = vmul.f32 %v5084_v13, %v1811_v44  ;;  %v1819_v54 = vadd.f32 %v1816_v39, %v1759_v6 }
 0x22a   :  { %5082 = vst [vmem:[#allocation55_spill] sm:$0xff] %v4369_v59  ;;  %v1827_v0 = vadd.f32 %v1824_v24, %v1767_v7  ;;  %v1862_v59 = vmul.f32 %v5084_v13, %v1809_v43  ;;  %v1835_v51 = vadd.f32 %v1832_v38, %v1775_v47  ;;  %v1849_v29 = vadd.f32 %v1846_v36, %v1789_v20  ;;  %v5090_v7 = vld [vmem:[#allocation39_spill] sm:$0xff]  ;;  %v5091_v13 = vld [vmem:[#allocation40_spill] sm:$0xff]  ;;  %v5092_v47 = vld [vmem:[#allocation42_spill] sm:$0xff] }
 0x22b   :  { %5085 = vst [vmem:[#allocation57_spill] sm:$0xff] %v4379_v57  ;;  %v1842_v35 = vadd.f32 %v1840_v53, %v1782_v56  ;;  %v1857_v58 = vadd.f32 %v1854_v42, %v1797_v21  ;;  %v1873_v17 = vadd.f32 %v5086_v60, %v1819_v54  ;;  %v4385_v1 = vmul.f32 %v5052_v2, %v2163_v12  ;;  %v5089_v57 = vld [vmem:[#allocation38_spill] sm:$0xff]  ;;  %v1983_v2 = vpop.permute.xlu0 %1982  ;;  %v5098_v36 = vld [vmem:[#allocation72_spill] sm:$0xff] }
 0x22c   :  { %v1865_v9 = vadd.f32 %v1862_v59, %v1805_v26  ;;  %v1881_v30 = vadd.f32 %v5087_v16, %v1827_v0  ;;  %v1889_v44 = vadd.f32 %v5088_v14, %v1835_v51  ;;  %v1903_v39 = vadd.f32 %v5090_v7, %v1849_v29  ;;  %v5094_v0 = vld [vmem:[#allocation68_spill] sm:$0xff]  ;;  %v5095_v59 = vld [vmem:[#allocation69_spill] sm:$0xff]  ;;  %v5100_v29 = vld [vmem:[#allocation74_spill] sm:$0xff] }
 0x22d   :  { %v1896_v6 = vadd.f32 %v5089_v57, %v1842_v35  ;;  %v1911_v43 = vadd.f32 %v5091_v13, %v1857_v58  ;;  %v4393_v42 = vmul.f32 %v3850_v33, %v2163_v12  ;;  %v4396_v21 = vmul.f32 %v3874_v40, %v2163_v12  ;;  %v5099_v51 = vld [vmem:[#allocation73_spill] sm:$0xff] }
 0x22e   :  { %v1919_v56 = vadd.f32 %v5092_v47, %v1865_v9  ;;  %v5093_v16 = vstv %s3867_s29  ;;  %v4403_v14 = vmul.f32 %v5058_v18, %v2163_v12  ;;  %v4406_v57 = vmul.f32 %v3887_v50, %v2163_v12  ;;  %v5096_v50 = vld [vmem:[#allocation70_spill] sm:$0xff]  ;;  %v1985_v9 = vpop.permute.xlu1 %1984 }
 0x22f   :  { %v4400_v54 = vmul.f32 %v5093_v16, %v2163_v12  ;;  %v1933_v20 = vadd.f32 %v4201_v8, %v1873_v17  ;;  %v1941_v26 = vadd.f32 %v4204_v55, %v1881_v30  ;;  %v1949_v33 = vadd.f32 %v4209_v37, %v1889_v44 }
 0x230   :  { %v1956_v60 = vadd.f32 %v4213_v27, %v1896_v6  ;;  %v1963_v40 = vadd.f32 %v4216_v19, %v1903_v39  ;;  %v1971_v58 = vadd.f32 %v4219_v23, %v1911_v43  ;;  %v1979_v35 = vadd.f32 %v4222_v45, %v1919_v56 }
 0x231   :  { %v1990_v18 = vmul.f32 %v5094_v0, %v1983_v2  ;;  %v1998_v24 = vmul.f32 %v5095_v59, %v1983_v2  ;;  %v2006_v38 = vmul.f32 %v5096_v50, %v1983_v2  ;;  %v5097_v53 = vstv %s3971_s17 }
 0x232   :  { %v2014_v8 = vmul.f32 %v5097_v53, %v1983_v2  ;;  %v2020_v55 = vmul.f32 %v5098_v36, %v1983_v2  ;;  %v2028_v37 = vmul.f32 %v5099_v51, %v1983_v2  ;;  %v2036_v27 = vmul.f32 %v5100_v29, %v1983_v2 }
 0x233   :  { %v4424_v19 = vmul.f32 %v3906_v41, %v2163_v12  ;;  %v1993_v23 = vadd.f32 %v1990_v18, %v1933_v20  ;;  %v2001_v45 = vadd.f32 %v1998_v24, %v1941_v26  ;;  %v2009_v17 = vadd.f32 %v2006_v38, %v1949_v33  ;;  %v1751_v12 = vpop.permute.xlu0 %1750  ;;  %v5104_v38 = vld [vmem:[#allocation45_spill] sm:$0xff] }
 0x234   :  { %v2016_v30 = vadd.f32 %v2014_v8, %v1956_v60  ;;  %v2023_v44 = vadd.f32 %v2020_v55, %v1963_v40  ;;  %v2031_v6 = vadd.f32 %v2028_v37, %v1971_v58  ;;  %v2039_v7 = vadd.f32 %v2036_v27, %v1979_v35 }
 0x235   :  { %v4427_v39 = vadd.f32 %v4225_v34, %v1993_v23  ;;  %v4430_v13 = vadd.f32 %v4231_v31, %v2001_v45  ;;  %v4433_v43 = vadd.f32 %v4234_v5, %v2009_v17  ;;  %v4436_v41 = vmul.f32 %v5094_v0, %v1985_v9  ;;  %v2221_v0 = vpop.permute.xlu1 %2220  ;;  %v5113_v45 = vld [vmem:[#allocation78_spill] sm:$0xff] }
 0x236   :  { %v4439_v47 = vadd.f32 %v4238_v28, %v2016_v30  ;;  %v4442_v56 = vadd.f32 %v4241_v25, %v2023_v44  ;;  %v4445_v34 = vadd.f32 %v4244_v63, %v2031_v6  ;;  %v4448_v31 = vmul.f32 %v5095_v59, %v1985_v9  ;;  %v5115_v6 = vld [vmem:[#allocation79_spill] sm:$0xff] }
 0x237   :  { %v4451_v16 = vadd.f32 %v4247_v46, %v2039_v7  ;;  %v4454_v5 = vmul.f32 %v5096_v50, %v1985_v9  ;;  %v5101_v2 = vmov %v5097_v53  ;;  %v4461_v28 = vmul.f32 %v5098_v36, %v1985_v9  ;;  %v5103_v50 = vld [vmem:[#allocation41_spill] sm:$0xff]  ;;  %v5105_v53 = vld [vmem:[#allocation48_spill] sm:$0xff]  ;;  %v5106_v36 = vld [vmem:[#allocation54_spill] sm:$0xff] }
 0x238   :  { %v4458_v20 = vmul.f32 %v5101_v2, %v1985_v9  ;;  %v4464_v25 = vmul.f32 %v5099_v51, %v1985_v9  ;;  %v1757_v63 = vmul.f32 %v3547_v62, %v1751_v12  ;;  %v1765_v26 = vmul.f32 %v3550_v3, %v1751_v12  ;;  %v5116_v2 = vld [vmem:[#allocation80_spill] sm:$0xff] }
 0x239   :  { %v1773_v33 = vmul.f32 %v3553_v10, %v1751_v12  ;;  %v5102_v46 = vstv %s3434_s30  ;;  %v1787_v40 = vmul.f32 %v3559_v22, %v1751_v12  ;;  %v1795_v58 = vmul.f32 %v3562_v61, %v1751_v12  ;;  %s5224_s30 = sld [smem:[#allocation136_spill]] }
 0x23a   :  { %v1781_v60 = vmul.f32 %v5102_v46, %v1751_v12  ;;  %v1803_v35 = vmul.f32 %v3565_v4, %v1751_v12  ;;  %v2037_v18 = vmul.f32 %v5100_v29, %v1985_v9  ;;  %v1760_v59 = vadd.f32 %v1757_v63, %v4316_v32  ;;  %v5107_v32 = vld [vmem:[#allocation76_spill] sm:$0xff]  ;;  %v1925_v12 = vpop.permute.xlu0 %1924  ;;  %v5119_v46 = vld [vmem:[#allocation46_spill] sm:$0xff] }
 0x23b   :  { %v1768_v24 = vadd.f32 %v1765_v26, %v4319_v52  ;;  %v1776_v62 = vadd.f32 %v1773_v33, %v4322_v15  ;;  %v1790_v10 = vadd.f32 %v1787_v40, %v4329_v48  ;;  %v1798_v22 = vadd.f32 %v1795_v58, %v4337_v11  ;;  %v5108_v52 = vld [vmem:[#allocation60_spill] sm:$0xff]  ;;  %v5109_v15 = vld [vmem:[#allocation62_spill] sm:$0xff]  ;;  %v5111_v48 = vld [vmem:[#allocation57_spill] sm:$0xff] }
 0x23c   :  { %v1783_v3 = vadd.f32 %v1781_v60, %v4326_v49  ;;  %v1806_v61 = vadd.f32 %v1803_v35, %v5103_v50  ;;  %v1820_v4 = vadd.f32 %v5104_v38, %v1760_v59  ;;  %v4486_v51 = vmul.f32 %v5107_v32, %v2221_v0  ;;  %v5110_v49 = vld [vmem:[#allocation55_spill] sm:$0xff]  ;;  %v5112_v11 = vld [vmem:[#allocation77_spill] sm:$0xff] }
 0x23d   :  { %v1828_v8 = vadd.f32 %v5105_v53, %v1768_v24  ;;  %v1836_v55 = vadd.f32 %v5106_v36, %v1776_v62  ;;  %v1850_v29 = vadd.f32 %v5109_v15, %v1790_v10  ;;  %v1858_v27 = vadd.f32 %v5110_v49, %v1798_v22  ;;  %v5118_v26 = vld [vmem:[#allocation43_spill] sm:$0xff]  ;;  %v5121_v35 = vld [vmem:[#allocation49_spill] sm:$0xff]  ;;  %v5122_v24 = vld [vmem:[#allocation50_spill] sm:$0xff] }
 0x23e   :  { %v1843_v37 = vadd.f32 %v5108_v52, %v1783_v3  ;;  %v1866_v9 = vadd.f32 %v5111_v48, %v1806_v61  ;;  %v4493_v23 = vmul.f32 %v5112_v11, %v2221_v0  ;;  %v4496_v17 = vmul.f32 %v5113_v45, %v2221_v0  ;;  %v5120_v40 = vld [vmem:[#allocation47_spill] sm:$0xff]  ;;  %v5124_v22 = vld [vmem:[#allocation53_spill] sm:$0xff]  ;;  %v5125_v61 = vld [vmem:[#allocation26_spill] sm:$0xff] }
 0x23f   :  { %v5114_v30 = vstv %s3982_s18  ;;  %v4503_v7 = vmul.f32 %v5115_v6, %v2221_v0  ;;  %v4506_v63 = vmul.f32 %v5116_v2, %v2221_v0  ;;  %v1874_v33 = vadd.f32 %v5118_v26, %v1820_v4  ;;  %v5123_v3 = vld [vmem:[#allocation51_spill] sm:$0xff]  ;;  %v5127_v52 = vld [vmem:[#allocation28_spill] sm:$0xff]  ;;  %v5129_v48 = vld [vmem:[#allocation81_spill] sm:$0xff] }
 0x240   :  { %v4500_v44 = vmul.f32 %v5114_v30, %v2221_v0  ;;  %v1882_v60 = vadd.f32 %v5119_v46, %v1828_v8  ;;  %v1890_v58 = vadd.f32 %v5120_v40, %v1836_v55  ;;  %v1897_v59 = vadd.f32 %v5121_v35, %v1843_v37  ;;  %v5126_v53 = vld [vmem:[#allocation27_spill] sm:$0xff]  ;;  %v2333_v8 = vpop.permute.xlu1 %2332  ;;  %v5131_v37 = vld [vmem:[#allocation29_spill] sm:$0xff] }
 0x241   :  { %5117 = vst [vmem:[#allocation61_spill] sm:$0xff] %v4506_v63  ;;  %v1904_v62 = vadd.f32 %v5122_v24, %v1850_v29  ;;  %v1912_v10 = vadd.f32 %v5123_v3, %v1858_v27  ;;  %v1920_v50 = vadd.f32 %v5124_v22, %v1866_v9  ;;  %v1931_v38 = vmul.f32 %v5125_v61, %v1925_v12  ;;  %v5132_v29 = vld [vmem:[#allocation30_spill] sm:$0xff]  ;;  %v5133_v27 = vld [vmem:[#allocation31_spill] sm:$0xff] }
 0x242   :  { %v1939_v36 = vmul.f32 %v5126_v53, %v1925_v12  ;;  %v1947_v15 = vmul.f32 %v5127_v52, %v1925_v12  ;;  %v5128_v49 = vstv %s4918_s16  ;;  %v4521_v55 = vmul.f32 %v5129_v48, %v2221_v0  ;;  %v5134_v53 = vld [vmem:[#allocation82_spill] sm:$0xff]  ;;  %v5136_v0 = vld [vmem:[#allocation84_spill] sm:$0xff]  ;;  %s2820_s16 = smov [#allocation8]  }
 0x243   :  { %v1955_v4 = vmul.f32 %v5128_v49, %v1925_v12  ;;  %v1961_v30 = vmul.f32 %v5131_v37, %v1925_v12  ;;  %v1969_v26 = vmul.f32 %v5132_v29, %v1925_v12  ;;  %v1977_v46 = vmul.f32 %v5133_v27, %v1925_v12  ;;  %v5135_v49 = vld [vmem:[#allocation83_spill] sm:$0xff]  ;;  %v5138_v12 = vld [vmem:[#allocation85_spill] sm:$0xff] }
 0x244   :  { %5130 = vst [vmem:[#allocation63_spill] sm:$0xff] %v4521_v55  ;;  %v1934_v9 = vadd.f32 %v1931_v38, %v1874_v33  ;;  %v1942_v40 = vadd.f32 %v1939_v36, %v1882_v60  ;;  %v1950_v35 = vadd.f32 %v1947_v15, %v1890_v58  ;;  %v4527_v52 = vmul.f32 %v5134_v53, %v2333_v8  ;;  %v2045_v60 = vpop.permute.xlu0 %2044  ;;  %v5139_v58 = vld [vmem:[#allocation86_spill] sm:$0xff]  ;;  %v5142_v27 = vld [vmem:[#allocation33_spill] sm:$0xff] }
 0x245   :  { %v1957_v24 = vadd.f32 %v1955_v4, %v1897_v59  ;;  %v1964_v3 = vadd.f32 %v1961_v30, %v1904_v62  ;;  %v1972_v22 = vadd.f32 %v1969_v26, %v1912_v10  ;;  %v1980_v61 = vadd.f32 %v1977_v46, %v1920_v50  ;;  %v5141_v30 = vld [vmem:[#allocation32_spill] sm:$0xff] }
 0x246   :  { %v4530_v63 = vmul.f32 %v5135_v49, %v2333_v8  ;;  %v4533_v37 = vmul.f32 %v5136_v0, %v2333_v8  ;;  %v5137_v29 = vstv %s3997_s21  ;;  %v4540_v33 = vmul.f32 %v5138_v12, %v2333_v8 }
 0x247   :  { %v4537_v55 = vmul.f32 %v5137_v29, %v2333_v8  ;;  %v4543_v59 = vmul.f32 %v5139_v58, %v2333_v8  ;;  %v1994_v62 = vadd.f32 %v4436_v41, %v1934_v9  ;;  %v2002_v10 = vadd.f32 %v4448_v31, %v1942_v40  ;;  %v5143_v29 = vld [vmem:[#allocation37_spill] sm:$0xff]  ;;  %v2391_v41 = vpop.permute.xlu1 %2390  ;;  %v5145_v9 = vld [vmem:[#allocation87_spill] sm:$0xff] }
 0x248   :  { %v2010_v50 = vadd.f32 %v4454_v5, %v1950_v35  ;;  %v2017_v38 = vadd.f32 %v4458_v20, %v1957_v24  ;;  %v2024_v36 = vadd.f32 %v4461_v28, %v1964_v3  ;;  %v2032_v15 = vadd.f32 %v4464_v25, %v1972_v22  ;;  %v5147_v5 = vld [vmem:[#allocation44_spill] sm:$0xff] }
 0x249   :  { %5140 = vst [vmem:[#allocation65_spill] sm:$0xff] %v4543_v59  ;;  %v2040_v4 = vadd.f32 %v2037_v18, %v1980_v61  ;;  %v2051_v26 = vmul.f32 %v5141_v30, %v2045_v60  ;;  %v2059_v46 = vmul.f32 %v5142_v27, %v2045_v60  ;;  %v2067_v58 = vmul.f32 %v5143_v29, %v2045_v60  ;;  %v5148_v20 = vld [vmem:[#allocation52_spill] sm:$0xff]  ;;  %v5150_v29 = vld [vmem:[#allocation90_spill] sm:$0xff] }
 0x24a   :  { %v5144_v12 = vstv %s4929_s26  ;;  %v4557_v31 = vmul.f32 %v5145_v9, %v2333_v8  ;;  %v2081_v40 = vmul.f32 %v5147_v5, %v2045_v60  ;;  %v2089_v35 = vmul.f32 %v5148_v20, %v2045_v60  ;;  %v5149_v28 = vld [vmem:[#allocation56_spill] sm:$0xff]  ;;  %v5152_v8 = vld [vmem:[#allocation125_spill] sm:$0xff]  ;;  %v5154_v20 = vld [vmem:[#allocation127_spill] sm:$0xff]  ;;  %s2595_s26 = sshll.u32 %s2820_s16, 4  ;;  %s2596_s26 = int_to_ptr.vmem [resolvable:$true] %s2595_s26 }
 0x24b   :  { %v2075_v0 = vmul.f32 %v5144_v12, %v2045_v60  ;;  %v2097_v24 = vmul.f32 %v5149_v28, %v2045_v60  ;;  %v2054_v25 = vadd.f32 %v2051_v26, %v1994_v62  ;;  %v2062_v18 = vadd.f32 %v2059_v46, %v2002_v10  ;;  %v5151_v12 = vld [vmem:[#allocation124_spill] sm:$0xff]  ;;  %v5156_v10 = vld [vmem:[#allocation129_spill] sm:$0xff]  ;;  %s2770_s29 = scalar_lea.vmem %s2596_s26, 256  ;;  %p2775_p11 = scmp.lt.s32.totalorder %s2596_s26, %s2596_s26 }
 0x24c   :  { %5146 = vst [vmem:[#allocation66_spill] sm:$0xff] %v4557_v31  ;;  %v2070_v3 = vadd.f32 %v2067_v58, %v2010_v50  ;;  %v2084_v61 = vadd.f32 %v2081_v40, %v2024_v36  ;;  %v2092_v30 = vadd.f32 %v2089_v35, %v2032_v15  ;;  %v4563_v49 = vmul.f32 %v5150_v29, %v2391_v41  ;;  %v5153_v31 = vld [vmem:[#allocation126_spill] sm:$0xff]  ;;  %v5155_v60 = vld [vmem:[#allocation128_spill] sm:$0xff]  ;;  %p2771_p10 = scmp.ne.s32.totalorder %s2596_s26, %s2770_s29  ;;  %p2776_p12 = scmp.lt.s32.totalorder %s2770_s29, %s2770_s29 }
 0x24d   :  { %v2077_v22 = vadd.f32 %v2075_v0, %v2017_v38  ;;  %v2100_v27 = vadd.f32 %v2097_v24, %v2040_v4  ;;  %v2112_v53 = vadd.f32 %v5151_v12, %v2054_v25  ;;  %v2120_v9 = vadd.f32 %v5152_v8, %v2062_v18  ;;  %v5157_v0 = vld [vmem:[#allocation130_spill] sm:$0xff]  ;;  %v5158_v38 = vld [vmem:[#allocation91_spill] sm:$0xff]  ;;  %v5159_v46 = vld [vmem:[#allocation92_spill] sm:$0xff]  ;;  %v2219_v25 = vpop.permute.xlu0 %2218 }
 0x24e   :  { %v2128_v5 = vadd.f32 %v5153_v31, %v2070_v3  ;;  %v2142_v62 = vadd.f32 %v5155_v60, %v2084_v61  ;;  %v2150_v58 = vadd.f32 %v5156_v10, %v2092_v30  ;;  %v4573_v36 = vmul.f32 %v5158_v38, %v2391_v41  ;;  %v5164_v61 = vld [vmem:[#allocation59_spill] sm:$0xff]  ;;  %p2777_p13 = por %p2776_p12, %p2775_p11 }
 0x24f   :  { %v2135_v59 = vadd.f32 %v5154_v20, %v2077_v22  ;;  %v2158_v50 = vadd.f32 %v5157_v0, %v2100_v27  ;;  %v2170_v15 = vadd.f32 %v4385_v1, %v2112_v53  ;;  %v2178_v4 = vadd.f32 %v4393_v42, %v2120_v9  ;;  %v5161_v22 = vld [vmem:[#allocation96_spill] sm:$0xff]  ;;  %v5162_v53 = vld [vmem:[#allocation97_spill] sm:$0xff]  ;;  %v5168_v12 = vld [vmem:[#allocation99_spill] sm:$0xff] }
 0x250   :  { %v2186_v26 = vadd.f32 %v4396_v21, %v2128_v5  ;;  %v4579_v40 = vmul.f32 %v5159_v46, %v2391_v41  ;;  %v2200_v35 = vadd.f32 %v4403_v14, %v2142_v62  ;;  %v2208_v28 = vadd.f32 %v4406_v57, %v2150_v58  ;;  %v5163_v21 = vld [vmem:[#allocation58_spill] sm:$0xff]  ;;  %v5166_v57 = vld [vmem:[#allocation121_spill] sm:$0xff]  ;;  %v5171_v62 = vld [vmem:[#allocation71_spill] sm:$0xff]  ;;  %p2778_p0 = pnand %p2777_p13, %p2771_p10 }
 0x251   :  { %v2193_v31 = vadd.f32 %v4400_v54, %v2135_v59  ;;  %v2216_v24 = vadd.f32 %v4424_v19, %v2158_v50  ;;  %v5160_v18 = vstv %s4019_s2  ;;  %v2425_v1 = vmul.f32 %v5161_v22, %v2391_v41  ;;  %v5165_v54 = vld [vmem:[#allocation64_spill] sm:$0xff]  ;;  %v5167_v59 = vld [vmem:[#allocation67_spill] sm:$0xff]  ;;  %v5169_v5 = vld [vmem:[#allocation122_spill] sm:$0xff] }
 0x252   :  { %v2419_v3 = vmul.f32 %v5160_v18, %v2391_v41  ;;  %v2433_v42 = vmul.f32 %v5162_v53, %v2391_v41  ;;  %v2111_v9 = vadd.f32 %v5163_v21, %v4427_v39  ;;  %v2119_v30 = vadd.f32 %v5164_v61, %v4430_v13  ;;  %v5170_v39 = vld [vmem:[#allocation123_spill] sm:$0xff]  ;;  %v5173_v0 = vld [vmem:[#allocation132_spill] sm:$0xff]  ;;  %v5176_v61 = vld [vmem:[#allocation134_spill] sm:$0xff] }
 0x253   :  { %v2127_v14 = vadd.f32 %v5165_v54, %v4433_v43  ;;  %v2134_v19 = vadd.f32 %v5166_v57, %v4439_v47  ;;  %v2141_v27 = vadd.f32 %v5167_v59, %v4442_v56  ;;  %v2441_v8 = vmul.f32 %v5168_v12, %v2391_v41  ;;  %v5172_v43 = vld [vmem:[#allocation131_spill] sm:$0xff]  ;;  %v5174_v47 = vld [vmem:[#allocation133_spill] sm:$0xff] }
 0x254   :  { %v2149_v20 = vadd.f32 %v5169_v5, %v4445_v34  ;;  %v2157_v60 = vadd.f32 %v5170_v39, %v4451_v16  ;;  %v2224_v13 = vmul.f32 %v5107_v32, %v2219_v25  ;;  %v2169_v10 = vadd.f32 %v5171_v62, %v2111_v9  ;;  %v5175_v21 = vld [vmem:[#allocation75_spill] sm:$0xff] }
 0x255   :  { %v2177_v58 = vadd.f32 %v5172_v43, %v2119_v30  ;;  %v2185_v50 = vadd.f32 %v5173_v0, %v2127_v14  ;;  %v2192_v18 = vadd.f32 %v5174_v47, %v2134_v19  ;;  %v2199_v56 = vadd.f32 %v5175_v21, %v2141_v27  ;;  %v5177_v54 = vld [vmem:[#allocation135_spill] sm:$0xff] }
 0x256   :  { %v2207_v41 = vadd.f32 %v5176_v61, %v2149_v20  ;;  %v2215_v57 = vadd.f32 %v5177_v54, %v2157_v60  ;;  %v2232_v34 = vmul.f32 %v5112_v11, %v2219_v25  ;;  %v2240_v16 = vmul.f32 %v5113_v45, %v2219_v25  ;;  %v2449_v11 = vpop.permute.xlu1 %2448 }
 0x257   :  { %v5178_v59 = vstv %s3982_s18  ;;  %v2254_v9 = vmul.f32 %v5115_v6, %v2219_v25  ;;  %v2262_v30 = vmul.f32 %v5116_v2, %v2219_v25  ;;  %v2227_v5 = vadd.f32 %v2224_v13, %v2169_v10  ;;  %v5179_v2 = vld [vmem:[#allocation61_spill] sm:$0xff]  ;;  %v5180_v10 = vld [vmem:[#allocation63_spill] sm:$0xff] }
 0x258   :  { %v2248_v32 = vmul.f32 %v5178_v59, %v2219_v25  ;;  %v2235_v14 = vadd.f32 %v2232_v34, %v2177_v58  ;;  %v2228_v19 = vadd.f32 %v4486_v51, %v2170_v15  ;;  %v2236_v27 = vadd.f32 %v4493_v23, %v2178_v4  ;;  %v5181_v51 = vld [vmem:[#allocation98_spill] sm:$0xff]  ;;  %v5182_v23 = vld [vmem:[#allocation100_spill] sm:$0xff]  ;;  %v5190_v59 = vld [vmem:[#allocation65_spill] sm:$0xff] }
 0x259   :  { %v2243_v39 = vadd.f32 %v2240_v16, %v2185_v50  ;;  %v2257_v62 = vadd.f32 %v2254_v9, %v2199_v56  ;;  %v2270_v60 = vmul.f32 %v5129_v48, %v2219_v25  ;;  %v2265_v43 = vadd.f32 %v2262_v30, %v2207_v41  ;;  %v5183_v50 = vld [vmem:[#allocation101_spill] sm:$0xff]  ;;  %v5185_v25 = vld [vmem:[#allocation104_spill] sm:$0xff]  ;;  %v5189_v34 = vld [vmem:[#allocation94_spill] sm:$0xff] }
 0x25a   :  { %v2250_v20 = vadd.f32 %v2248_v32, %v2192_v18  ;;  %v2244_v45 = vadd.f32 %v4496_v17, %v2186_v26  ;;  %v2251_v0 = vadd.f32 %v4500_v44, %v2193_v31  ;;  %v2258_v6 = vadd.f32 %v4503_v7, %v2200_v35  ;;  %v5184_v18 = vld [vmem:[#allocation102_spill] sm:$0xff]  ;;  %v5186_v56 = vld [vmem:[#allocation93_spill] sm:$0xff]  ;;  %v5188_v31 = vld [vmem:[#allocation107_spill] sm:$0xff] }
 0x25b   :  { %v2266_v13 = vadd.f32 %v5179_v2, %v2208_v28  ;;  %v2274_v58 = vadd.f32 %v5180_v10, %v2216_v24  ;;  %v2282_v15 = vadd.f32 %v5181_v51, %v2228_v19  ;;  %v2290_v4 = vadd.f32 %v5182_v23, %v2236_v27  ;;  %v5187_v26 = vld [vmem:[#allocation105_spill] sm:$0xff]  ;;  %v2331_v24 = vpop.permute.xlu0 %2330  ;;  %v5191_v9 = vld [vmem:[#allocation66_spill] sm:$0xff]  ;;  %v5194_v51 = vld [vmem:[#allocation103_spill] sm:$0xff] }
 0x25c   :  { %v2298_v47 = vadd.f32 %v5183_v50, %v2244_v45  ;;  %v2305_v48 = vadd.f32 %v5184_v18, %v2251_v0  ;;  %v2312_v21 = vadd.f32 %v5185_v25, %v2258_v6  ;;  %v2453_v17 = vmul.f32 %v5186_v56, %v2449_v11  ;;  %v5197_v18 = vld [vmem:[#allocation88_spill] sm:$0xff] }
 0x25d   :  { %v2320_v44 = vadd.f32 %v5187_v26, %v2266_v13  ;;  %v2328_v7 = vadd.f32 %v5188_v31, %v2274_v58  ;;  %v2340_v35 = vadd.f32 %v4527_v52, %v2282_v15  ;;  %v2348_v28 = vadd.f32 %v4530_v63, %v2290_v4  ;;  %v5195_v15 = vld [vmem:[#allocation106_spill] sm:$0xff] }
 0x25e   :  { %v2356_v61 = vadd.f32 %v4533_v37, %v2298_v47  ;;  %v2363_v41 = vadd.f32 %v4537_v55, %v2305_v48  ;;  %v2370_v54 = vadd.f32 %v4540_v33, %v2312_v21  ;;  %v2461_v16 = vmul.f32 %v5189_v34, %v2449_v11  ;;  %v5192_v37 = vld [vmem:[#allocation95_spill] sm:$0xff]  ;;  %v5199_v21 = vld [vmem:[#allocation112_spill] sm:$0xff] }
 0x25f   :  { %v2378_v32 = vadd.f32 %v5190_v59, %v2320_v44  ;;  %v2386_v30 = vadd.f32 %v5191_v9, %v2328_v7  ;;  %v2398_v19 = vadd.f32 %v4563_v49, %v2340_v35  ;;  %v2406_v52 = vadd.f32 %v4573_v36, %v2348_v28  ;;  %v5200_v44 = vld [vmem:[#allocation113_spill] sm:$0xff]  ;;  %v5201_v7 = vld [vmem:[#allocation114_spill] sm:$0xff]  ;;  %v5202_v28 = vld [vmem:[#allocation115_spill] sm:$0xff] }
 0x260   :  { %v2414_v63 = vadd.f32 %v4579_v40, %v2356_v61  ;;  %v2421_v27 = vadd.f32 %v2419_v3, %v2363_v41  ;;  %v2428_v45 = vadd.f32 %v2425_v1, %v2370_v54  ;;  %v2469_v0 = vmul.f32 %v5192_v37, %v2449_v11  ;;  %v5196_v40 = vld [vmem:[#allocation111_spill] sm:$0xff]  ;;  %v5203_v54 = vld [vmem:[#allocation82_spill] sm:$0xff] }
 0x261   :  { %v2436_v55 = vadd.f32 %v2433_v42, %v2378_v32  ;;  %v2444_v6 = vadd.f32 %v2441_v8, %v2386_v30  ;;  %v4646_v2 = vadd.f32 %v2453_v17, %v2398_v19  ;;  %v4648_v33 = vadd.f32 %v2461_v16, %v2406_v52  ;;  %v2389_v8 = vpop.permute.xlu0 %2388  ;;  %v5204_v16 = vld [vmem:[#allocation83_spill] sm:$0xff]  ;;  %v5205_v32 = vld [vmem:[#allocation84_spill] sm:$0xff]  ;;  %v5206_v30 = vld [vmem:[#allocation12_spill] sm:$0xff] }
 0x262   :  { %v4650_v13 = vadd.f32 %v2469_v0, %v2414_v63  ;;  %v5193_v10 = vstv %s4137_s28  ;;  %v2483_v49 = vmul.f32 %v5194_v51, %v2449_v11  ;;  %v2491_v36 = vmul.f32 %v5195_v15, %v2449_v11  ;;  %v5209_v63 = vld [vmem:[#allocation85_spill] sm:$0xff]  ;;  %v5211_v0 = vld [vmem:[#allocation87_spill] sm:$0xff] }
 0x263   :  { %v2477_v58 = vmul.f32 %v5193_v10, %v2449_v11  ;;  %v2273_v23 = vadd.f32 %v2270_v60, %v2215_v57  ;;  %v2499_v3 = vmul.f32 %v5196_v40, %v2449_v11  ;;  %v2505_v1 = vrot.slane %v4646_v2, 5  ;;  %v5198_v60 = vld [vmem:[#allocation89_spill] sm:$0xff] }
 0x264   :  { %v2515_v42 = vrot.slane %v4648_v33, 6  ;;  %v4661_v50 = vadd.f32 %v2483_v49, %v2428_v45  ;;  %v4663_v47 = vadd.f32 %v2491_v36, %v2436_v55  ;;  %v2281_v48 = vadd.f32 %v5197_v18, %v2227_v5 }
 0x265   :  { %v4659_v4 = vadd.f32 %v2477_v58, %v2421_v27  ;;  %v4666_v25 = vadd.f32 %v2499_v3, %v2444_v6  ;;  %v2523_v57 = vrot.slane %v4650_v13, 7  ;;  %v2289_v11 = vadd.f32 %v5198_v60, %v2235_v14  ;;  %v5207_v14 = vld [vmem:[#allocation116_spill] sm:$0xff]  ;;  %v5210_v27 = vld [vmem:[#allocation86_spill] sm:$0xff]  ;;  %v2447_v10 = vpop.permute.xlu0 %2446 }
 0x266   :  { %v2297_v17 = vadd.f32 %v5199_v21, %v2243_v39  ;;  %v2531_v26 = vrot.slane %v4661_v50, 1  ;;  %v2304_v31 = vadd.f32 %v5200_v44, %v2250_v20  ;;  %v2311_v35 = vadd.f32 %v5201_v7, %v2257_v62 }
 0x267   :  { %v2319_v61 = vadd.f32 %v5202_v28, %v2265_v43  ;;  %v2539_v41 = vrot.slane %v4663_v47, 2  ;;  %v2336_v5 = vmul.f32 %v5203_v54, %v2331_v24  ;;  %v2344_v59 = vmul.f32 %v5204_v16, %v2331_v24 }
 0x268   :  { %v2352_v9 = vmul.f32 %v5205_v32, %v2331_v24  ;;  %vm2509_vm12 = vcmp.lt.s32.totalorder %v5206_v30, 3  ;;  %v2327_v39 = vadd.f32 %v5207_v14, %v2273_v23  ;;  %v5208_v19 = vstv %s3997_s21 }
 0x269   :  { %v2360_v52 = vmul.f32 %v5208_v19, %v2331_v24  ;;  %v2366_v20 = vmul.f32 %v5209_v63, %v2331_v24  ;;  %v2374_v62 = vmul.f32 %v5210_v27, %v2331_v24  ;;  %v2339_v43 = vadd.f32 %v2336_v5, %v2281_v48 }
 0x26a   :  { %v2347_v45 = vadd.f32 %v2344_v59, %v2289_v11  ;;  %v2382_v55 = vmul.f32 %v5211_v0, %v2331_v24  ;;  %v2394_v6 = vmul.f32 %v5150_v29, %v2389_v8  ;;  %vm2517_vm13 = vcmp.lt.s32.totalorder %v5206_v30, 2 }
 0x26b   :  { %v2355_v58 = vadd.f32 %v2352_v9, %v2297_v17  ;;  %v2362_v49 = vadd.f32 %v2360_v52, %v2304_v31  ;;  %v2369_v36 = vadd.f32 %v2366_v20, %v2311_v35  ;;  %v2377_v23 = vadd.f32 %v2374_v62, %v2319_v61 }
 0x26c   :  { %vm2525_vm14 = vcmp.lt.s32.totalorder %v5206_v30, 1  ;;  %vm2533_vm15 = vcmp.lt.s32.totalorder %v5206_v30, 7  ;;  %v2402_v3 = vmul.f32 %v5158_v38, %v2389_v8  ;;  %v2410_v18 = vmul.f32 %v5159_v46, %v2389_v8 }
 0x26d   :  { %v5212_v48 = vstv %s4019_s2  ;;  %v2424_v29 = vmul.f32 %v5161_v22, %v2389_v8  ;;  %vm2541_vm0 = vcmp.lt.s32.totalorder %v5206_v30, 6  ;;  %v2432_v24 = vmul.f32 %v5162_v53, %v2389_v8 }
 0x26e   :  { %v2418_v60 = vmul.f32 %v5212_v48, %v2389_v8  ;;  %v2440_v11 = vmul.f32 %v5168_v12, %v2389_v8  ;;  %v2397_v21 = vadd.f32 %v2394_v6, %v2339_v43  ;;  %v2452_v17 = vmul.f32 %v5186_v56, %v2447_v10  ;;  %v5216_v43 = vld [vmem:[#allocation109_spill] sm:$0xff]  ;;  %v5218_v6 = vld [vmem:[#allocation110_spill] sm:$0xff] }
 0x26f   :  { %v2385_v44 = vadd.f32 %v2382_v55, %v2327_v39  ;;  %v2405_v31 = vadd.f32 %v2402_v3, %v2347_v45  ;;  %v2413_v7 = vadd.f32 %v2410_v18, %v2355_v58  ;;  %v2427_v35 = vadd.f32 %v2424_v29, %v2369_v36  ;;  %v5221_v36 = vld [vmem:[#allocation117_spill] sm:$0xff]  ;;  %v5222_v18 = vld [vmem:[#allocation118_spill] sm:$0xff] }
 0x270   :  { %v2420_v38 = vadd.f32 %v2418_v60, %v2362_v49  ;;  %v2435_v46 = vadd.f32 %v2432_v24, %v2377_v23  ;;  %v2455_v28 = vadd.f32 %v2452_v17, %v2397_v21  ;;  %v2460_v61 = vmul.f32 %v5189_v34, %v2447_v10  ;;  %v5223_v21 = vld [vmem:[#allocation120_spill] sm:$0xff] }
 0x271   :  { %v2468_v22 = vmul.f32 %v5192_v37, %v2447_v10  ;;  %v5213_v54 = vstv %s4137_s28  ;;  %v2482_v53 = vmul.f32 %v5194_v51, %v2447_v10  ;;  %v2490_v12 = vmul.f32 %v5195_v15, %v2447_v10  ;;  %v5214_v37 = vld [vmem:[#allocation108_spill] sm:$0xff] }
 0x272   :  { %v2476_v5 = vmul.f32 %v5213_v54, %v2447_v10  ;;  %v2443_v8 = vadd.f32 %v2440_v11, %v2385_v44  ;;  %v2463_v16 = vadd.f32 %v2460_v61, %v2405_v31  ;;  %v2498_v56 = vmul.f32 %v5196_v40, %v2447_v10 }
 0x273   :  { %v2504_v59 = vrot.slane %v2455_v28, 5  ;;  %v2471_v32 = vadd.f32 %v2468_v22, %v2413_v7  ;;  %v2485_v14 = vadd.f32 %v2482_v53, %v2427_v35  ;;  %v2493_v39 = vadd.f32 %v2490_v12, %v2435_v46 }
 0x274   :  { %v2478_v9 = vadd.f32 %v2476_v5, %v2420_v38  ;;  %v2501_v19 = vadd.f32 %v2498_v56, %v2443_v8  ;;  %v5215_v52 = vrot.slane %v5214_v37, 5  ;;  %v2514_v15 = vrot.slane %v2463_v16, 6 }
 0x275   :  { %v2510_v34 = vsel %vm2509_vm12, %v2504_v59, %v2505_v1  ;;  %v2522_v20 = vrot.slane %v2471_v32, 7  ;;  %v2530_v40 = vrot.slane %v2485_v14, 1  ;;  %v2538_v27 = vrot.slane %v2493_v39, 2 }
 0x276   :  { %v2511_v51 = vsel %vm2509_vm12, %v5215_v52, %v2504_v59  ;;  %v2513_v62 = vadd.f32 %v2510_v34, %v4659_v4  ;;  %v2518_v2 = vsel %vm2517_vm13, %v2514_v15, %v2515_v42  ;;  %v5217_v45 = vrot.slane %v5216_v43, 6 }
 0x277   :  { %v2512_v63 = vadd.f32 %v2511_v51, %v2478_v9  ;;  %vm2549_vm1 = vcmp.lt.s32.totalorder %v5206_v30, 5  ;;  %v2526_v55 = vsel %vm2525_vm14, %v2522_v20, %v2523_v57  ;;  %v5219_v4 = vrot.slane %v5218_v6, 7  ;;  %v5220_v57 = vld [vmem:[#allocation119_spill] sm:$0xff] }
 0x278   :  { %v2519_v1 = vsel %vm2517_vm13, %v5217_v45, %v2514_v15  ;;  %v2535_v42 = vsel %vm2533_vm15, %v2530_v40, %v2531_v26  ;;  %v2521_v10 = vadd.f32 %v2518_v2, %v2513_v62  ;;  %v2543_v58 = vsel %vm2541_vm0, %v2538_v27, %v2539_v41 }
 0x279   :  { %v2520_v0 = vadd.f32 %v2519_v1, %v2512_v63  ;;  %v2527_v33 = vsel %vm2525_vm14, %v5219_v4, %v2522_v20  ;;  %v2546_v13 = vrot.slane %v2501_v19, 3  ;;  %v2547_v49 = vrot.slane %v4666_v25, 3 }
 0x27a   :  { %v2503_v23 = vadd.f32 %v5221_v36, %v5220_v57  ;;  %v2532_v48 = vrot.slane %v5222_v18, 1  ;;  %v2529_v60 = vadd.f32 %v2526_v55, %v2521_v10  ;;  %v2540_v17 = vrot.slane %v5223_v21, 2 }
 0x27b   :  { %v2528_v3 = vadd.f32 %v2527_v33, %v2520_v0  ;;  %v2551_v29 = vsel %vm2549_vm1, %v2546_v13, %v2547_v49  ;;  %v2555_v35 = vstv %s5224_s30 }
 0x27c   :  { %v2534_v24 = vsel %vm2533_vm15, %v2531_v26, %v2532_v48  ;;  %v2542_v25 = vsel %vm2541_vm0, %v2539_v41, %v2540_v17  ;;  %v2548_v7 = vrot.slane %v2503_v23, 3 }
 0x27d   :  { %v2536_v11 = vadd.f32 %v2535_v42, %v2528_v3  ;;  %v2537_v44 = vadd.f32 %v2534_v24, %v2529_v60 }
 0x27e   :  { %v2550_v50 = vsel %vm2549_vm1, %v2547_v49, %v2548_v7 }
 0x27f   :  { %v2544_v31 = vadd.f32 %v2543_v58, %v2536_v11  ;;  %v2545_v38 = vadd.f32 %v2542_v25, %v2537_v44 }
 0x281   :  { %v2552_v26 = vadd.f32 %v2551_v29, %v2544_v31  ;;  %v2553_v46 = vadd.f32 %v2550_v50, %v2545_v38 }
 0x283   :  { %v2556_v28 = vadd.f32 %v2555_v35, %v2552_v26  ;;  %v2557_v61 = vadd.f32 %v2555_v35, %v2553_v46 }
 0x285   :  { %v2560_v22 = vand.u32 2147483647, %v2556_v28  ;;  %v2561_v54 = vand.u32 2147483647, %v2557_v61  ;;  %v2558_v51 = vmin.f32 %v2556_v28, 0.0  ;;  %v2559_v20 = vmin.f32 %v2557_v61, 0.0 }
 0x287   :  { %v2562_v47 = vsub.f32 0.0, %v2560_v22  ;;  %v2563_v5 = vsub.f32 0.0, %v2561_v54 }
 0x289   :  { %v2564_v53 = vmul.f32 1.442695, %v2562_v47  ;;  %v2566_v41 = vmul.f32 1.442695, %v2563_v5 }
 0x28b   :  { %2730 = vpow2.f32 %v2564_v53 }
 0x28c   :  { %2732 = vpow2.f32 %v2566_v41 }
 0x298   :  { %v2731_v12 = vpop.eup %2730 }
 0x299   :  { %v2733_v8 = vpop.eup %2732  ;;  %v2568_v16 = vadd.f32 1.0, %v2731_v12  ;;  %v2571_v30 = vmul.f32 -0.5, %v2731_v12  ;;  %v2574_v9 = vand.u32 2147483647, %v2731_v12 }
 0x29a   :  { %v2577_v56 = vadd.f32 1.0, %v2733_v8  ;;  %v2580_v59 = vmul.f32 -0.5, %v2733_v8  ;;  %v2583_v39 = vand.u32 2147483647, %v2733_v8 }
 0x29b   :  { %2734 = vlog2.f32 %v2568_v16  ;;  %v2572_v32 = vadd.f32 1.0, %v2571_v30  ;;  %vm2575_vm2 = vcmp.lt.f32.partialorder %v2574_v9, 0.0004427343 }
 0x29c   :  { %2736 = vlog2.f32 %v2577_v56  ;;  %v2581_v14 = vadd.f32 1.0, %v2580_v59  ;;  %vm2584_vm3 = vcmp.lt.f32.partialorder %v2583_v39, 0.0004427343 }
 0x29d   :  { %v2573_v52 = vmul.f32 %v2731_v12, %v2572_v32 }
 0x29e   :  { %v2582_v63 = vmul.f32 %v2733_v8, %v2581_v14 }
 0x2a8   :  { %v2735_v19 = vpop.eup %2734 }
 0x2a9   :  { %v2737_v34 = vpop.eup %2736  ;;  %v2570_v37 = vmul.f32 0.6931472, %v2735_v19 }
 0x2aa   :  { %v2579_v15 = vmul.f32 0.6931472, %v2737_v34 }
 0x2ab   :  { %v2576_v40 = vsel %vm2575_vm2, %v2573_v52, %v2570_v37 }
 0x2ac   :  { %v2585_v27 = vsel %vm2584_vm3, %v2582_v63, %v2579_v15  ;;  %v2586_v62 = vsub.f32 %v2558_v51, %v2576_v40 }
 0x2ad   :  { %v2587_v2 = vsub.f32 %v2559_v20, %v2585_v27 }
 0x2ae   :  { %2588 = vst [vmem:[#allocation8] sm:$0xff] %v2586_v62 }
 0x2af   :  { %2589 = vst [vmem:[#allocation8 + $0x8] sm:$0xff] %v2587_v2 }
 0x2b0   :  { %2781 = shalt.err (!%p2778_p0)
}
 0x2b1   :  { %s5225_s4 = smov 8   ;;  %s5226_s5 = smov 128  }
 0x2b2   :  { %s5227_s7 = sld [smem:[#allocation137_spill]] }
 0x2b8   :  { %2601 = dma.vmem_to_hbm [thread:$0]  %s2596_s26, 256, %s5227_s7, [#allocation5], %s5226_s5, %s5226_s5, %s5225_s4  }
 0x2b9   :  { %2794 = dma.done.wait [#allocation5], 256  }
 0x2ba   :  { %2795 = vsyncadd [#allocation5], 4294967040 }
 0x2bb   :  { %2605 = vsyncpa [#allocation4], 1 }
 0x2bc   :  { %2606 = vsyncpa [#allocation5], 1 }
 0x2bd   :  { %2607 = vsyncpa [#allocation6], 1 }

</bundles_post_ra>
